<compile_context>
chip_gen: v7x
topology: tpu7x:2x2x1
jax: 0.10.0
libtpu: 0.0.40
codegen_flags: <defaults>
</compile_context>

<pallas_src>
import jax
import jax.numpy as jnp
from jax.experimental import pallas as pl
from jax.experimental.pallas import tpu as pltpu


# ----------------------------- Pallas kernel ------------------------------- #
def _nino_mlp_kernel(x_ref, tab_ref, wp_ref, w1_ref, w2_ref, w3_ref, w4_ref,
                     bias_ref, b4_ref, out_ref):
    """Fused edge_proj + embedding gather + 4-layer SiLU MLP (last layer sliced to
    step k) + residual add, for one lane-tile of (E*F) rows. Rows are on lanes.

    x_ref holds (ctx+1, TN): rows 0..ctx-1 are the ctx context features, row ctx is
    float(edge_type) for that row (exact small integers)."""
    x = x_ref[...]                                  # (ctx+1, TN) f32
    ctx = x.shape[0] - 1
    tn = x.shape[1]
    n_types = tab_ref.shape[1]

    # one-hot(edge_type): (edge_types, TN); gathers (layer_embed + edge_proj bias)
    et_i = x[ctx:ctx + 1, :].astype(jnp.int32)      # (1, TN)
    onehot = (jax.lax.broadcasted_iota(jnp.int32, (n_types, tn), 0) == et_i
              ).astype(jnp.float32)

    def silu(z):
        # single EUP exp per element + approximate EUP reciprocal (stays off the VPU)
        return z * pl.reciprocal(1.0 + jnp.exp(-z), approx=True)

    # edge_proj (W @ X; wp is zero-padded with an extra column so the edge_type row
    # contributes nothing) + embedding gather (bias folded into the table)
    h = (jnp.dot(wp_ref[...], x, preferred_element_type=jnp.float32)
         + jnp.dot(tab_ref[...], onehot, preferred_element_type=jnp.float32))   # (hid, TN)

    # edge_mlp: 3x (Linear(hid,hid) + SiLU)
    h = silu(jnp.dot(w1_ref[...], h, preferred_element_type=jnp.float32) + bias_ref[:, 0:1])
    h = silu(jnp.dot(w2_ref[...], h, preferred_element_type=jnp.float32) + bias_ref[:, 1:2])
    h = silu(jnp.dot(w3_ref[...], h, preferred_element_type=jnp.float32) + bias_ref[:, 2:3])

    # final Linear sliced to row (k-1): hid -> 1, bias scalar from SMEM
    y = jnp.dot(w4_ref[...], h, preferred_element_type=jnp.float32) + b4_ref[0]  # (1, TN)

    # residual: edge_attr[:, :, ctx-1] is sublane-row ctx-1 of x (NOT the last row,
    # which is the folded edge_type row)
    out_ref[...] = (y + x[ctx - 1:ctx, :]).astype(out_ref.dtype)


# ------------------------------- wrapper ------------------------------------ #
def nino_forward(edge_attr, edge_type, params, *, k, ctx, hid, tile_n=2048):
    """NiNoModel.forward, is_mlp branch, eval mode, dms step k (1-indexed).

    edge_attr: (E, F*ctx) float32
    edge_type: (E,)       int32
    returns:   (E, F, 1)  float32
    """
    E, FC = edge_attr.shape
    assert FC % ctx == 0
    F = FC // ctx
    N = E * F

    seq_len = params["mlp_b4"].shape[0]
    assert 1 <= k <= seq_len, (k, seq_len)
    assert tile_n % 128 == 0, tile_n

    n_types = params["layer_embed"].shape[0]

    # rows on lanes: (ctx, N), with float(edge_type) appended as sublane row `ctx`
    x_t = edge_attr.reshape(N, ctx).astype(jnp.float32).T                     # (ctx, N)
    et_row = jnp.broadcast_to(edge_type.astype(jnp.float32)[:, None],
                              (E, F)).reshape(1, N)                           # (1, N)
    x_aug = jnp.concatenate([x_t, et_row], axis=0)                            # (ctx+1, N)

    # (layer_embed + edge_proj bias) table, transposed for table @ onehot
    tab_t = (params["layer_embed"] + params["edge_proj_b"][None, :]).T        # (hid, n_types)

    # torch Linear weights are (out, in) == exactly what W @ X needs; zero-pad edge_proj
    # with one extra column so the folded edge_type row contributes nothing
    wp_ext = jnp.concatenate([params["edge_proj_w"],
                              jnp.zeros((hid, 1), jnp.float32)], axis=1)      # (hid, ctx+1)
    w1 = params["mlp_w1"]                                                     # (hid, hid)
    w2 = params["mlp_w2"]
    w3 = params["mlp_w3"]
    w4k = params["mlp_w4"][k - 1:k, :]                                        # (1, hid)
    bias_stack = jnp.stack([params["mlp_b1"], params["mlp_b2"], params["mlp_b3"]],
                           axis=1)                                            # (hid, 3)
    b4k = params["mlp_b4"][k - 1:k]                                           # (1,) via SMEM

    grid = (pl.cdiv(N, tile_n),)   # ragged last block: input over-read, store masked

    out = pl.pallas_call(
        _nino_mlp_kernel,
        out_shape=jax.ShapeDtypeStruct((1, N), jnp.float32),
        grid_spec=pltpu.PrefetchScalarGridSpec(
            num_scalar_prefetch=0,
            grid=grid,
            in_specs=[
                pl.BlockSpec((ctx + 1, tile_n), lambda i: (0, i)),    # x rows + edge_type row
                pl.BlockSpec((hid, n_types), lambda i: (0, 0)),       # embed(+bp) table^T
                pl.BlockSpec((hid, ctx + 1), lambda i: (0, 0)),       # edge_proj W (padded)
                pl.BlockSpec((hid, hid), lambda i: (0, 0)),           # mlp W1
                pl.BlockSpec((hid, hid), lambda i: (0, 0)),           # mlp W2
                pl.BlockSpec((hid, hid), lambda i: (0, 0)),           # mlp W3
                pl.BlockSpec((1, hid), lambda i: (0, 0)),             # mlp W4[k-1]
                pl.BlockSpec((hid, 3), lambda i: (0, 0)),             # b1|b2|b3
                pl.BlockSpec(memory_space=pltpu.MemorySpace.SMEM),    # b4[k-1] scalar
            ],
            out_specs=pl.BlockSpec((1, tile_n), lambda i: (0, i)),    # lane-dense output
        ),
        compiler_params=pltpu.CompilerParams(
            dimension_semantics=("parallel",)),
    )(x_aug, tab_t, wp_ext, w1, w2, w3, w4k, bias_stack, b4k)

    return out[0, :].reshape(E, F, 1)


# -------------------------- pure-JAX reference ------------------------------ #
def nino_reference(edge_attr, edge_type, params, *, k, ctx, hid):
    E, FC = edge_attr.shape
    F = FC // ctx
    x = edge_attr.reshape(E, F, ctx).astype(jnp.float32)
    res = x[:, :, ctx - 1]                                              # (E, F)

    silu = lambda z: z * jax.nn.sigmoid(z)
    h = jnp.einsum("efc,hc->efh", x, params["edge_proj_w"]) + params["edge_proj_b"]
    h = h + params["layer_embed"][edge_type][:, None, :]
    h = silu(jnp.einsum("efh,oh->efo", h, params["mlp_w1"]) + params["mlp_b1"])
    h = silu(jnp.einsum("efh,oh->efo", h, params["mlp_w2"]) + params["mlp_b2"])
    h = silu(jnp.einsum("efh,oh->efo", h, params["mlp_w3"]) + params["mlp_b3"])
    y = jnp.einsum("efh,oh->efo", h, params["mlp_w4"][k - 1:k, :]) + params["mlp_b4"][k - 1]
    return res[..., None] + y                                           # (E, F, 1)


# ------------------------------ param init ---------------------------------- #
def init_params(key, *, ctx, hid, seq_len, edge_types, std=0.02):
    """Matches NiNoModel._init_weights: Linear/Embedding weights ~ N(0, 0.02), biases zero."""
    ks = jax.random.split(key, 6)
    return {
        "layer_embed": std * jax.random.normal(ks[0], (edge_types, hid), jnp.float32),
        "edge_proj_w": std * jax.random.normal(ks[1], (hid, ctx), jnp.float32),
        "edge_proj_b": jnp.zeros((hid,), jnp.float32),
        "mlp_w1": std * jax.random.normal(ks[2], (hid, hid), jnp.float32),
        "mlp_b1": jnp.zeros((hid,), jnp.float32),
        "mlp_w2": std * jax.random.normal(ks[3], (hid, hid), jnp.float32),
        "mlp_b2": jnp.zeros((hid,), jnp.float32),
        "mlp_w3": std * jax.random.normal(ks[4], (hid, hid), jnp.float32),
        "mlp_b3": jnp.zeros((hid,), jnp.float32),
        "mlp_w4": std * jax.random.normal(ks[5], (seq_len, hid), jnp.float32),
        "mlp_b4": jnp.zeros((seq_len,), jnp.float32),
    }


# --------------------------------- main -------------------------------------- #
if __name__ == "__main__":
    # Small config consistent with NiNoModel(gnn=False): ctx=5, hid=32, seq_len=8, edge_types=15
    ctx, hid, seq_len, edge_types = 5, 32, 8, 15
    # 2500 edges x 2 feature slots -> N=5000 rows: 3 grid steps at tile_n=2048, with a
    # ragged last tile exercising the masked-boundary store path.
    E, F = 2500, 2
    k = 3                   # dms prediction step (1-indexed)

    key = jax.random.PRNGKey(0)
    k_param, k_x, k_t = jax.random.split(key, 3)

    params = init_params(k_param, ctx=ctx, hid=hid, seq_len=seq_len, edge_types=edge_types)
    edge_attr = jax.random.normal(k_x, (E, F * ctx), jnp.float32)
    edge_type = jax.random.randint(k_t, (E,), 0, edge_types, jnp.int32)

    out = nino_forward(edge_attr, edge_type, params, k=k, ctx=ctx, hid=hid)
    out = jax.block_until_ready(out)

    ref = nino_reference(edge_attr, edge_type, params, k=k, ctx=ctx, hid=hid)
    assert out.shape == (E, F, 1), out.shape
    assert jnp.allclose(out, ref, rtol=1e-4, atol=1e-4), float(jnp.max(jnp.abs(out - ref)))

    print("KERNEL_OK")
</pallas_src>

<mosaic_0001>
module attributes {stable_mosaic.version = 11 : i64} {
  func.func @_nino_mlp_kernel(%arg0: i32, %arg1: memref<6x2048xf32, #tpu.memory_space<vmem>>, %arg2: memref<32x15xf32, #tpu.memory_space<vmem>>, %arg3: memref<32x6xf32, #tpu.memory_space<vmem>>, %arg4: memref<32x32xf32, #tpu.memory_space<vmem>>, %arg5: memref<32x32xf32, #tpu.memory_space<vmem>>, %arg6: memref<32x32xf32, #tpu.memory_space<vmem>>, %arg7: memref<1x32xf32, #tpu.memory_space<vmem>>, %arg8: memref<32x3xf32, #tpu.memory_space<vmem>>, %arg9: memref<1xf32, #tpu.memory_space<smem>>, %arg10: memref<1x2048xf32, #tpu.memory_space<vmem>>) attributes {dimension_semantics = [#tpu.dimension_semantics<parallel>], iteration_bounds = array<i64: 3>, scalar_prefetch = 0 : i64, scratch_operands = 0 : i64, tpu.core_type = #tpu.core_type<tc>, window_params = [{transform_indices = @transform_0, window_bounds = array<i64: 6, 2048>}, {pipeline_mode = #tpu.pipeline_mode<synchronous>, transform_indices = @transform_1, window_bounds = array<i64: 32, 15>}, {pipeline_mode = #tpu.pipeline_mode<synchronous>, transform_indices = @transform_2, window_bounds = array<i64: 32, 6>}, {pipeline_mode = #tpu.pipeline_mode<synchronous>, transform_indices = @transform_3, window_bounds = array<i64: 32, 32>}, {pipeline_mode = #tpu.pipeline_mode<synchronous>, transform_indices = @transform_4, window_bounds = array<i64: 32, 32>}, {pipeline_mode = #tpu.pipeline_mode<synchronous>, transform_indices = @transform_5, window_bounds = array<i64: 32, 32>}, {pipeline_mode = #tpu.pipeline_mode<synchronous>, transform_indices = @transform_6, window_bounds = array<i64: 1, 32>}, {pipeline_mode = #tpu.pipeline_mode<synchronous>, transform_indices = @transform_7, window_bounds = array<i64: 32, 3>}, {transform_indices = @transform_8, window_bounds = array<i64: 1>}, {transform_indices = @transform_9, window_bounds = array<i64: 1, 2048>}]} {
    %c0 = arith.constant 0 : index
    %c0_0 = arith.constant 0 : index
    %0 = vector.load %arg1[%c0, %c0_0] : memref<6x2048xf32, #tpu.memory_space<vmem>>, vector<6x2048xf32>
    %1 = vector.extract_strided_slice %0 {offsets = [5, 0], sizes = [1, 2048], strides = [1, 1]} : vector<6x2048xf32> to vector<1x2048xf32>
    %2 = arith.fptosi %1 : vector<1x2048xf32> to vector<1x2048xi32>
    %3 = tpu.iota {dimensions = array<i32: 0>} : vector<15x2048xi32>
    %4 = vector.broadcast %2 : vector<1x2048xi32> to vector<15x2048xi32>
    %5 = arith.cmpi eq, %3, %4 : vector<15x2048xi32>
    %6 = arith.extui %5 : vector<15x2048xi1> to vector<15x2048xi32>
    %7 = arith.sitofp %6 : vector<15x2048xi32> to vector<15x2048xf32>
    %c0_1 = arith.constant 0 : index
    %c0_2 = arith.constant 0 : index
    %8 = vector.load %arg3[%c0_1, %c0_2] : memref<32x6xf32, #tpu.memory_space<vmem>>, vector<32x6xf32>
    %cst = arith.constant dense<0.000000e+00> : vector<32x2048xf32>
    %9 = tpu.matmul %8, %0, %cst {dimension_numbers = #tpu.dot_dimension_numbers<[1], [0], [0], [1], [0, 0, 1, 1], [], []>} : vector<32x6xf32>, vector<6x2048xf32>, vector<32x2048xf32> -> vector<32x2048xf32>
    %c0_3 = arith.constant 0 : index
    %c0_4 = arith.constant 0 : index
    %10 = vector.load %arg2[%c0_3, %c0_4] : memref<32x15xf32, #tpu.memory_space<vmem>>, vector<32x15xf32>
    %cst_5 = arith.constant dense<0.000000e+00> : vector<32x2048xf32>
    %11 = tpu.matmul %10, %7, %cst_5 {dimension_numbers = #tpu.dot_dimension_numbers<[1], [0], [0], [1], [0, 0, 1, 1], [], []>} : vector<32x15xf32>, vector<15x2048xf32>, vector<32x2048xf32> -> vector<32x2048xf32>
    %12 = arith.addf %9, %11 : vector<32x2048xf32>
    %c0_6 = arith.constant 0 : index
    %c0_7 = arith.constant 0 : index
    %13 = vector.load %arg4[%c0_6, %c0_7] : memref<32x32xf32, #tpu.memory_space<vmem>>, vector<32x32xf32>
    %cst_8 = arith.constant dense<0.000000e+00> : vector<32x2048xf32>
    %14 = tpu.matmul %13, %12, %cst_8 {dimension_numbers = #tpu.dot_dimension_numbers<[1], [0], [0], [1], [0, 0, 1, 1], [], []>} : vector<32x32xf32>, vector<32x2048xf32>, vector<32x2048xf32> -> vector<32x2048xf32>
    %c0_9 = arith.constant 0 : index
    %c0_10 = arith.constant 0 : index
    %15 = vector.load %arg8[%c0_9, %c0_10] : memref<32x3xf32, #tpu.memory_space<vmem>>, vector<32x1xf32>
    %16 = vector.broadcast %15 : vector<32x1xf32> to vector<32x2048xf32>
    %17 = arith.addf %14, %16 : vector<32x2048xf32>
    %cst_11 = arith.constant 0.000000e+00 : f32
    %18 = vector.broadcast %cst_11 : f32 to vector<32x2048xf32>
    %19 = arith.subf %18, %17 : vector<32x2048xf32>
    %20 = math.exp %19 : vector<32x2048xf32>
    %cst_12 = arith.constant 1.000000e+00 : f32
    %21 = vector.broadcast %cst_12 : f32 to vector<32x2048xf32>
    %22 = arith.addf %21, %20 : vector<32x2048xf32>
    %23 = tpu.reciprocal %22 {approx = true} : vector<32x2048xf32> -> vector<32x2048xf32>
    %24 = arith.mulf %17, %23 : vector<32x2048xf32>
    %c0_13 = arith.constant 0 : index
    %c0_14 = arith.constant 0 : index
    %25 = vector.load %arg5[%c0_13, %c0_14] : memref<32x32xf32, #tpu.memory_space<vmem>>, vector<32x32xf32>
    %cst_15 = arith.constant dense<0.000000e+00> : vector<32x2048xf32>
    %26 = tpu.matmul %25, %24, %cst_15 {dimension_numbers = #tpu.dot_dimension_numbers<[1], [0], [0], [1], [0, 0, 1, 1], [], []>} : vector<32x32xf32>, vector<32x2048xf32>, vector<32x2048xf32> -> vector<32x2048xf32>
    %c0_16 = arith.constant 0 : index
    %c1 = arith.constant 1 : index
    %27 = vector.load %arg8[%c0_16, %c1] : memref<32x3xf32, #tpu.memory_space<vmem>>, vector<32x1xf32>
    %28 = vector.broadcast %27 : vector<32x1xf32> to vector<32x2048xf32>
    %29 = arith.addf %26, %28 : vector<32x2048xf32>
    %cst_17 = arith.constant 0.000000e+00 : f32
    %30 = vector.broadcast %cst_17 : f32 to vector<32x2048xf32>
    %31 = arith.subf %30, %29 : vector<32x2048xf32>
    %32 = math.exp %31 : vector<32x2048xf32>
    %cst_18 = arith.constant 1.000000e+00 : f32
    %33 = vector.broadcast %cst_18 : f32 to vector<32x2048xf32>
    %34 = arith.addf %33, %32 : vector<32x2048xf32>
    %35 = tpu.reciprocal %34 {approx = true} : vector<32x2048xf32> -> vector<32x2048xf32>
    %36 = arith.mulf %29, %35 : vector<32x2048xf32>
    %c0_19 = arith.constant 0 : index
    %c0_20 = arith.constant 0 : index
    %37 = vector.load %arg6[%c0_19, %c0_20] : memref<32x32xf32, #tpu.memory_space<vmem>>, vector<32x32xf32>
    %cst_21 = arith.constant dense<0.000000e+00> : vector<32x2048xf32>
    %38 = tpu.matmul %37, %36, %cst_21 {dimension_numbers = #tpu.dot_dimension_numbers<[1], [0], [0], [1], [0, 0, 1, 1], [], []>} : vector<32x32xf32>, vector<32x2048xf32>, vector<32x2048xf32> -> vector<32x2048xf32>
    %c0_22 = arith.constant 0 : index
    %c2 = arith.constant 2 : index
    %39 = vector.load %arg8[%c0_22, %c2] : memref<32x3xf32, #tpu.memory_space<vmem>>, vector<32x1xf32>
    %40 = vector.broadcast %39 : vector<32x1xf32> to vector<32x2048xf32>
    %41 = arith.addf %38, %40 : vector<32x2048xf32>
    %cst_23 = arith.constant 0.000000e+00 : f32
    %42 = vector.broadcast %cst_23 : f32 to vector<32x2048xf32>
    %43 = arith.subf %42, %41 : vector<32x2048xf32>
    %44 = math.exp %43 : vector<32x2048xf32>
    %cst_24 = arith.constant 1.000000e+00 : f32
    %45 = vector.broadcast %cst_24 : f32 to vector<32x2048xf32>
    %46 = arith.addf %45, %44 : vector<32x2048xf32>
    %47 = tpu.reciprocal %46 {approx = true} : vector<32x2048xf32> -> vector<32x2048xf32>
    %48 = arith.mulf %41, %47 : vector<32x2048xf32>
    %c0_25 = arith.constant 0 : index
    %c0_26 = arith.constant 0 : index
    %49 = vector.load %arg7[%c0_25, %c0_26] : memref<1x32xf32, #tpu.memory_space<vmem>>, vector<1x32xf32>
    %cst_27 = arith.constant dense<0.000000e+00> : vector<1x2048xf32>
    %50 = tpu.matmul %49, %48, %cst_27 {dimension_numbers = #tpu.dot_dimension_numbers<[1], [0], [0], [1], [0, 0, 1, 1], [], []>} : vector<1x32xf32>, vector<32x2048xf32>, vector<1x2048xf32> -> vector<1x2048xf32>
    %c0_28 = arith.constant 0 : index
    %51 = memref.load %arg9[%c0_28] : memref<1xf32, #tpu.memory_space<smem>>
    %52 = vector.broadcast %51 : f32 to vector<1x2048xf32>
    %53 = arith.addf %50, %52 : vector<1x2048xf32>
    %54 = vector.extract_strided_slice %0 {offsets = [4, 0], sizes = [1, 2048], strides = [1, 1]} : vector<6x2048xf32> to vector<1x2048xf32>
    %55 = arith.addf %53, %54 : vector<1x2048xf32>
    %c0_29 = arith.constant 0 : index
    %c0_30 = arith.constant 0 : index
    %56 = vector.load %arg10[%c0_29, %c0_30] : memref<1x2048xf32, #tpu.memory_space<vmem>>, vector<1x2048xf32>
    tpu.vector_store %arg10[%c0_29, %c0_30], %55 {strides = array<i32>} : memref<1x2048xf32, #tpu.memory_space<vmem>>, vector<1x2048xf32>,
    return
  }
  func.func @transform_0(%arg0: i32) -> (i32, i32) {
    %c0_i32 = arith.constant 0 : i32
    %c0_i32_0 = arith.constant 0 : i32
    return %c0_i32, %arg0 : i32, i32
  }
  func.func @transform_1(%arg0: i32) -> (i32, i32) {
    %c0_i32 = arith.constant 0 : i32
    %c0_i32_0 = arith.constant 0 : i32
    %c0_i32_1 = arith.constant 0 : i32
    return %c0_i32, %c0_i32_0 : i32, i32
  }
  func.func @transform_2(%arg0: i32) -> (i32, i32) {
    %c0_i32 = arith.constant 0 : i32
    %c0_i32_0 = arith.constant 0 : i32
    %c0_i32_1 = arith.constant 0 : i32
    return %c0_i32, %c0_i32_0 : i32, i32
  }
  func.func @transform_3(%arg0: i32) -> (i32, i32) {
    %c0_i32 = arith.constant 0 : i32
    %c0_i32_0 = arith.constant 0 : i32
    %c0_i32_1 = arith.constant 0 : i32
    return %c0_i32, %c0_i32_0 : i32, i32
  }
  func.func @transform_4(%arg0: i32) -> (i32, i32) {
    %c0_i32 = arith.constant 0 : i32
    %c0_i32_0 = arith.constant 0 : i32
    %c0_i32_1 = arith.constant 0 : i32
    return %c0_i32, %c0_i32_0 : i32, i32
  }
  func.func @transform_5(%arg0: i32) -> (i32, i32) {
    %c0_i32 = arith.constant 0 : i32
    %c0_i32_0 = arith.constant 0 : i32
    %c0_i32_1 = arith.constant 0 : i32
    return %c0_i32, %c0_i32_0 : i32, i32
  }
  func.func @transform_6(%arg0: i32) -> (i32, i32) {
    %c0_i32 = arith.constant 0 : i32
    %c0_i32_0 = arith.constant 0 : i32
    %c0_i32_1 = arith.constant 0 : i32
    return %c0_i32, %c0_i32_0 : i32, i32
  }
  func.func @transform_7(%arg0: i32) -> (i32, i32) {
    %c0_i32 = arith.constant 0 : i32
    %c0_i32_0 = arith.constant 0 : i32
    %c0_i32_1 = arith.constant 0 : i32
    return %c0_i32, %c0_i32_0 : i32, i32
  }
  func.func @transform_8(%arg0: i32) -> i32 {
    %c0_i32 = arith.constant 0 : i32
    %c0_i32_0 = arith.constant 0 : i32
    return %c0_i32 : i32
  }
  func.func @transform_9(%arg0: i32) -> (i32, i32) {
    %c0_i32 = arith.constant 0 : i32
    %c0_i32_0 = arith.constant 0 : i32
    return %c0_i32, %arg0 : i32, i32
  }
}

</mosaic_0001>

<bundles_post_ra>
// kernel: tpu_custom_call.1
= control target key start
LH: loop header
LB: loop body
LE: loop exit
PB: predicated region body
PF: predicated region fallthrough
CT: control target
= control target key end

     0   :  { %s10927_s0 = inlined_call_operand.hbm [shape: f32[6,5000], index: 0, kind: input, shape index: {}]   ;;  %s10928_s1 = inlined_call_operand.vmem [shape: f32[32,15], index: 1, kind: input, shape index: {}]   ;;  %s10929_s2 = inlined_call_operand.vmem [shape: f32[32,6], index: 2, kind: input, shape index: {}]   ;;  %s10930_s3 = inlined_call_operand.vmem [shape: f32[32,32], index: 3, kind: input, shape index: {}]   ;;  %s10931_s4 = inlined_call_operand.vmem [shape: f32[32,32], index: 4, kind: input, shape index: {}]   ;;  %s10932_s5 = inlined_call_operand.vmem [shape: f32[32,32], index: 5, kind: input, shape index: {}]   ;;  %s10933_s6 = inlined_call_operand.vmem [shape: f32[1,32], index: 6, kind: input, shape index: {}]   ;;  %s10934_s7 = inlined_call_operand.vmem [shape: f32[32,3], index: 7, kind: input, shape index: {}]   ;;  %s10935_s8 = inlined_call_operand.<no memory space> [shape: f32[1], index: 8, kind: input, shape index: {}]   ;;  %s10936_s9 = inlined_call_operand.hbm [shape: f32[1,5000], index: 9, kind: output, shape index: {}]  }
   0x1   :  { %14 = sst [smem:[#allocation2]] %s10935_s8 }
   0x2   :  { %15 = vsyncpa [#allocation4], 0 }
   0x3   :  { %17 = vsyncpa [#allocation4 + $0x1], 0 }
   0x4   :  { %18 = vsyncpa [#allocation5], 0 }
   0x5   :  { %20 = vsyncpa [#allocation5 + $0x1], 0  ;;  %s8010_s11 = smov 0   ;;  %s8012_s12 = smov 0  }
   0x6   :  { %s8014_s13 = smov 0   ;;  %s8016_s14 = smov 0  }
   0x7 LB: > { %11011 = sst [smem:[#allocation9_spill]] %s7943_s13  ;;  %s8031_s8 = sadd.s32 4294967295, %s7947_s14   ;;  %s7947_s14 = sphi %s8016_s14, %s11216_s14   ;;  %s7943_s13 = sphi %s8014_s13, %s11213_s13   ;;  %s7939_s12 = sphi %s8012_s12, %s11215_s12   ;;  %s7935_s11 = sphi %s8010_s11, %s11214_s11  }
   0x8   : > { %s6340_s15 = sadd.s32 4294967294, %s7947_s14   ;;  %s8035_s16 = sadd.s32 1, %s7947_s14  }
   0x9   : > { %s33_s17 = sadd.s32 1, %s7943_s13  ;;  %s30_s18 = ssub.s32 %s7947_s14, %s8035_s16 }
   0xa   : > { %p40_p0 = scmp.ne.s32.totalorder %s7943_s13, %s7939_s12  ;;  %p31_p1 = scmp.eq.s32.totalorder %s30_s18, 0 }
   0xb   : > { %p41_p2 = scmp.eq.s32.totalorder %s7947_s14, 0  ;;  %p46_p3 = scmp.ne.s32.totalorder %s7939_s12, %s7935_s11 }
   0xc   : > { %p47_p4 = scmp.eq.s32.totalorder %s8031_s8, 0  ;;  %p238_p7 = scmp.eq.s32.totalorder %s8031_s8, 2 }
   0xd   : > { %s8047_s19 = scalar_select %p31_p1, %s7943_s13, %s33_s17  }
   0xe   : > { %p42_p5 = por %p41_p2, %p40_p0  ;;  %p8049_p6 = por %p47_p4, %p46_p3 }
   0xf   : > { %11012 = sst [smem:[#allocation10_spill]] %s8047_s19  ;;  %p244_p8 = scmp.eq.s32.totalorder %s6340_s15, 2 }
  0x10   : > { %s11013_s20 = scalar_select %p8049_p6, 1, 0 }
  0x11   : > { %p8054_p9 = por %p238_p7, %p40_p0  ;;  %p8058_p10 = por %p244_p8, %p46_p3 }
  0x12   : > { %p6342_p11 = scmp.ge.s32.totalorder %s7947_s14, 3 }
  0x13   : > { %s11014_s21 = scalar_select %p8054_p9, 1, 0 }
  0x14   : > { %s11015_s22 = scalar_select %p8058_p10, 1, 0 }
  0x15   : > { %284 = sbr.rel (%p6342_p11) target bundleno = 62 (0x3e), region = 48 }
  0x1c   : > { %287 = sbr.rel (!%p42_p5) target bundleno = 62 (0x3e), region = 52  ;;  %s288_s23 = sand.u32 (%p42_p5), 1, %s7943_s13  }
  0x1d   : > { %s6344_s24 = sshll.u32 (%p42_p5), %s7947_s14, 4  ;;  %s6343_s25 = sshll.u32 (%p42_p5), %s288_s23, 7 }
  0x1e   : > { %s294_s26 = ssub.s32 (%p42_p5), 40, %s6344_s24  ;;  %s8068_s29 = scalar_lea.sflag (%p42_p5), [#allocation4], %s288_s23 }
  0x1f   : > { %p295_p12 = scmp.lt.s32.totalorder (%p42_p5), %s294_s26, 16  ;;  %s292_s30 = scalar_lea.vmem (%p42_p5), [#allocation3], %s6343_s25 }
  0x23   : > { %s11218_s26 = smov (!%p295_p12, %s294_s26), 16 }
  0x24   : > { %s8065_s27 = sshll.u32 %s11218_s26, 7 }
  0x25   : > { %s299_s28 = ssub.s32 2048, %s8065_s27 }
  0x26   : > { %300 = vsyncadd %s8068_s29, %s299_s28  ;;  %p6346_p13 = scmp.ne.s32.totalorder %s8065_s27, 0  ;;  %s6608_s10 = sshll.u32 %s7947_s14, 11 }
  0x27   : > { %s8076_s18 = scalar_lea.hbm %s10927_s0, %s6608_s10  ;;  %s306_s23 = sshll.u32 %s292_s30, 4  ;;  %s307_s23 = int_to_ptr.vmem [resolvable:$true] %s306_s23 }
  0x28   : > { %s7853_s24 = scalar_lea.hbm %s8076_s18, %s8065_s27  ;;  %s7857_s28 = scalar_lea.hbm %s10927_s0, 5120 }
  0x29   : > { %p7854_p0 = scmp.ne.s32.totalorder %s8076_s18, %s7853_s24  ;;  %p7858_p3 = scmp.lt.u32.totalorder %s8076_s18, %s10927_s0 }
  0x2a   : > { %p7859_p4 = scmp.lt.u32.totalorder %s7857_s28, %s7853_s24  ;;  %p7861_p7 = scmp.lt.u32.totalorder %s7853_s24, %s8076_s18 }
  0x2b   : > { %p7855_p1 = pnand %p7854_p0, %p6346_p13 }
  0x2c   : > { %p7860_p5 = por %p7859_p4, %p7858_p3 }
  0x2d   : > { %p7856_p2 = pneg %p7855_p1 }
  0x2e   : > { %p7862_p8 = por %p7861_p7, %p7860_p5 }
  0x30   : > { %p7863_p11 = pnand %p7862_p8, %p7856_p2 }
  0x32   : > { %7866 = shalt.err (!%p7863_p11)
}
  0x33   : > { %s7867_s30 = scalar_lea.vmem %s307_s23, %s8065_s27  ;;  %s7949_s10 = smov [#allocation3]  }
  0x34   : > { %p7868_p12 = scmp.ne.s32.totalorder %s307_s23, %s7867_s30  ;;  %s7871_s15 = sshll.u32 %s7949_s10, 4  ;;  %s7872_s15 = int_to_ptr.vmem [resolvable:$false] %s7871_s15 }
  0x35   : > { %s7873_s17 = scalar_lea.vmem %s7872_s15, 4096  ;;  %p7874_p10 = scmp.lt.s32.totalorder %s307_s23, %s7872_s15 }
  0x36   : > { %p7869_p0 = pnand %p7868_p12, %p6346_p13  ;;  %p7875_p9 = scmp.lt.s32.totalorder %s7873_s17, %s7867_s30 }
  0x38   : > { %p7870_p1 = pneg %p7869_p0  ;;  %p7876_p6 = por %p7875_p9, %p7874_p10 }
  0x3a   : > { %p7877_p3 = pnand %p7876_p6, %p7870_p1 }
  0x3c   : > { %7880 = shalt.err (!%p7877_p3)
}
  0x3d   : > { %309 = dma.hbm_to_vmem [thread:$0]  (%p6346_p13), %s8076_s18, %s8065_s27, %s307_s23, %s8068_s29  }
  0x3e PF: > { %p6350_p2 = scmp.ge.s32.totalorder %s7947_s14, 1  ;;  %p311_p4 = scmp.lt.s32.totalorder %s7947_s14, 4 }
  0x40   : > { %p312_p5 = pnand %p6350_p2, %p311_p4 }
  0x42   : > { %315 = sbr.rel (%p312_p5) target bundleno = 1597 (0x63d), region = 56 }
  0x49   : > { %s8102_s13 = sand.u32 1, %s7939_s12   ;;  %p11016_p6 = scmp.ne.s32.totalorder %s11013_s20, 0 }
  0x4a   : > { %s6351_s19 = sshll.u32 %s8102_s13, 7  ;;  %s318_s24 = scalar_lea.sflag [#allocation4], %s8102_s13 }
  0x4b   : > { %s8106_s25 = scalar_lea.vmem [#allocation3], %s6351_s19 }
  0x4c   : > { %7926 = dma.done.wait (%p11016_p6), %s318_s24, 2048  }
  0x4d   : > { %7928 = vsyncadd (%p11016_p6), %s318_s24, 4294965248  ;;  %v398_v0 = vlaneseq  ;;  %v10939_v1 = vmov 0.0   ;;  %vm582_vm0 = vcmask 1046528   ;;  %v8120_v4 = vld [vmem:[%s8106_s25 + $0x8] sm:$0x3f]  ;;  %vm569_vm1 = vcmask 121856  }
  0x4e   : > { %695 = vmatprep.mubr.f32.mxu0 %v10939_v1  ;;  %784 = vmatprep.mubr.f32.mxu1 %v10939_v1  ;;  %v8123_v5 = vld [vmem:[%s8106_s25 + $0x18] sm:$0x3f]  ;;  %v8126_v6 = vld [vmem:[%s8106_s25] sm:$0x3f]  ;;  %v6980_v7 = vtrunc.f32 %v8120_v4  ;;  %v8135_v11 = vld [vmem:[%s8106_s25 + $0x10] sm:$0x3f] }
  0x4f   : > { %v8114_v2 = vshrl.u32 %v398_v0, 7  ;;  %v6984_v9 = vtrunc.f32 %v8123_v5  ;;  %v6978_v10 = vtrunc.f32 %v8126_v6  ;;  %v6982_v12 = vtrunc.f32 %v8135_v11  ;;  %v8139_v13 = vld [vmem:[%s8106_s25 + $0x28] sm:$0x3f]  ;;  %v8142_v14 = vld [vmem:[%s8106_s25 + $0x38] sm:$0x3f]  ;;  %v8199_v50 = vld [vmem:[%s10928_s1] sm:$0xff] }
  0x50   : > { %v8145_v15 = vld [vmem:[%s8106_s25 + $0x20] sm:$0x3f]  ;;  %v6981_v16 = vcvt.f32.s32 %v6980_v7  ;;  %v6988_v19 = vtrunc.f32 %v8139_v13  ;;  %v8149_v20 = vld [vmem:[%s8106_s25 + $0x30] sm:$0x3f]  ;;  %v6992_v22 = vtrunc.f32 %v8142_v14  ;;  %v8172_v36 = vld [vmem:[%s8106_s25 + $0x48] sm:$0x3f] }
  0x51   : > { %11017 = vst [vmem:[#allocation11_spill] sm:$0xff] %v8114_v2  ;;  %v8117_v3 = vadd.s32 8, %v8114_v2  ;;  %v8130_v8 = vsub.s32 5, %v8114_v2  ;;  %v6985_v17 = vcvt.f32.s32 %v6984_v9  ;;  %v6979_v18 = vcvt.f32.s32 %v6978_v10  ;;  %v8205_v51 = vld [vmem:[%s8106_s25 + $0x58] sm:$0x3f]  ;;  %v8255_v9 = vld [vmem:[%s10928_s1 + $0x8] sm:$0xff] }
  0x52   : > { %v6983_v21 = vcvt.f32.s32 %v6982_v12  ;;  %v6986_v23 = vtrunc.f32 %v8145_v15  ;;  %v6990_v24 = vtrunc.f32 %v8149_v20  ;;  %v6989_v28 = vcvt.f32.s32 %v6988_v19  ;;  %v8217_v54 = vld [vmem:[%s8106_s25 + $0x40] sm:$0x3f]  ;;  %v8220_v55 = vld [vmem:[%s8106_s25 + $0x50] sm:$0x3f]  ;;  %v8234_v60 = vld [vmem:[%s8106_s25 + $0x68] sm:$0x3f] }
  0x53   : > { %v408_v25 = vrot.slane %v6981_v16, %v8130_v8  ;;  %v416_v26 = vrot.slane %v6985_v17, %v8130_v8  ;;  %v404_v27 = vrot.slane %v6979_v18, %v8130_v8  ;;  %v6993_v30 = vcvt.f32.s32 %v6992_v22  ;;  %v8237_v61 = vld [vmem:[%s8106_s25 + $0x78] sm:$0x3f]  ;;  %s5511_s27 = sld [smem:[#allocation2]]  ;;  %s6352_s29 = sshll.u32 %s8102_s13, 4 }
  0x54   : > { %v412_v29 = vrot.slane %v6983_v21, %v8130_v8  ;;  %v6987_v31 = vcvt.f32.s32 %v6986_v23  ;;  %v6991_v32 = vcvt.f32.s32 %v6990_v24  ;;  %v7951_v37 = vmov 1.0   ;;  %s10852_s18 = scalar_lea.vmem [#allocation6], %s6352_s29  ;;  %p11210_p9 = scmp.ne.s32.totalorder %s11014_s21, 0 }
  0x55   : > { %vm466_vm2 = vcmp.eq.s32.totalorder %v8114_v2, %v408_v25  ;;  %vm482_vm3 = vcmp.eq.s32.totalorder %v8117_v3, %v408_v25  ;;  %vm468_vm4 = vcmp.eq.s32.totalorder %v8114_v2, %v416_v26  ;;  %vm484_vm5 = vcmp.eq.s32.totalorder %v8117_v3, %v416_v26  ;;  %s6602_s23 = sshll.u32 (%p11210_p9), %s8031_s8, 4 }
  0x56   : > { %v6370_v33 = vsel %vm482_vm3, 1.0, %v10939_v1  ;;  %vm8164_vm6 = vmpackc.low %vm582_vm0, %vm466_vm2  ;;  %v6372_v35 = vsel %vm484_vm5, 1.0, %v10939_v1  ;;  %vm465_vm7 = vcmp.eq.s32.totalorder %v8114_v2, %v404_v27  ;;  %vm481_vm8 = vcmp.eq.s32.totalorder %v8117_v3, %v404_v27  ;;  %s6259_s26 = ssub.s32 (%p11210_p9), 40, %s6602_s23 }
  0x57   : > { %v6610_v38 = vpack.c.bf16 %v6370_v33, %v7951_v37  ;;  %v6616_v39 = vpack.c.bf16 %v6372_v35, %v7951_v37  ;;  %vm6617_vm9 = vmpackc.low %vm582_vm0, %vm468_vm4  ;;  %v6369_v40 = vsel %vm481_vm8, 1.0, %v10939_v1  ;;  %vm467_vm10 = vcmp.eq.s32.totalorder %v8114_v2, %v412_v29  ;;  %p6260_p10 = scmp.lt.s32.totalorder (%p11210_p9), %s6259_s26, 16 }
  0x58   : > { %v6613_v41 = vpack.c.bf16 %v6369_v40, %v7951_v37  ;;  %vm6614_vm11 = vmpackc.low %vm582_vm0, %vm465_vm7  ;;  %vm483_vm12 = vcmp.eq.s32.totalorder %v8117_v3, %v412_v29  ;;  %v424_v42 = vrot.slane %v6989_v28, %v8130_v8  ;;  %v432_v43 = vrot.slane %v6993_v30, %v8130_v8  ;;  %v8289_v29 = vld [vmem:[%s10928_s1 + $0x10] sm:$0xff]  ;;  %v8310_v40 = vld [vmem:[%s8106_s25 + $0x60] sm:$0x3f] }
  0x59   : > { %6612 = vmatprep.subr.msk.bf16.mxu0 %vm8164_vm6, %v6610_v38  ;;  %6618 = vmatprep.subr.msk.bf16.mxu1 %vm6617_vm9, %v6616_v39  ;;  %v6371_v44 = vsel %vm483_vm12, 1.0, %v10939_v1  ;;  %vm8188_vm13 = vmpackc.low %vm582_vm0, %vm467_vm10  ;;  %v420_v46 = vrot.slane %v6987_v31, %v8130_v8  ;;  %v428_v47 = vrot.slane %v6991_v32, %v8130_v8  ;;  %v6996_v48 = vtrunc.f32 %v8172_v36 }
  0x5a   : > { %6615 = vmatpush1.bf16.msk.msra.mxu0 %vm6614_vm11, %v6613_v41  ;;  %v6619_v49 = vpack.c.bf16 %v6371_v44, %v7951_v37  ;;  %vm470_vm14 = vcmp.eq.s32.totalorder %v8114_v2, %v424_v42  ;;  %vm486_vm15 = vcmp.eq.s32.totalorder %v8117_v3, %v424_v42  ;;  %vm472_vm2 = vcmp.eq.s32.totalorder %v8114_v2, %v432_v43  ;;  %v8316_v41 = vld [vmem:[%s10928_s1 + $0x18] sm:$0xff]  ;;  %v8326_v44 = vld [vmem:[%s8106_s25 + $0x70] sm:$0x3f] }
  0x5b   : > { %v6374_v52 = vsel %vm486_vm15, 1.0, %v10939_v1  ;;  %vm8209_vm3 = vmpackc.low %vm582_vm0, %vm470_vm14  ;;  %vm488_vm4 = vcmp.eq.s32.totalorder %v8117_v3, %v432_v43  ;;  %vm469_vm5 = vcmp.eq.s32.totalorder %v8114_v2, %v420_v46  ;;  %vm485_vm6 = vcmp.eq.s32.totalorder %v8117_v3, %v420_v46 }
  0x5c   : > { %6621 = vmatpush1.bf16.msk.msra.mxu1 %vm8188_vm13, %v6619_v49  ;;  %v6622_v56 = vpack.c.bf16 %v6374_v52, %v7951_v37  ;;  %v6376_v57 = vsel %vm488_vm4, 1.0, %v10939_v1  ;;  %vm8227_vm7 = vmpackc.low %vm582_vm0, %vm472_vm2  ;;  %v6373_v59 = vsel %vm485_vm6, 1.0, %v10939_v1  ;;  %vm471_vm8 = vcmp.eq.s32.totalorder %v8114_v2, %v428_v47 }
  0x5d   : > { %6389 = vmatmul.mubr.msk.f32.vlgmr.msra.gmra.mrb[0].mxu0 %vm569_vm1, %v8199_v50  ;;  %v6628_v62 = vpack.c.bf16 %v6376_v57, %v7951_v37  ;;  %v6625_v63 = vpack.c.bf16 %v6373_v59, %v7951_v37  ;;  %vm8246_vm9 = vmpackc.low %vm582_vm0, %vm469_vm5  ;;  %vm487_vm10 = vcmp.eq.s32.totalorder %v8117_v3, %v428_v47  ;;  %v6997_v7 = vcvt.f32.s32 %v6996_v48 }
  0x5e   : > { %701 = vmatprep.mubr.f32.mxu0 %v10939_v1  ;;  %6624 = vmatprep.subr.msk.bf16.mxu0 %vm8209_vm3, %v6622_v56  ;;  %v6375_v10 = vsel %vm487_vm10, 1.0, %v10939_v1  ;;  %vm8261_vm11 = vmpackc.low %vm582_vm0, %vm471_vm8  ;;  %v7000_v16 = vtrunc.f32 %v8205_v51  ;;  %v6994_v17 = vtrunc.f32 %v8217_v54  ;;  %v6998_v18 = vtrunc.f32 %v8220_v55 }
  0x5f   : > { %6397 = vmatmul.mubr.msk.f32.vlgmr.msra.gmra.mrb[0].mxu1 %vm569_vm1, %v8199_v50  ;;  %6630 = vmatprep.subr.msk.bf16.mxu1 %vm8227_vm7, %v6628_v62  ;;  %v6631_v19 = vpack.c.bf16 %v6375_v10, %v7951_v37  ;;  %v440_v21 = vrot.slane %v6997_v7, %v8130_v8  ;;  %v7004_v22 = vtrunc.f32 %v8234_v60  ;;  %v7008_v23 = vtrunc.f32 %v8237_v61 }
  0x60   : > { %790 = vmatprep.mubr.f32.mxu1 %v10939_v1  ;;  %6627 = vmatpush1.bf16.msk.msra.mxu0 %vm8246_vm9, %v6625_v63  ;;  %v7001_v24 = vcvt.f32.s32 %v7000_v16  ;;  %v6995_v25 = vcvt.f32.s32 %v6994_v17  ;;  %v6999_v26 = vcvt.f32.s32 %v6998_v18  ;;  %v7002_v46 = vtrunc.f32 %v8310_v40 }
  0x61   : > { %6390 = vmatmul.mubr.msk.f32.gmra.mrb[2].mxu0 %vm569_vm1, %v8255_v9  ;;  %6633 = vmatpush1.bf16.msk.msra.mxu1 %vm8261_vm11, %v6631_v19  ;;  %vm474_vm12 = vcmp.eq.s32.totalorder %v8114_v2, %v440_v21  ;;  %vm490_vm13 = vcmp.eq.s32.totalorder %v8117_v3, %v440_v21  ;;  %v7005_v27 = vcvt.f32.s32 %v7004_v22  ;;  %v7009_v28 = vcvt.f32.s32 %v7008_v23 }
  0x62   : > { %707 = vmatprep.mubr.f32.mxu0 %v10939_v1  ;;  %v6378_v30 = vsel %vm490_vm13, 1.0, %v10939_v1  ;;  %vm6635_vm14 = vmpackc.low %vm582_vm0, %vm474_vm12  ;;  %v448_v31 = vrot.slane %v7001_v24, %v8130_v8  ;;  %v436_v32 = vrot.slane %v6995_v25, %v8130_v8  ;;  %v444_v33 = vrot.slane %v6999_v26, %v8130_v8 }
  0x63   : > { %6398 = vmatmul.mubr.msk.f32.gmra.mrb[2].mxu1 %vm569_vm1, %v8255_v9  ;;  %v6634_v34 = vpack.c.bf16 %v6378_v30, %v7951_v37  ;;  %v456_v35 = vrot.slane %v7005_v27, %v8130_v8  ;;  %v464_v38 = vrot.slane %v7009_v28, %v8130_v8  ;;  %v7006_v52 = vtrunc.f32 %v8326_v44 }
  0x64   : > { %796 = vmatprep.mubr.f32.mxu1 %v10939_v1  ;;  %vm476_vm15 = vcmp.eq.s32.totalorder %v8114_v2, %v448_v31  ;;  %vm492_vm2 = vcmp.eq.s32.totalorder %v8117_v3, %v448_v31  ;;  %vm489_vm3 = vcmp.eq.s32.totalorder %v8117_v3, %v436_v32  ;;  %vm491_vm5 = vcmp.eq.s32.totalorder %v8117_v3, %v444_v33 }
  0x65   : > { %6391 = vmatmul.mubr.msk.f32.gmra.mrb[4].mxu0 %vm569_vm1, %v8289_v29  ;;  %6636 = vmatprep.subr.msk.bf16.mxu0 %vm6635_vm14, %v6634_v34  ;;  %v6380_v39 = vsel %vm492_vm2, 1.0, %v10939_v1  ;;  %vm6641_vm4 = vmpackc.low %vm582_vm0, %vm476_vm15  ;;  %v6377_v43 = vsel %vm489_vm3, 1.0, %v10939_v1  ;;  %vm494_vm6 = vcmp.eq.s32.totalorder %v8117_v3, %v456_v35  ;;  %vm496_vm7 = vcmp.eq.s32.totalorder %v8117_v3, %v464_v38 }
  0x66   : > { %713 = vmatprep.mubr.f32.mxu0 %v10939_v1  ;;  %v6640_v42 = vpack.c.bf16 %v6380_v39, %v7951_v37  ;;  %vm473_vm8 = vcmp.eq.s32.totalorder %v8114_v2, %v436_v32  ;;  %v6382_v45 = vsel %vm494_vm6, 1.0, %v10939_v1  ;;  %v6379_v47 = vsel %vm491_vm5, 1.0, %v10939_v1 }
  0x67   : > { %6399 = vmatmul.mubr.msk.f32.gmra.mrb[4].mxu1 %vm569_vm1, %v8289_v29  ;;  %vm478_vm9 = vcmp.eq.s32.totalorder %v8114_v2, %v456_v35  ;;  %v6637_v48 = vpack.c.bf16 %v6377_v43, %v7951_v37  ;;  %vm475_vm10 = vcmp.eq.s32.totalorder %v8114_v2, %v444_v33  ;;  %v6384_v49 = vsel %vm496_vm7, 1.0, %v10939_v1  ;;  %vm6638_vm11 = vmpackc.low %vm582_vm0, %vm473_vm8  ;;  %v8579_v33 = vld [vmem:[%s10930_s3] sm:$0xff] }
  0x68   : > { %802 = vmatprep.mubr.f32.mxu1 %v10939_v1  ;;  %6642 = vmatprep.subr.msk.bf16.mxu1 %vm6641_vm4, %v6640_v42  ;;  %v6646_v53 = vpack.c.bf16 %v6382_v45, %v7951_v37  ;;  %vm480_vm12 = vcmp.eq.s32.totalorder %v8114_v2, %v464_v38  ;;  %v6643_v56 = vpack.c.bf16 %v6379_v47, %v7951_v37  ;;  %vm6647_vm13 = vmpackc.low %vm582_vm0, %vm478_vm9  ;;  %v7003_v57 = vcvt.f32.s32 %v7002_v46 }
  0x69   : > { %6392 = vmatmul.mubr.msk.f32.gmra.mrb[6].mxu0 %vm569_vm1, %v8316_v41  ;;  %vm6644_vm14 = vmpackc.low %vm582_vm0, %vm475_vm10  ;;  %v6652_v58 = vpack.c.bf16 %v6384_v49, %v7951_v37  ;;  %v7007_v59 = vcvt.f32.s32 %v7006_v52  ;;  %vm1356_vm7 = vcmask 1045504   ;;  %v8598_v49 = vld [vmem:[%s10930_s3 + $0x10] sm:$0xff] }
  0x6a   : > { %873 = vmatprep.mubr.f32.mxu0 %v10939_v1  ;;  %vm6653_vm15 = vmpackc.low %vm582_vm0, %vm480_vm12  ;;  %v452_v62 = vrot.slane %v7003_v57, %v8130_v8 }
  0x6b   : > { %6400 = vmatmul.mubr.msk.f32.gmra.mrb[6].mxu1 %vm569_vm1, %v8316_v41  ;;  %v460_v63 = vrot.slane %v7007_v59, %v8130_v8  ;;  %v8609_v59 = vld [vmem:[%s10930_s3 + $0x18] sm:$0xff] }
  0x6c   : > { %962 = vmatprep.mubr.f32.mxu1 %v10939_v1  ;;  %vm493_vm2 = vcmp.eq.s32.totalorder %v8117_v3, %v452_v62  ;;  %vm477_vm4 = vcmp.eq.s32.totalorder %v8114_v2, %v452_v62 }
  0x6d   : > { %6405 = vmatmul.mubr.msk.f32.vlgmr.msra.gmra.mrb[8].mxu0 %vm569_vm1, %v8199_v50  ;;  %vm495_vm3 = vcmp.eq.s32.totalorder %v8117_v3, %v460_v63  ;;  %v6381_v0 = vsel %vm493_vm2, 1.0, %v10939_v1  ;;  %vm479_vm5 = vcmp.eq.s32.totalorder %v8114_v2, %v460_v63  ;;  %vm6650_vm6 = vmpackc.low %vm582_vm0, %vm477_vm4 }
  0x6e   : > { %879 = vmatprep.mubr.f32.mxu0 %v10939_v1  ;;  %6639 = vmatpush1.bf16.msk.msra.mxu0 %vm6638_vm11, %v6637_v48  ;;  %v6383_v8 = vsel %vm495_vm3, 1.0, %v10939_v1  ;;  %v6649_v7 = vpack.c.bf16 %v6381_v0, %v7951_v37  ;;  %vm6656_vm8 = vmpackc.low %vm582_vm0, %vm479_vm5  ;;  %vm1343_vm0 = vcmask 48128  }
  0x6f   : > { %6413 = vmatmul.mubr.msk.f32.vlgmr.msra.gmra.mrb[8].mxu1 %vm569_vm1, %v8199_v50  ;;  %6648 = vmatprep.subr.msk.bf16.mxu0 %vm6647_vm13, %v6646_v53  ;;  %v6655_v3 = vpack.c.bf16 %v6383_v8, %v7951_v37 }
  0x70   : > { %968 = vmatprep.mubr.f32.mxu1 %v10939_v1  ;;  %6645 = vmatpush1.bf16.msk.msra.mxu1 %vm6644_vm14, %v6643_v56 }
  0x71   : > { %6406 = vmatmul.mubr.msk.f32.gmra.mrb[10].mxu0 %vm569_vm1, %v8255_v9  ;;  %6654 = vmatprep.subr.msk.bf16.mxu1 %vm6653_vm15, %v6652_v58 }
  0x72   : > { %885 = vmatprep.mubr.f32.mxu0 %v10939_v1 }
  0x73   : > { %6414 = vmatmul.mubr.msk.f32.gmra.mrb[10].mxu1 %vm569_vm1, %v8255_v9 }
  0x74   : > { %974 = vmatprep.mubr.f32.mxu1 %v10939_v1 }
  0x75   : > { %6407 = vmatmul.mubr.msk.f32.gmra.mrb[12].mxu0 %vm569_vm1, %v8289_v29 }
  0x76   : > { %891 = vmatprep.mubr.f32.mxu0 %v10939_v1 }
  0x77   : > { %6415 = vmatmul.mubr.msk.f32.gmra.mrb[12].mxu1 %vm569_vm1, %v8289_v29 }
  0x78   : > { %980 = vmatprep.mubr.f32.mxu1 %v10939_v1 }
  0x79   : > { %6408 = vmatmul.mubr.msk.f32.gmra.mrb[14].mxu0 %vm569_vm1, %v8316_v41 }
  0x7a   : > { %1051 = vmatprep.mubr.f32.mxu0 %v10939_v1 }
  0x7b   : > { %6416 = vmatmul.mubr.msk.f32.gmra.mrb[14].mxu1 %vm569_vm1, %v8316_v41 }
  0x7c   : > { %1140 = vmatprep.mubr.f32.mxu1 %v10939_v1 }
  0x7d   : > { %6421 = vmatmul.mubr.msk.f32.vlgmr.msra.gmra.mrb[16].mxu0 %vm569_vm1, %v8199_v50 }
  0x7e   : > { %1057 = vmatprep.mubr.f32.mxu0 %v10939_v1  ;;  %6651 = vmatpush1.bf16.msk.msra.mxu0 %vm6650_vm6, %v6649_v7 }
  0x7f   : > { %6429 = vmatmul.mubr.msk.f32.vlgmr.msra.gmra.mrb[16].mxu1 %vm569_vm1, %v8199_v50  ;;  %6449 = vmatprep.subr.msk.mxu0 %vm1356_vm7, %v8120_v4  ;;  %v8448_v4 = vld [vmem:[%s10929_s2] sm:$0xff] }
  0x80   : > { %1146 = vmatprep.mubr.f32.mxu1 %v10939_v1  ;;  %6657 = vmatpush1.bf16.msk.msra.mxu1 %vm6656_vm8, %v6655_v3 }
  0x81   : > { %6422 = vmatmul.mubr.msk.f32.gmra.mrb[18].mxu0 %vm569_vm1, %v8255_v9  ;;  %6455 = vmatprep.subr.msk.mxu1 %vm1356_vm7, %v8123_v5  ;;  %v8459_v5 = vld [vmem:[%s10929_s2 + $0x8] sm:$0xff] }
  0x82   : > { %1063 = vmatprep.mubr.f32.mxu0 %v10939_v1 }
  0x83   : > { %6430 = vmatmul.mubr.msk.f32.gmra.mrb[18].mxu1 %vm569_vm1, %v8255_v9 }
  0x84   : > { %1152 = vmatprep.mubr.f32.mxu1 %v10939_v1 }
  0x85   : > { %6423 = vmatmul.mubr.msk.f32.gmra.mrb[20].mxu0 %vm569_vm1, %v8289_v29 }
  0x86   : > { %1069 = vmatprep.mubr.f32.mxu0 %v10939_v1 }
  0x87   : > { %6431 = vmatmul.mubr.msk.f32.gmra.mrb[20].mxu1 %vm569_vm1, %v8289_v29 }
  0x88   : > { %1158 = vmatprep.mubr.f32.mxu1 %v10939_v1 }
  0x89   : > { %6424 = vmatmul.mubr.msk.f32.gmra.mrb[22].mxu0 %vm569_vm1, %v8316_v41 }
  0x8a   : > { %1229 = vmatprep.mubr.f32.mxu0 %v10939_v1 }
  0x8b   : > { %6432 = vmatmul.mubr.msk.f32.gmra.mrb[22].mxu1 %vm569_vm1, %v8316_v41 }
  0x8c   : > { %1318 = vmatprep.mubr.f32.mxu1 %v10939_v1 }
  0x8d   : > { %6437 = vmatmul.mubr.msk.f32.vlgmr.msra.gmra.mrb[24].mxu0 %vm569_vm1, %v8199_v50 }
  0x8e   : > { %1235 = vmatprep.mubr.f32.mxu0 %v10939_v1  ;;  %6450 = vmatpush1.msk.msra.mxu0 %vm1356_vm7, %v8126_v6  ;;  %v563_v6 = vld [vmem:[%s10929_s2 + $0x10] sm:$0xff] }
  0x8f   : > { %6445 = vmatmul.mubr.msk.f32.vlgmr.msra.gmra.mrb[24].mxu1 %vm569_vm1, %v8199_v50  ;;  %6461 = vmatprep.subr.msk.mxu0 %vm1356_vm7, %v8139_v13  ;;  %v2121_v13 = vld [vmem:[%s10934_s7] sm:$0xff] }
  0x90   : > { %1324 = vmatprep.mubr.f32.mxu1 %v10939_v1  ;;  %6456 = vmatpush1.msk.msra.mxu1 %vm1356_vm7, %v8135_v11  ;;  %v564_v11 = vld [vmem:[%s10929_s2 + $0x18] sm:$0xff] }
  0x91   : > { %6438 = vmatmul.mubr.msk.f32.gmra.mrb[26].mxu0 %vm569_vm1, %v8255_v9  ;;  %6467 = vmatprep.subr.msk.mxu1 %vm1356_vm7, %v8142_v14  ;;  %v2123_v14 = vld [vmem:[%s10934_s7 + $0x10] sm:$0xff] }
  0x92   : > { %1241 = vmatprep.mubr.f32.mxu0 %v10939_v1 }
  0x93   : > { %6446 = vmatmul.mubr.msk.f32.gmra.mrb[26].mxu1 %vm569_vm1, %v8255_v9 }
  0x94   : > { %1330 = vmatprep.mubr.f32.mxu1 %v10939_v1 }
  0x95   : > { %6439 = vmatmul.mubr.msk.f32.gmra.mrb[28].mxu0 %vm569_vm1, %v8289_v29 }
  0x96   : > { %1247 = vmatprep.mubr.f32.mxu0 %v10939_v1 }
  0x97   : > { %6447 = vmatmul.mubr.msk.f32.gmra.mrb[28].mxu1 %vm569_vm1, %v8289_v29 }
  0x98   : > { %1336 = vmatprep.mubr.f32.mxu1 %v10939_v1 }
  0x99   : > { %6440 = vmatmul.mubr.msk.f32.gmra.mrb[30].mxu0 %vm569_vm1, %v8316_v41 }
  0x9a   : > { %1469 = vmatprep.mubr.f32.mxu0 %v10939_v1 }
  0x9b   : > { %6448 = vmatmul.mubr.msk.f32.gmra.mrb[30].mxu1 %vm569_vm1, %v8316_v41  ;;  %vm2145_vm1 = vcmask 261120   ;;  %v8587_v41 = vld [vmem:[%s10930_s3 + $0x8] sm:$0xff] }
  0x9c   : > { %1558 = vmatprep.mubr.f32.mxu1 %v10939_v1 }
  0x9d   : > { %6451 = vmatmul.mubr.msk.f32.vlgmr.msra.gmra.mrb[0].mxu0 %vm1343_vm0, %v8448_v4 }
  0x9e   : > { %1475 = vmatprep.mubr.f32.mxu0 %v10939_v1  ;;  %6462 = vmatpush1.msk.msra.mxu0 %vm1356_vm7, %v8145_v15  ;;  %v7952_v15 = vmov 0  }
  0x9f   : > { %6457 = vmatmul.mubr.msk.f32.vlgmr.msra.gmra.mrb[0].mxu1 %vm1343_vm0, %v8448_v4  ;;  %6473 = vmatprep.subr.msk.mxu0 %vm1356_vm7, %v8172_v36  ;;  %v2124_v36 = vld [vmem:[%s10934_s7 + $0x18] sm:$0xff] }
  0xa0   : > { %1564 = vmatprep.mubr.f32.mxu1 %v10939_v1  ;;  %6468 = vmatpush1.msk.msra.mxu1 %vm1356_vm7, %v8149_v20  ;;  %v2122_v20 = vld [vmem:[%s10934_s7 + $0x8] sm:$0xff] }
  0xa1   : > { %6452 = vmatmul.mubr.msk.f32.gmra.mrb[2].mxu0 %vm1343_vm0, %v8459_v5  ;;  %6479 = vmatprep.subr.msk.mxu1 %vm1356_vm7, %v8205_v51 }
  0xa2   : > { %1481 = vmatprep.mubr.f32.mxu0 %v10939_v1  ;;  %7055 = vset.pattern.permute.xlu0 %v7952_v15 }
  0xa3   : > { %6458 = vmatmul.mubr.msk.f32.gmra.mrb[2].mxu1 %vm1343_vm0, %v8459_v5  ;;  %7056 = vset.pattern.permute.xlu1 %v7952_v15 }
  0xa4   : > { %1570 = vmatprep.mubr.f32.mxu1 %v10939_v1  ;;  %2127 = vperm.xlu0 %7055, %v2121_v13  }
  0xa5   : > { %6453 = vmatmul.mubr.msk.f32.gmra.mrb[4].mxu0 %vm1343_vm0, %v563_v6  ;;  %2137 = vperm.xlu1 %7056, %v2123_v14  }
  0xa6   : > { %1487 = vmatprep.mubr.f32.mxu0 %v10939_v1 }
  0xa7   : > { %6459 = vmatmul.mubr.msk.f32.gmra.mrb[4].mxu1 %vm1343_vm0, %v563_v6 }
  0xa8   : > { %1576 = vmatprep.mubr.f32.mxu1 %v10939_v1  ;;  %2132 = vperm.xlu0 %7055, %v2122_v20  }
  0xa9   : > { %6454 = vmatmul.mubr.msk.f32.gmra.mrb[6].mxu0 %vm1343_vm0, %v564_v11  ;;  %2142 = vperm.xlu1 %7056, %v2124_v36  }
  0xaa   : > { %1647 = vmatprep.mubr.f32.mxu0 %v10939_v1 }
  0xab   : > { %6460 = vmatmul.mubr.msk.f32.gmra.mrb[6].mxu1 %vm1343_vm0, %v564_v11 }
  0xac   : > { %1736 = vmatprep.mubr.f32.mxu1 %v10939_v1 }
  0xad   : > { %6463 = vmatmul.mubr.msk.f32.vlgmr.msra.gmra.mrb[8].mxu0 %vm1343_vm0, %v8448_v4 }
  0xae   : > { %1653 = vmatprep.mubr.f32.mxu0 %v10939_v1  ;;  %6474 = vmatpush1.msk.msra.mxu0 %vm1356_vm7, %v8217_v54 }
  0xaf   : > { %6469 = vmatmul.mubr.msk.f32.vlgmr.msra.gmra.mrb[8].mxu1 %vm1343_vm0, %v8448_v4  ;;  %6485 = vmatprep.subr.msk.mxu0 %vm1356_vm7, %v8234_v60 }
  0xb0   : > { %1742 = vmatprep.mubr.f32.mxu1 %v10939_v1  ;;  %6480 = vmatpush1.msk.msra.mxu1 %vm1356_vm7, %v8220_v55 }
  0xb1   : > { %6464 = vmatmul.mubr.msk.f32.gmra.mrb[10].mxu0 %vm1343_vm0, %v8459_v5  ;;  %6491 = vmatprep.subr.msk.mxu1 %vm1356_vm7, %v8237_v61 }
  0xb2   : > { %1659 = vmatprep.mubr.f32.mxu0 %v10939_v1 }
  0xb3   : > { %6470 = vmatmul.mubr.msk.f32.gmra.mrb[10].mxu1 %vm1343_vm0, %v8459_v5 }
  0xb4   : > { %1748 = vmatprep.mubr.f32.mxu1 %v10939_v1 }
  0xb5   : > { %6465 = vmatmul.mubr.msk.f32.gmra.mrb[12].mxu0 %vm1343_vm0, %v563_v6 }
  0xb6   : > { %1665 = vmatprep.mubr.f32.mxu0 %v10939_v1 }
  0xb7   : > { %6471 = vmatmul.mubr.msk.f32.gmra.mrb[12].mxu1 %vm1343_vm0, %v563_v6 }
  0xb8   : > { %1754 = vmatprep.mubr.f32.mxu1 %v10939_v1 }
  0xb9   : > { %6466 = vmatmul.mubr.msk.f32.gmra.mrb[14].mxu0 %vm1343_vm0, %v564_v11 }
  0xba   : > { %1825 = vmatprep.mubr.f32.mxu0 %v10939_v1 }
  0xbb   : > { %6472 = vmatmul.mubr.msk.f32.gmra.mrb[14].mxu1 %vm1343_vm0, %v564_v11 }
  0xbc   : > { %1914 = vmatprep.mubr.f32.mxu1 %v10939_v1 }
  0xbd   : > { %6475 = vmatmul.mubr.msk.f32.vlgmr.msra.gmra.mrb[16].mxu0 %vm1343_vm0, %v8448_v4 }
  0xbe   : > { %1831 = vmatprep.mubr.f32.mxu0 %v10939_v1  ;;  %6486 = vmatpush1.msk.msra.mxu0 %vm1356_vm7, %v8310_v40 }
  0xbf   : > { %6481 = vmatmul.mubr.msk.f32.vlgmr.msra.gmra.mrb[16].mxu1 %vm1343_vm0, %v8448_v4 }
  0xc0   : > { %1920 = vmatprep.mubr.f32.mxu1 %v10939_v1  ;;  %6492 = vmatpush1.msk.msra.mxu1 %vm1356_vm7, %v8326_v44 }
  0xc1   : > { %6476 = vmatmul.mubr.msk.f32.gmra.mrb[18].mxu0 %vm1343_vm0, %v8459_v5 }
  0xc2   : > { %1837 = vmatprep.mubr.f32.mxu0 %v10939_v1 }
  0xc3   : > { %6482 = vmatmul.mubr.msk.f32.gmra.mrb[18].mxu1 %vm1343_vm0, %v8459_v5 }
  0xc4   : > { %1926 = vmatprep.mubr.f32.mxu1 %v10939_v1 }
  0xc5   : > { %6477 = vmatmul.mubr.msk.f32.gmra.mrb[20].mxu0 %vm1343_vm0, %v563_v6 }
  0xc6   : > { %1843 = vmatprep.mubr.f32.mxu0 %v10939_v1 }
  0xc7   : > { %6483 = vmatmul.mubr.msk.f32.gmra.mrb[20].mxu1 %vm1343_vm0, %v563_v6 }
  0xc8   : > { %1932 = vmatprep.mubr.f32.mxu1 %v10939_v1 }
  0xc9   : > { %6478 = vmatmul.mubr.msk.f32.gmra.mrb[22].mxu0 %vm1343_vm0, %v564_v11 }
  0xca   : > { %2003 = vmatprep.mubr.f32.mxu0 %v10939_v1 }
  0xcb   : > { %6484 = vmatmul.mubr.msk.f32.gmra.mrb[22].mxu1 %vm1343_vm0, %v564_v11 }
  0xcc   : > { %2092 = vmatprep.mubr.f32.mxu1 %v10939_v1 }
  0xcd   : > { %6487 = vmatmul.mubr.msk.f32.vlgmr.msra.gmra.mrb[24].mxu0 %vm1343_vm0, %v8448_v4 }
  0xce   : > { %2009 = vmatprep.mubr.f32.mxu0 %v10939_v1 }
  0xcf   : > { %6493 = vmatmul.mubr.msk.f32.vlgmr.msra.gmra.mrb[24].mxu1 %vm1343_vm0, %v8448_v4 }
  0xd0   : > { %2098 = vmatprep.mubr.f32.mxu1 %v10939_v1 }
  0xd1   : > { %6488 = vmatmul.mubr.msk.f32.gmra.mrb[26].mxu0 %vm1343_vm0, %v8459_v5 }
  0xd2   : > { %2015 = vmatprep.mubr.f32.mxu0 %v10939_v1 }
  0xd3   : > { %6494 = vmatmul.mubr.msk.f32.gmra.mrb[26].mxu1 %vm1343_vm0, %v8459_v5 }
  0xd4   : > { %2104 = vmatprep.mubr.f32.mxu1 %v10939_v1 }
  0xd5   : > { %6489 = vmatmul.mubr.msk.f32.gmra.mrb[28].mxu0 %vm1343_vm0, %v563_v6 }
  0xd6   : > { %2021 = vmatprep.mubr.f32.mxu0 %v10939_v1 }
  0xd7   : > { %6495 = vmatmul.mubr.msk.f32.gmra.mrb[28].mxu1 %vm1343_vm0, %v563_v6 }
  0xd8   : > { %2110 = vmatprep.mubr.f32.mxu1 %v10939_v1 }
  0xd9   : > { %6490 = vmatmul.mubr.msk.f32.gmra.mrb[30].mxu0 %vm1343_vm0, %v564_v11 }
  0xda   : > { %2222 = vmatprep.mubr.f32.mxu0 %v10939_v1 }
  0xdb   : > { %6496 = vmatmul.mubr.msk.f32.gmra.mrb[30].mxu1 %vm1343_vm0, %v564_v11 }
  0xdc   : > { %2311 = vmatprep.mubr.f32.mxu1 %v10939_v1 }
 0x170   : > { %v1471_v37 = vpop.f32.mrb[0].mxu0 }
 0x171   : > { %v1473_v50 = vpop.f32.mrb[1].mxu0 }
 0x172   : > { %v1560_v51 = vpop.f32.mrb[0].mxu1 }
 0x173   : > { %v1562_v54 = vpop.f32.mrb[1].mxu1 }
 0x174   : > { %v1477_v55 = vpop.f32.mrb[2].mxu0 }
 0x175   : > { %v6660_v60 = vpack.c.bf16 %v1477_v55, %v1471_v37  ;;  %v1479_v61 = vpop.f32.mrb[3].mxu0 }
 0x176   : > { %v1566_v9 = vpop.f32.mrb[2].mxu1  ;;  %v6658_v10 = vpack.c.bf16 %v1479_v61, %v1473_v50 }
 0x177   : > { %v6668_v12 = vpack.c.bf16 %v1566_v9, %v1560_v51  ;;  %v1568_v16 = vpop.f32.mrb[3].mxu1 }
 0x178   : > { %v6666_v17 = vpack.c.bf16 %v1568_v16, %v1562_v54  ;;  %v1483_v18 = vpop.f32.mrb[4].mxu0  ;;  %6659 = vmatprep.subr.bf16.mxu0 %v6658_v10 }
 0x179   : > { %v1485_v19 = vpop.f32.mrb[5].mxu0  ;;  %6661 = vmatpush1.bf16.msra.mxu0 %v6660_v60 }
 0x17a   : > { %v1572_v21 = vpop.f32.mrb[4].mxu1  ;;  %6667 = vmatprep.subr.bf16.mxu1 %v6666_v17 }
 0x17b   : > { %v1574_v22 = vpop.f32.mrb[5].mxu1  ;;  %6669 = vmatpush1.bf16.msra.mxu1 %v6668_v12 }
 0x17c   : > { %v1489_v23 = vpop.f32.mrb[6].mxu0 }
 0x17d   : > { %v6664_v24 = vpack.c.bf16 %v1489_v23, %v1483_v18  ;;  %v1491_v25 = vpop.f32.mrb[7].mxu0 }
 0x17e   : > { %v1578_v26 = vpop.f32.mrb[6].mxu1  ;;  %v6662_v27 = vpack.c.bf16 %v1491_v25, %v1485_v19 }
 0x17f   : > { %v6672_v28 = vpack.c.bf16 %v1578_v26, %v1572_v21  ;;  %v1580_v29 = vpop.f32.mrb[7].mxu1 }
 0x180   : > { %v6670_v30 = vpack.c.bf16 %v1580_v29, %v1574_v22  ;;  %v1649_v31 = vpop.f32.mrb[8].mxu0  ;;  %6663 = vmatprep.subr.bf16.mxu0 %v6662_v27 }
 0x181   : > { %v1651_v32 = vpop.f32.mrb[9].mxu0  ;;  %6665 = vmatpush1.bf16.msra.mxu0 %v6664_v24 }
 0x182   : > { %v1738_v34 = vpop.f32.mrb[8].mxu1  ;;  %6671 = vmatprep.subr.bf16.mxu1 %v6670_v30 }
 0x183   : > { %v1740_v35 = vpop.f32.mrb[9].mxu1  ;;  %6673 = vmatpush1.bf16.msra.mxu1 %v6672_v28 }
 0x184   : > { %v1655_v38 = vpop.f32.mrb[10].mxu0  ;;  %6497 = vmatmul.mubr.msk.f32.vlgmr.msra.gmra.mrb[32].mxu0 %vm2145_vm1, %v8579_v33 }
 0x185   : > { %v6676_v39 = vpack.c.bf16 %v1655_v38, %v1649_v31  ;;  %v1657_v40 = vpop.f32.mrb[11].mxu0  ;;  %2228 = vmatprep.mubr.f32.mxu0 %v10939_v1 }
 0x186   : > { %v1744_v42 = vpop.f32.mrb[10].mxu1  ;;  %6501 = vmatmul.mubr.msk.f32.vlgmr.msra.gmra.mrb[32].mxu1 %vm2145_vm1, %v8579_v33  ;;  %v6674_v43 = vpack.c.bf16 %v1657_v40, %v1651_v32 }
 0x187   : > { %v6684_v44 = vpack.c.bf16 %v1744_v42, %v1738_v34  ;;  %v1746_v45 = vpop.f32.mrb[11].mxu1  ;;  %2317 = vmatprep.mubr.f32.mxu1 %v10939_v1 }
 0x188   : > { %v6682_v46 = vpack.c.bf16 %v1746_v45, %v1740_v35  ;;  %v1661_v47 = vpop.f32.mrb[12].mxu0  ;;  %6498 = vmatmul.mubr.msk.f32.gmra.mrb[34].mxu0 %vm2145_vm1, %v8587_v41  ;;  %6675 = vmatprep.subr.bf16.mxu0 %v6674_v43 }
 0x189   : > { %v1663_v48 = vpop.f32.mrb[13].mxu0  ;;  %6677 = vmatpush1.bf16.msra.mxu0 %v6676_v39  ;;  %2234 = vmatprep.mubr.f32.mxu0 %v10939_v1 }
 0x18a   : > { %v1750_v52 = vpop.f32.mrb[12].mxu1  ;;  %6502 = vmatmul.mubr.msk.f32.gmra.mrb[34].mxu1 %vm2145_vm1, %v8587_v41  ;;  %6683 = vmatprep.subr.bf16.mxu1 %v6682_v46 }
 0x18b   : > { %v1752_v53 = vpop.f32.mrb[13].mxu1  ;;  %6685 = vmatpush1.bf16.msra.mxu1 %v6684_v44  ;;  %2323 = vmatprep.mubr.f32.mxu1 %v10939_v1 }
 0x18c   : > { %v1667_v56 = vpop.f32.mrb[14].mxu0  ;;  %6499 = vmatmul.mubr.msk.f32.gmra.mrb[36].mxu0 %vm2145_vm1, %v8598_v49 }
 0x18d   : > { %v6680_v57 = vpack.c.bf16 %v1667_v56, %v1661_v47  ;;  %v1669_v58 = vpop.f32.mrb[15].mxu0  ;;  %2240 = vmatprep.mubr.f32.mxu0 %v10939_v1 }
 0x18e   : > { %v1756_v62 = vpop.f32.mrb[14].mxu1  ;;  %6503 = vmatmul.mubr.msk.f32.gmra.mrb[36].mxu1 %vm2145_vm1, %v8598_v49  ;;  %v6678_v63 = vpack.c.bf16 %v1669_v58, %v1663_v48 }
 0x18f   : > { %v6688_v0 = vpack.c.bf16 %v1756_v62, %v1750_v52  ;;  %v1758_v8 = vpop.f32.mrb[15].mxu1  ;;  %2329 = vmatprep.mubr.f32.mxu1 %v10939_v1 }
 0x190   : > { %v6686_v7 = vpack.c.bf16 %v1758_v8, %v1752_v53  ;;  %v1827_v3 = vpop.f32.mrb[16].mxu0  ;;  %6500 = vmatmul.mubr.msk.f32.gmra.mrb[38].mxu0 %vm2145_vm1, %v8609_v59  ;;  %6679 = vmatprep.subr.bf16.mxu0 %v6678_v63 }
 0x191   : > { %v1829_v4 = vpop.f32.mrb[17].mxu0  ;;  %6681 = vmatpush1.bf16.msra.mxu0 %v6680_v57  ;;  %2400 = vmatprep.mubr.f32.mxu0 %v10939_v1 }
 0x192   : > { %v1916_v5 = vpop.f32.mrb[16].mxu1  ;;  %6504 = vmatmul.mubr.msk.f32.gmra.mrb[38].mxu1 %vm2145_vm1, %v8609_v59  ;;  %6687 = vmatprep.subr.bf16.mxu1 %v6686_v7 }
 0x193   : > { %v1918_v6 = vpop.f32.mrb[17].mxu1  ;;  %6689 = vmatpush1.bf16.msra.mxu1 %v6688_v0  ;;  %2489 = vmatprep.mubr.f32.mxu1 %v10939_v1 }
 0x194   : > { %v1833_v11 = vpop.f32.mrb[18].mxu0  ;;  %6505 = vmatmul.mubr.msk.f32.vlgmr.msra.gmra.mrb[40].mxu0 %vm2145_vm1, %v8579_v33 }
 0x195   : > { %v6692_v13 = vpack.c.bf16 %v1833_v11, %v1827_v3  ;;  %v1835_v14 = vpop.f32.mrb[19].mxu0  ;;  %2406 = vmatprep.mubr.f32.mxu0 %v10939_v1 }
 0x196   : > { %v1922_v15 = vpop.f32.mrb[18].mxu1  ;;  %6509 = vmatmul.mubr.msk.f32.vlgmr.msra.gmra.mrb[40].mxu1 %vm2145_vm1, %v8579_v33  ;;  %v6690_v20 = vpack.c.bf16 %v1835_v14, %v1829_v4  ;;  %v8715_v14 = vpop.permute.xlu1 %2137 }
 0x197   : > { %v6700_v36 = vpack.c.bf16 %v1922_v15, %v1916_v5  ;;  %v1924_v37 = vpop.f32.mrb[19].mxu1  ;;  %2495 = vmatprep.mubr.f32.mxu1 %v10939_v1 }
 0x198   : > { %v6698_v50 = vpack.c.bf16 %v1924_v37, %v1918_v6  ;;  %v1839_v51 = vpop.f32.mrb[20].mxu0  ;;  %6506 = vmatmul.mubr.msk.f32.gmra.mrb[42].mxu0 %vm2145_vm1, %v8587_v41  ;;  %6691 = vmatprep.subr.bf16.mxu0 %v6690_v20 }
 0x199   : > { %v1841_v54 = vpop.f32.mrb[21].mxu0  ;;  %6693 = vmatpush1.bf16.msra.mxu0 %v6692_v13  ;;  %2412 = vmatprep.mubr.f32.mxu0 %v10939_v1 }
 0x19a   : > { %v1928_v55 = vpop.f32.mrb[20].mxu1  ;;  %6510 = vmatmul.mubr.msk.f32.gmra.mrb[42].mxu1 %vm2145_vm1, %v8587_v41  ;;  %6699 = vmatprep.subr.bf16.mxu1 %v6698_v50 }
 0x19b   : > { %v1930_v60 = vpop.f32.mrb[21].mxu1  ;;  %6701 = vmatpush1.bf16.msra.mxu1 %v6700_v36  ;;  %2501 = vmatprep.mubr.f32.mxu1 %v10939_v1 }
 0x19c   : > { %v1845_v61 = vpop.f32.mrb[22].mxu0  ;;  %6507 = vmatmul.mubr.msk.f32.gmra.mrb[44].mxu0 %vm2145_vm1, %v8598_v49 }
 0x19d   : > { %v6696_v9 = vpack.c.bf16 %v1845_v61, %v1839_v51  ;;  %v1847_v10 = vpop.f32.mrb[23].mxu0  ;;  %2418 = vmatprep.mubr.f32.mxu0 %v10939_v1 }
 0x19e   : > { %v1934_v12 = vpop.f32.mrb[22].mxu1  ;;  %6511 = vmatmul.mubr.msk.f32.gmra.mrb[44].mxu1 %vm2145_vm1, %v8598_v49  ;;  %v6694_v16 = vpack.c.bf16 %v1847_v10, %v1841_v54 }
 0x19f   : > { %v6704_v17 = vpack.c.bf16 %v1934_v12, %v1928_v55  ;;  %v1936_v18 = vpop.f32.mrb[23].mxu1  ;;  %2507 = vmatprep.mubr.f32.mxu1 %v10939_v1 }
 0x1a0   : > { %v6702_v19 = vpack.c.bf16 %v1936_v18, %v1930_v60  ;;  %v2005_v21 = vpop.f32.mrb[24].mxu0  ;;  %6508 = vmatmul.mubr.msk.f32.gmra.mrb[46].mxu0 %vm2145_vm1, %v8609_v59  ;;  %6695 = vmatprep.subr.bf16.mxu0 %v6694_v16 }
 0x1a1   : > { %v2007_v22 = vpop.f32.mrb[25].mxu0  ;;  %6697 = vmatpush1.bf16.msra.mxu0 %v6696_v9  ;;  %2578 = vmatprep.mubr.f32.mxu0 %v10939_v1 }
 0x1a2   : > { %v2094_v23 = vpop.f32.mrb[24].mxu1  ;;  %6512 = vmatmul.mubr.msk.f32.gmra.mrb[46].mxu1 %vm2145_vm1, %v8609_v59  ;;  %6703 = vmatprep.subr.bf16.mxu1 %v6702_v19 }
 0x1a3   : > { %v2096_v24 = vpop.f32.mrb[25].mxu1  ;;  %6705 = vmatpush1.bf16.msra.mxu1 %v6704_v17  ;;  %2667 = vmatprep.mubr.f32.mxu1 %v10939_v1 }
 0x1a4   : > { %v2011_v25 = vpop.f32.mrb[26].mxu0  ;;  %6513 = vmatmul.mubr.msk.f32.vlgmr.msra.gmra.mrb[48].mxu0 %vm2145_vm1, %v8579_v33 }
 0x1a5   : > { %v6708_v26 = vpack.c.bf16 %v2011_v25, %v2005_v21  ;;  %v2013_v27 = vpop.f32.mrb[27].mxu0  ;;  %2584 = vmatprep.mubr.f32.mxu0 %v10939_v1 }
 0x1a6   : > { %v2100_v28 = vpop.f32.mrb[26].mxu1  ;;  %6517 = vmatmul.mubr.msk.f32.vlgmr.msra.gmra.mrb[48].mxu1 %vm2145_vm1, %v8579_v33  ;;  %v6706_v29 = vpack.c.bf16 %v2013_v27, %v2007_v22 }
 0x1a7   : > { %v6716_v30 = vpack.c.bf16 %v2100_v28, %v2094_v23  ;;  %v2102_v31 = vpop.f32.mrb[27].mxu1  ;;  %2673 = vmatprep.mubr.f32.mxu1 %v10939_v1 }
 0x1a8   : > { %v6714_v32 = vpack.c.bf16 %v2102_v31, %v2096_v24  ;;  %v2017_v34 = vpop.f32.mrb[28].mxu0  ;;  %6514 = vmatmul.mubr.msk.f32.gmra.mrb[50].mxu0 %vm2145_vm1, %v8587_v41  ;;  %6707 = vmatprep.subr.bf16.mxu0 %v6706_v29 }
 0x1a9   : > { %v2019_v35 = vpop.f32.mrb[29].mxu0  ;;  %6709 = vmatpush1.bf16.msra.mxu0 %v6708_v26  ;;  %2590 = vmatprep.mubr.f32.mxu0 %v10939_v1  ;;  %v8740_v26 = vpop.permute.xlu1 %2142 }
 0x1aa   : > { %v2106_v38 = vpop.f32.mrb[28].mxu1  ;;  %6518 = vmatmul.mubr.msk.f32.gmra.mrb[50].mxu1 %vm2145_vm1, %v8587_v41  ;;  %6715 = vmatprep.subr.bf16.mxu1 %v6714_v32 }
 0x1ab   : > { %v2108_v39 = vpop.f32.mrb[29].mxu1  ;;  %6717 = vmatpush1.bf16.msra.mxu1 %v6716_v30  ;;  %2679 = vmatprep.mubr.f32.mxu1 %v10939_v1 }
 0x1ac   : > { %v2023_v40 = vpop.f32.mrb[30].mxu0  ;;  %6515 = vmatmul.mubr.msk.f32.gmra.mrb[52].mxu0 %vm2145_vm1, %v8598_v49 }
 0x1ad   : > { %v6712_v42 = vpack.c.bf16 %v2023_v40, %v2017_v34  ;;  %v2025_v43 = vpop.f32.mrb[31].mxu0  ;;  %2596 = vmatprep.mubr.f32.mxu0 %v10939_v1 }
 0x1ae   : > { %v2112_v44 = vpop.f32.mrb[30].mxu1  ;;  %6519 = vmatmul.mubr.msk.f32.gmra.mrb[52].mxu1 %vm2145_vm1, %v8598_v49  ;;  %v6710_v45 = vpack.c.bf16 %v2025_v43, %v2019_v35 }
 0x1af   : > { %v6720_v46 = vpack.c.bf16 %v2112_v44, %v2106_v38  ;;  %v2114_v47 = vpop.f32.mrb[31].mxu1  ;;  %2685 = vmatprep.mubr.f32.mxu1 %v10939_v1 }
 0x1b0   : > { %v6718_v48 = vpack.c.bf16 %v2114_v47, %v2108_v39  ;;  %6516 = vmatmul.mubr.msk.f32.gmra.mrb[54].mxu0 %vm2145_vm1, %v8609_v59  ;;  %6711 = vmatprep.subr.bf16.mxu0 %v6710_v45 }
 0x1b1   : > { %6713 = vmatpush1.bf16.msra.mxu0 %v6712_v42  ;;  %2756 = vmatprep.mubr.f32.mxu0 %v10939_v1 }
 0x1b2   : > { %6520 = vmatmul.mubr.msk.f32.gmra.mrb[54].mxu1 %vm2145_vm1, %v8609_v59  ;;  %6719 = vmatprep.subr.bf16.mxu1 %v6718_v48 }
 0x1b3   : > { %6721 = vmatpush1.bf16.msra.mxu1 %v6720_v46  ;;  %2845 = vmatprep.mubr.f32.mxu1 %v10939_v1 }
 0x1b4   : > { %6521 = vmatmul.mubr.msk.f32.vlgmr.msra.gmra.mrb[56].mxu0 %vm2145_vm1, %v8579_v33 }
 0x1b5   : > { %2762 = vmatprep.mubr.f32.mxu0 %v10939_v1 }
 0x1b6   : > { %6525 = vmatmul.mubr.msk.f32.vlgmr.msra.gmra.mrb[56].mxu1 %vm2145_vm1, %v8579_v33  ;;  %v8692_v33 = vpop.permute.xlu0 %2127 }
 0x1b7   : > { %2851 = vmatprep.mubr.f32.mxu1 %v10939_v1 }
 0x1b8   : > { %6522 = vmatmul.mubr.msk.f32.gmra.mrb[58].mxu0 %vm2145_vm1, %v8587_v41 }
 0x1b9   : > { %2768 = vmatprep.mubr.f32.mxu0 %v10939_v1 }
 0x1ba   : > { %6526 = vmatmul.mubr.msk.f32.gmra.mrb[58].mxu1 %vm2145_vm1, %v8587_v41  ;;  %v8697_v56 = vpop.permute.xlu0 %2132 }
 0x1bb   : > { %2857 = vmatprep.mubr.f32.mxu1 %v10939_v1 }
 0x1bc   : > { %6523 = vmatmul.mubr.msk.f32.gmra.mrb[60].mxu0 %vm2145_vm1, %v8598_v49 }
 0x1bd   : > { %2774 = vmatprep.mubr.f32.mxu0 %v10939_v1 }
 0x1be   : > { %6527 = vmatmul.mubr.msk.f32.gmra.mrb[60].mxu1 %vm2145_vm1, %v8598_v49 }
 0x1bf   : > { %2863 = vmatprep.mubr.f32.mxu1 %v10939_v1 }
 0x1c0   : > { %6524 = vmatmul.mubr.msk.f32.gmra.mrb[62].mxu0 %vm2145_vm1, %v8609_v59 }
 0x1c1   : > { %3350 = vmatprep.mubr.f32.mxu0 %v10939_v1 }
 0x1c2   : > { %6528 = vmatmul.mubr.msk.f32.gmra.mrb[62].mxu1 %vm2145_vm1, %v8609_v59 }
 0x1c3   : > { %3439 = vmatprep.mubr.f32.mxu1 %v10939_v1 }
 0x257   : > { %v2224_v41 = vpop.f32.mrb[32].mxu0 }
 0x258   : > { %v8695_v52 = vadd.f32 %v2224_v41, %v8692_v33  ;;  %v2226_v53 = vpop.f32.mrb[33].mxu0 }
 0x259   : > { %v2313_v49 = vpop.f32.mrb[32].mxu1  ;;  %v8700_v57 = vadd.f32 %v2226_v53, %v8692_v33 }
 0x25a   : > { %v2870_v58 = vsub.f32 0.0, %v8695_v52  ;;  %v8704_v62 = vadd.f32 %v2313_v49, %v8692_v33  ;;  %v2315_v59 = vpop.f32.mrb[33].mxu1 }
 0x25b   : > { %v2871_v63 = vsub.f32 0.0, %v8700_v57  ;;  %v8708_v0 = vadd.f32 %v2315_v59, %v8692_v33  ;;  %v2230_v8 = vpop.f32.mrb[34].mxu0 }
 0x25c   : > { %v2934_v7 = vmul.f32 1.442695, %v2870_v58  ;;  %v2872_v3 = vsub.f32 0.0, %v8704_v62  ;;  %v8712_v4 = vadd.f32 %v2230_v8, %v8697_v56  ;;  %v2232_v5 = vpop.f32.mrb[35].mxu0 }
 0x25d   : > { %v2936_v6 = vmul.f32 1.442695, %v2871_v63  ;;  %v2873_v11 = vsub.f32 0.0, %v8708_v0  ;;  %v2319_v13 = vpop.f32.mrb[34].mxu1  ;;  %v8718_v15 = vadd.f32 %v2232_v5, %v8697_v56 }
 0x25e   : > { %7061 = vpow2.f32 %v2934_v7  ;;  %v2938_v20 = vmul.f32 1.442695, %v2872_v3  ;;  %v2886_v36 = vsub.f32 0.0, %v8712_v4  ;;  %v8722_v37 = vadd.f32 %v2319_v13, %v8697_v56  ;;  %v2321_v50 = vpop.f32.mrb[35].mxu1 }
 0x25f   : > { %7063 = vpow2.f32 %v2936_v6  ;;  %v2940_v51 = vmul.f32 1.442695, %v2873_v11  ;;  %v2887_v54 = vsub.f32 0.0, %v8718_v15  ;;  %v8726_v55 = vadd.f32 %v2321_v50, %v8697_v56  ;;  %v2236_v60 = vpop.f32.mrb[36].mxu0 }
 0x260   : > { %7065 = vpow2.f32 %v2938_v20  ;;  %v2966_v61 = vmul.f32 1.442695, %v2886_v36  ;;  %v2888_v9 = vsub.f32 0.0, %v8722_v37  ;;  %v8730_v10 = vadd.f32 %v2236_v60, %v8715_v14  ;;  %v2238_v12 = vpop.f32.mrb[37].mxu0 }
 0x261   : > { %7067 = vpow2.f32 %v2940_v51  ;;  %v2968_v16 = vmul.f32 1.442695, %v2887_v54  ;;  %v2889_v17 = vsub.f32 0.0, %v8726_v55  ;;  %v2325_v18 = vpop.f32.mrb[36].mxu1  ;;  %v8734_v19 = vadd.f32 %v2238_v12, %v8715_v14 }
 0x262   : > { %7069 = vpow2.f32 %v2966_v61  ;;  %v2970_v21 = vmul.f32 1.442695, %v2888_v9  ;;  %v2902_v22 = vsub.f32 0.0, %v8730_v10  ;;  %v8738_v23 = vadd.f32 %v2325_v18, %v8715_v14  ;;  %v2327_v24 = vpop.f32.mrb[37].mxu1 }
 0x263   : > { %7071 = vpow2.f32 %v2968_v16  ;;  %v2972_v25 = vmul.f32 1.442695, %v2889_v17  ;;  %v2903_v27 = vsub.f32 0.0, %v8734_v19  ;;  %v8744_v28 = vadd.f32 %v2327_v24, %v8715_v14  ;;  %v2242_v29 = vpop.f32.mrb[38].mxu0 }
 0x264   : > { %7073 = vpow2.f32 %v2970_v21  ;;  %v2998_v30 = vmul.f32 1.442695, %v2902_v22  ;;  %v2904_v31 = vsub.f32 0.0, %v8738_v23  ;;  %v8748_v32 = vadd.f32 %v2242_v29, %v8740_v26  ;;  %v2244_v34 = vpop.f32.mrb[39].mxu0 }
 0x265   : > { %7075 = vpow2.f32 %v2972_v25  ;;  %v3000_v35 = vmul.f32 1.442695, %v2903_v27  ;;  %v2905_v38 = vsub.f32 0.0, %v8744_v28  ;;  %v2331_v39 = vpop.f32.mrb[38].mxu1  ;;  %v8753_v45 = vadd.f32 %v2244_v34, %v8740_v26 }
 0x266   : > { %7077 = vpow2.f32 %v2998_v30  ;;  %v3002_v40 = vmul.f32 1.442695, %v2904_v31  ;;  %v2918_v42 = vsub.f32 0.0, %v8748_v32  ;;  %v2333_v43 = vpop.f32.mrb[39].mxu1  ;;  %v8756_v8 = vadd.f32 %v2331_v39, %v8740_v26 }
 0x267   : > { %7079 = vpow2.f32 %v3000_v35  ;;  %v3004_v44 = vmul.f32 1.442695, %v2905_v38  ;;  %v2402_v46 = vpop.f32.mrb[40].mxu0  ;;  %v2919_v6 = vsub.f32 0.0, %v8753_v45  ;;  %v8760_v54 = vadd.f32 %v2333_v43, %v8740_v26 }
 0x268   : > { %v7062_v47 = vpop.eup %7061  ;;  %7081 = vpow2.f32 %v3002_v40  ;;  %v3030_v48 = vmul.f32 1.442695, %v2918_v42  ;;  %v2404_v41 = vpop.f32.mrb[41].mxu0  ;;  %v2920_v12 = vsub.f32 0.0, %v8756_v8  ;;  %v8764_v16 = vadd.f32 %v2402_v46, %v8692_v33 }
 0x269   : > { %v7064_v53 = vpop.eup %7063  ;;  %v3062_v49 = vadd.f32 1.0, %v7062_v47  ;;  %7083 = vpow2.f32 %v3004_v44  ;;  %v2491_v58 = vpop.f32.mrb[40].mxu1  ;;  %v3032_v22 = vmul.f32 1.442695, %v2919_v6  ;;  %v8770_v30 = vadd.f32 %v2404_v41, %v8692_v33 }
 0x26a   : > { %v7066_v59 = vpop.eup %7065  ;;  %v3063_v63 = vadd.f32 1.0, %v7064_v53  ;;  %7085 = vpow2.f32 %v3030_v48  ;;  %v2493_v7 = vpop.f32.mrb[41].mxu1  ;;  %v8767_v24 = vadd.f32 %v2491_v58, %v8692_v33  ;;  %v2921_v39 = vsub.f32 0.0, %v8760_v54 }
 0x26b   : > { %v7068_v3 = vpop.eup %7067  ;;  %7087 = vrcp.f32 %v3062_v49  ;;  %v3064_v5 = vadd.f32 1.0, %v7066_v59  ;;  %v2408_v11 = vpop.f32.mrb[42].mxu0  ;;  %11030 = vst [vmem:[#allocation12_spill] sm:$0xff] %v8770_v30  ;;  %v8773_v31 = vadd.f32 %v2493_v7, %v8692_v33  ;;  %v3034_v46 = vmul.f32 1.442695, %v2920_v12 }
 0x26c   : > { %v7070_v13 = vpop.eup %7069  ;;  %7089 = vrcp.f32 %v3063_v63  ;;  %v3065_v20 = vadd.f32 1.0, %v7068_v3  ;;  %v2410_v36 = vpop.f32.mrb[43].mxu0  ;;  %v8779_v40 = vadd.f32 %v2408_v11, %v8697_v56  ;;  %v2874_v47 = vsub.f32 0.0, %v8764_v16 }
 0x26d   : > { %v7072_v50 = vpop.eup %7071  ;;  %7091 = vrcp.f32 %v3064_v5  ;;  %v3078_v51 = vadd.f32 1.0, %v7070_v13  ;;  %v2497_v60 = vpop.f32.mrb[42].mxu1  ;;  %11031 = vst [vmem:[#allocation13_spill] sm:$0xff] %v8773_v31  ;;  %v2876_v49 = vsub.f32 0.0, %v8767_v24  ;;  %v2875_v3 = vsub.f32 0.0, %v8770_v30 }
 0x26e   : > { %v7074_v61 = vpop.eup %7073  ;;  %7093 = vrcp.f32 %v3065_v20  ;;  %v3079_v9 = vadd.f32 1.0, %v7072_v50  ;;  %v2499_v17 = vpop.f32.mrb[43].mxu1  ;;  %v8786_v58 = vadd.f32 %v2497_v60, %v8697_v56  ;;  %v2877_v5 = vsub.f32 0.0, %v8773_v31 }
 0x26f   : > { %v7076_v18 = vpop.eup %7075  ;;  %7095 = vrcp.f32 %v3078_v51  ;;  %v3080_v21 = vadd.f32 1.0, %v7074_v61  ;;  %v2414_v25 = vpop.f32.mrb[44].mxu0  ;;  %v2890_v20 = vsub.f32 0.0, %v8779_v40  ;;  %v8796_v50 = vadd.f32 %v2410_v36, %v8697_v56 }
 0x270   : > { %v7078_v27 = vpop.eup %7077  ;;  %7097 = vrcp.f32 %v3079_v9  ;;  %v3081_v29 = vadd.f32 1.0, %v7076_v18  ;;  %v8775_v34 = vpop.f32.mrb[45].mxu0  ;;  %v3036_v61 = vmul.f32 1.442695, %v2921_v39  ;;  %v8803_v9 = vadd.f32 %v2499_v17, %v8697_v56 }
 0x271   : > { %v7080_v35 = vpop.eup %7079  ;;  %7099 = vrcp.f32 %v3080_v21  ;;  %v3094_v38 = vadd.f32 1.0, %v7078_v27  ;;  %v2503_v42 = vpop.f32.mrb[44].mxu1  ;;  %11032 = vst [vmem:[#allocation14_spill] sm:$0xff] %v8796_v50  ;;  %v2942_v21 = vmul.f32 1.442695, %v2874_v47  ;;  %v2892_v27 = vsub.f32 0.0, %v8786_v58 }
 0x272   : > { %v7082_v43 = vpop.eup %7081  ;;  %7101 = vrcp.f32 %v3081_v29  ;;  %v3095_v44 = vadd.f32 1.0, %v7080_v35  ;;  %v8782_v48 = vpop.f32.mrb[45].mxu1  ;;  %11033 = vst [vmem:[#allocation15_spill] sm:$0xff] %v8803_v9  ;;  %v8809_v29 = vadd.f32 %v2414_v25, %v8715_v14  ;;  %v2944_v39 = vmul.f32 1.442695, %v2875_v3 }
 0x273   : > { %v7084_v41 = vpop.eup %7083  ;;  %7103 = vrcp.f32 %v3094_v38  ;;  %v3096_v53 = vadd.f32 1.0, %v7082_v43  ;;  %v8788_v59 = vpop.f32.mrb[46].mxu0  ;;  %v2946_v38 = vmul.f32 1.442695, %v2876_v49  ;;  %v8816_v17 = vadd.f32 %v2503_v42, %v8715_v14 }
 0x274   : > { %v7086_v63 = vpop.eup %7085  ;;  %7105 = vrcp.f32 %v3095_v44  ;;  %v3097_v7 = vadd.f32 1.0, %v7084_v41  ;;  %v8792_v6 = vpop.f32.mrb[47].mxu0  ;;  %11034 = vst [vmem:[#allocation16_spill] sm:$0xff] %v8809_v29  ;;  %v2948_v47 = vmul.f32 1.442695, %v2877_v5  ;;  %v2893_v42 = vsub.f32 0.0, %v8803_v9 }
 0x275   : > { %v7088_v11 = vpop.eup %7087  ;;  %7107 = vrcp.f32 %v3096_v53  ;;  %v3110_v13 = vadd.f32 1.0, %v7086_v63  ;;  %v8798_v51 = vpop.f32.mrb[46].mxu1  ;;  %11035 = vst [vmem:[#allocation17_spill] sm:$0xff] %v8816_v17  ;;  %v2974_v41 = vmul.f32 1.442695, %v2890_v20  ;;  %v2891_v53 = vsub.f32 0.0, %v8796_v50 }
 0x276   : > { %v8800_v60 = vpop.eup %7089  ;;  %7109 = vrcp.f32 %v3097_v7  ;;  %v8805_v12 = vpop.f32.mrb[47].mxu1  ;;  %v8826_v7 = vmul.f32 %v7088_v11, %v8695_v52  ;;  %v2978_v5 = vmul.f32 1.442695, %v2892_v27 }
 0x277   : > { %v7092_v18 = vpop.eup %7091  ;;  %7111 = vrcp.f32 %v3110_v13  ;;  %v8811_v36 = vpop.f32.mrb[48].mxu0  ;;  %v2906_v13 = vsub.f32 0.0, %v8809_v29 }
 0x278   : > { %v8813_v35 = vpop.eup %7093  ;;  %7113 = vpow2.f32 %v3034_v46  ;;  %v8818_v43 = vpop.f32.mrb[49].mxu0  ;;  %v8835_v3 = vmul.f32 %v7092_v18, %v8704_v62  ;;  %v2976_v18 = vmul.f32 1.442695, %v2891_v53  ;;  %v8866_v53 = vadd.f32 %v8775_v34, %v8715_v14 }
 0x279   : > { %v7096_v44 = vpop.eup %7095  ;;  %7115 = vpow2.f32 %v3032_v22  ;;  %v8821_v25 = vpop.f32.mrb[48].mxu1  ;;  %v8905_v30 = vmul.f32 %v8813_v35, %v8708_v0 }
 0x27a   : > { %v8823_v63 = vpop.eup %7097  ;;  %v8829_v46 = vmul.f32 %v7096_v44, %v8712_v4  ;;  %7117 = vpow2.f32 %v3036_v61  ;;  %v8832_v49 = vpop.f32.mrb[49].mxu1  ;;  %v2908_v61 = vsub.f32 0.0, %v8816_v17  ;;  %v2980_v4 = vmul.f32 1.442695, %v2893_v42  ;;  %11036 = vst [vmem:[#allocation18_spill] sm:$0xff] %v8866_v53 }
 0x27b   : > { %v7100_v22 = vpop.eup %7099  ;;  %7119 = vpow2.f32 %v2942_v21  ;;  %v8838_v20 = vpop.f32.mrb[50].mxu0  ;;  %v8872_v42 = vadd.f32 %v8782_v48, %v8715_v14  ;;  %v8890_v48 = vmul.f32 %v8800_v60, %v8700_v57 }
 0x27c   : > { %v8840_v52 = vpop.eup %7101  ;;  %v8845_v11 = vmul.f32 %v7100_v22, %v8722_v37  ;;  %7121 = vpow2.f32 %v2946_v38  ;;  %v8848_v44 = vpop.f32.mrb[51].mxu0  ;;  %v3006_v38 = vmul.f32 1.442695, %v2906_v13 }
 0x27d   : > { %v7104_v62 = vpop.eup %7103  ;;  %7123 = vpow2.f32 %v2944_v39  ;;  %v8850_v21 = vpop.f32.mrb[50].mxu1  ;;  %v3010_v39 = vmul.f32 1.442695, %v2908_v61  ;;  %11037 = vst [vmem:[#allocation19_spill] sm:$0xff] %v8872_v42  ;;  %v2909_v57 = vsub.f32 0.0, %v8872_v42 }
 0x27e   : > { %v8852_v27 = vpop.eup %7105  ;;  %7125 = vpow2.f32 %v2948_v47  ;;  %v8856_v2 = vpop.f32.mrb[51].mxu1  ;;  %v8881_v61 = vmul.f32 %v7104_v62, %v8730_v10 }
 0x27f   : > { %v8858_v37 = vpop.eup %7107  ;;  %7127 = vpow2.f32 %v2974_v41  ;;  %v8860_v22 = vpop.f32.mrb[52].mxu0  ;;  %v8876_v41 = vadd.f32 %v8788_v59, %v8740_v26 }
 0x280   : > { %v8862_v17 = vpop.eup %7109  ;;  %7129 = vpow2.f32 %v2978_v5  ;;  %v8868_v29 = vpop.f32.mrb[53].mxu0  ;;  %11039 = vst [vmem:[#allocation21_spill] sm:$0xff] %v8881_v61 }
 0x281   : > { %v7112_v47 = vpop.eup %7111  ;;  %7131 = vpow2.f32 %v2976_v18  ;;  %11038 = vst [vmem:[#allocation20_spill] sm:$0xff] %v8876_v41  ;;  %v8878_v13 = vpop.f32.mrb[52].mxu1  ;;  %v2922_v60 = vsub.f32 0.0, %v8876_v41 }
 0x282   : > { %v7114_v5 = vpop.eup %7113  ;;  %v8884_v34 = vmul.f32 %v7112_v47, %v8748_v32  ;;  %7133 = vpow2.f32 %v2980_v4  ;;  %v8886_v1 = vpop.f32.mrb[53].mxu1  ;;  %v2907_v32 = vsub.f32 0.0, %v8866_v53  ;;  %v8919_v53 = vadd.f32 %v8792_v6, %v8740_v26 }
 0x283   : > { %v7116_v18 = vpop.eup %7115  ;;  %v3112_v9 = vadd.f32 1.0, %v7114_v5  ;;  %7135 = vpow2.f32 %v3006_v38  ;;  %v8892_v59 = vpop.f32.mrb[54].mxu0 }
 0x284   : > { %v7118_v50 = vpop.eup %7117  ;;  %v3111_v62 = vadd.f32 1.0, %v7116_v18  ;;  %7137 = vpow2.f32 %v3010_v39  ;;  %v8897_v4 = vpop.f32.mrb[55].mxu0  ;;  %v8909_v18 = vadd.f32 %v8798_v51, %v8740_v26  ;;  %11042 = vst [vmem:[#allocation24_spill] sm:$0xff] %v8919_v53  ;;  %v8925_v51 = vmul.f32 %v8840_v52, %v8726_v55 }
 0x285   : > { %v7120_v47 = vpop.eup %7119  ;;  %7139 = vrcp.f32 %v3112_v9  ;;  %v3113_v31 = vadd.f32 1.0, %v7118_v50  ;;  %v8901_v38 = vpop.f32.mrb[54].mxu1  ;;  %v8915_v9 = vmul.f32 %v8823_v63, %v8718_v15  ;;  %v3012_v63 = vmul.f32 1.442695, %v2909_v57 }
 0x286   : > { %v7122_v5 = vpop.eup %7121  ;;  %7141 = vrcp.f32 %v3111_v62  ;;  %v3066_v39 = vadd.f32 1.0, %v7120_v47  ;;  %11040 = vst [vmem:[#allocation22_spill] sm:$0xff] %v8909_v18  ;;  %v8911_v10 = vpop.f32.mrb[55].mxu1  ;;  %v3008_v47 = vmul.f32 1.442695, %v2907_v32  ;;  %v2924_v61 = vsub.f32 0.0, %v8909_v18 }
 0x287   : > { %11041 = vst [vmem:[#allocation23_spill] sm:$0xff] %v8911_v10  ;;  %v7124_v50 = vpop.eup %7123  ;;  %7143 = vrcp.f32 %v3113_v31  ;;  %v3068_v42 = vadd.f32 1.0, %v7122_v5  ;;  %v8921_v0 = vpop.f32.mrb[56].mxu0  ;;  %v3038_v5 = vmul.f32 1.442695, %v2922_v60  ;;  %v8934_v55 = vadd.f32 %v8805_v12, %v8740_v26 }
 0x288   : > { %11043 = vst [vmem:[#allocation25_spill] sm:$0xff] %v8921_v0  ;;  %v7126_v35 = vpop.eup %7125  ;;  %7145 = vrcp.f32 %v3066_v39  ;;  %v3067_v62 = vadd.f32 1.0, %v7124_v50  ;;  %v8927_v41 = vpop.f32.mrb[57].mxu0  ;;  %v8941_v57 = vadd.f32 %v8811_v36, %v8692_v33  ;;  %v8957_v36 = vadd.f32 %v8818_v43, %v8692_v33 }
 0x289   : > { %v7128_v15 = vpop.eup %7127  ;;  %7147 = vrcp.f32 %v3068_v42  ;;  %v3069_v31 = vadd.f32 1.0, %v7126_v35  ;;  %v8929_v10 = vpop.f32.mrb[56].mxu1  ;;  %v2923_v42 = vsub.f32 0.0, %v8919_v53  ;;  %v8947_v35 = vmul.f32 %v8858_v37, %v8738_v23 }
 0x28a   : > { %v7130_v6 = vpop.eup %7129  ;;  %7149 = vrcp.f32 %v3067_v62  ;;  %v3082_v0 = vadd.f32 1.0, %v7128_v15  ;;  %v8936_v52 = vpop.f32.mrb[57].mxu1  ;;  %v8951_v62 = vadd.f32 %v8821_v25, %v8692_v33  ;;  %11046 = vst [vmem:[#allocation28_spill] sm:$0xff] %v8957_v36  ;;  %v8961_v53 = vadd.f32 %v8832_v49, %v8692_v33 }
 0x28b   : > { %v7132_v32 = vpop.eup %7131  ;;  %7151 = vrcp.f32 %v3069_v31  ;;  %v3084_v39 = vadd.f32 1.0, %v7130_v6  ;;  %v8943_v60 = vpop.f32.mrb[58].mxu0  ;;  %v3042_v25 = vmul.f32 1.442695, %v2924_v61  ;;  %v2878_v43 = vsub.f32 0.0, %v8941_v57 }
 0x28c   : > { %11044 = vst [vmem:[#allocation26_spill] sm:$0xff] %v8943_v60  ;;  %v7134_v50 = vpop.eup %7133  ;;  %7153 = vrcp.f32 %v3082_v0  ;;  %v3083_v12 = vadd.f32 1.0, %v7132_v32  ;;  %v8953_v15 = vpop.f32.mrb[59].mxu0  ;;  %11047 = vst [vmem:[#allocation29_spill] sm:$0xff] %v8961_v53  ;;  %v2925_v32 = vsub.f32 0.0, %v8934_v55  ;;  %v2880_v61 = vsub.f32 0.0, %v8951_v62 }
 0x28d   : > { %11045 = vst [vmem:[#allocation27_spill] sm:$0xff] %v8953_v15  ;;  %v7136_v31 = vpop.eup %7135  ;;  %7155 = vrcp.f32 %v3084_v39  ;;  %v3085_v6 = vadd.f32 1.0, %v7134_v50  ;;  %v8963_v23 = vpop.f32.mrb[58].mxu1  ;;  %v3040_v60 = vmul.f32 1.442695, %v2923_v42  ;;  %v2879_v42 = vsub.f32 0.0, %v8957_v36 }
 0x28e   : > { %11048 = vst [vmem:[#allocation30_spill] sm:$0xff] %v8963_v23  ;;  %v7138_v37 = vpop.eup %7137  ;;  %7157 = vrcp.f32 %v3083_v12  ;;  %v3098_v0 = vadd.f32 1.0, %v7136_v31  ;;  %v8966_v15 = vpop.f32.mrb[59].mxu1  ;;  %v8979_v12 = vadd.f32 %v8838_v20, %v8697_v56 }
 0x28f   : > { %11049 = vst [vmem:[#allocation31_spill] sm:$0xff] %v8966_v15  ;;  %v7140_v39 = vpop.eup %7139  ;;  %7159 = vrcp.f32 %v3085_v6  ;;  %v3100_v50 = vadd.f32 1.0, %v7138_v37  ;;  %v8969_v18 = vpop.f32.mrb[60].mxu0  ;;  %v2881_v37 = vsub.f32 0.0, %v8961_v53 }
 0x290   : > { %11050 = vst [vmem:[#allocation32_spill] sm:$0xff] %v8969_v18  ;;  %v8971_v49 = vpop.eup %7141  ;;  %v8974_v23 = vmul.f32 %v7140_v39, %v8756_v8  ;;  %7161 = vrcp.f32 %v3098_v0  ;;  %v8981_v31 = vpop.f32.mrb[61].mxu0  ;;  %v8989_v8 = vadd.f32 %v8850_v21, %v8697_v56  ;;  %v3044_v21 = vmul.f32 1.442695, %v2925_v32 }
 0x291   : > { %11051 = vst [vmem:[#allocation33_spill] sm:$0xff] %v8981_v31  ;;  %v8983_v6 = vpop.eup %7143  ;;  %7163 = vrcp.f32 %v3100_v50  ;;  %v8991_v0 = vpop.f32.mrb[60].mxu1  ;;  %v8997_v31 = vadd.f32 %v8848_v44, %v8697_v56  ;;  %v6722_v50 = vpack.c.bf16 %v8915_v9, %v8890_v48  ;;  %v2894_v44 = vsub.f32 0.0, %v8979_v12 }
 0x292   : > { %11052 = vst [vmem:[#allocation34_spill] sm:$0xff] %v8991_v0  ;;  %v7146_v39 = vpop.eup %7145  ;;  %7165 = vpow2.f32 %v3008_v47  ;;  %v9001_v18 = vpop.f32.mrb[61].mxu1  ;;  %v6730_v0 = vpack.c.bf16 %v8925_v51, %v8905_v30  ;;  %v2950_v47 = vmul.f32 1.442695, %v2878_v43  ;;  %v2954_v9 = vmul.f32 1.442695, %v2880_v61 }
 0x293   : > { %v7148_v53 = vpop.eup %7147  ;;  %7167 = vpow2.f32 %v3012_v63  ;;  %v9005_v15 = vpop.f32.mrb[62].mxu0  ;;  %6723 = vmatprep.subr.bf16.mxu0 %v6722_v50  ;;  %v2952_v63 = vmul.f32 1.442695, %v2879_v42  ;;  %v2896_v32 = vsub.f32 0.0, %v8989_v8  ;;  %v11054_v30 = vpack.c.bf16 %v8829_v46, %v8826_v7 }
 0x294   : > { %v9007_v36 = vpop.eup %7149  ;;  %7169 = vpow2.f32 %v3038_v5  ;;  %v9010_v20 = vpop.f32.mrb[63].mxu0  ;;  %6731 = vmatprep.subr.bf16.mxu1 %v6730_v0  ;;  %v2956_v43 = vmul.f32 1.442695, %v2881_v37  ;;  %v2895_v50 = vsub.f32 0.0, %v8997_v31  ;;  %v9031_v7 = vmul.f32 %v7146_v39, %v8764_v16 }
 0x295   : > { %11053 = vst [vmem:[#allocation35_spill] sm:$0xff] %v9010_v20  ;;  %v9012_v48 = vpop.eup %7151  ;;  %7171 = vpow2.f32 %v3042_v25  ;;  %6725 = vmatpush1.bf16.msra.mxu0 %v11054_v30  ;;  %v9018_v51 = vpop.f32.mrb[62].mxu1  ;;  %v9023_v20 = vadd.f32 %v8856_v2, %v8697_v56  ;;  %v11055_v25 = vpack.c.bf16 %v8845_v11, %v8835_v3  ;;  %v9043_v37 = vmul.f32 %v7148_v53, %v8767_v24 }
 0x296   : > { %v7154_v5 = vpop.eup %7153  ;;  %7173 = vpow2.f32 %v3040_v60  ;;  %v9028_v61 = vpop.f32.mrb[63].mxu1  ;;  %v9038_v60 = vadd.f32 %v8860_v22, %v8715_v14  ;;  %v2982_v11 = vmul.f32 1.442695, %v2894_v44  ;;  %v2986_v0 = vmul.f32 1.442695, %v2896_v32  ;;  %v11074_v22 = vld [vmem:[#allocation30_spill] sm:$0xff] }
 0x297   : > { %6733 = vmatpush1.bf16.msra.mxu1 %v11055_v25  ;;  %v7156_v42 = vpop.eup %7155  ;;  %v9034_v46 = vmul.f32 %v7154_v5, %v8779_v40  ;;  %7175 = vpow2.f32 %v3044_v21  ;;  %v2984_v24 = vmul.f32 1.442695, %v2895_v50  ;;  %v2897_v53 = vsub.f32 0.0, %v9023_v20 }
 0x298   : > { %v9040_v2 = vpop.eup %7157  ;;  %v9046_v3 = vmul.f32 %v7156_v42, %v8786_v58  ;;  %7177 = vpow2.f32 %v2950_v47  ;;  %v3223_v21 = vmul.f32 %v8852_v27, %v8734_v19  ;;  %v2910_v47 = vsub.f32 0.0, %v9038_v60 }
 0x299   : > { %v9048_v16 = vpop.eup %7159  ;;  %7179 = vpow2.f32 %v2954_v9  ;;  %v9064_v44 = vadd.f32 %v8878_v13, %v8715_v14  ;;  %v3225_v32 = vmul.f32 %v8862_v17, %v8744_v28  ;;  %v9074_v30 = vadd.f32 %v8886_v1, %v8715_v14 }
 0x29a   : > { %v9052_v39 = vpop.eup %7161  ;;  %7181 = vpow2.f32 %v2952_v63  ;;  %v9070_v63 = vadd.f32 %v8868_v29, %v8715_v14  ;;  %v3239_v27 = vmul.f32 %v8971_v49, %v8753_v45  ;;  %v3241_v13 = vmul.f32 %v8983_v6, %v8760_v54 }
 0x29b   : > { %v9057_v58 = vpop.eup %7163  ;;  %7183 = vpow2.f32 %v2956_v43  ;;  %v9080_v17 = vmul.f32 1.442695, %v2897_v53  ;;  %v9084_v29 = vadd.f32 %v8892_v59, %v8740_v26  ;;  %v9086_v25 = vmul.f32 1.442695, %v2910_v47 }
 0x29c   : > { %v7166_v9 = vpop.eup %7165  ;;  %7185 = vpow2.f32 %v2982_v11  ;;  %v2912_v45 = vsub.f32 0.0, %v9064_v44  ;;  %v2911_v6 = vsub.f32 0.0, %v9070_v63  ;;  %v2913_v42 = vsub.f32 0.0, %v9074_v30 }
 0x29d   : > { %v7168_v19 = vpop.eup %7167  ;;  %v3099_v5 = vadd.f32 1.0, %v7166_v9  ;;  %7187 = vpow2.f32 %v2986_v0  ;;  %v6734_v59 = vpack.c.bf16 %v3241_v13, %v3225_v32  ;;  %v11056_v9 = vld [vmem:[#allocation12_spill] sm:$0xff]  ;;  %v11057_v32 = vld [vmem:[#allocation13_spill] sm:$0xff]  ;;  %v9108_v13 = vadd.f32 %v8897_v4, %v8740_v26 }
 0x29e   : > { %v7170_v43 = vpop.eup %7169  ;;  %v3101_v28 = vadd.f32 1.0, %v7168_v19  ;;  %7189 = vpow2.f32 %v2984_v24  ;;  %v6726_v24 = vpack.c.bf16 %v3239_v27, %v3223_v21  ;;  %v9093_v19 = vmul.f32 %v9007_v36, %v11056_v9 }
 0x29f   : > { %v7172_v1 = vpop.eup %7171  ;;  %7191 = vrcp.f32 %v3099_v5  ;;  %v3114_v50 = vadd.f32 1.0, %v7170_v43  ;;  %v2926_v5 = vsub.f32 0.0, %v9084_v29  ;;  %6735 = vmatprep.subr.bf16.mxu1 %v6734_v59  ;;  %v9104_v36 = vmul.f32 %v9012_v48, %v11057_v32  ;;  %v11061_v59 = vld [vmem:[#allocation14_spill] sm:$0xff] }
 0x2a0   : > { %v7174_v49 = vpop.eup %7173  ;;  %7193 = vrcp.f32 %v3101_v28  ;;  %v3116_v54 = vadd.f32 1.0, %v7172_v1  ;;  %v9096_v1 = vmul.f32 1.442695, %v2912_v45  ;;  %6727 = vmatprep.subr.bf16.mxu0 %v6726_v24  ;;  %v11058_v45 = vld [vmem:[#allocation21_spill] sm:$0xff]  ;;  %v9121_v24 = vmul.f32 1.442695, %v2913_v42 }
 0x2a1   : > { %v7176_v11 = vpop.eup %7175  ;;  %7195 = vrcp.f32 %v3114_v50  ;;  %v3115_v0 = vadd.f32 1.0, %v7174_v49  ;;  %v9100_v50 = vadd.f32 %v8901_v38, %v8740_v26  ;;  %v11059_v49 = vpack.c.bf16 %v8884_v34, %v11058_v45 }
 0x2a2   : > { %v7178_v53 = vpop.eup %7177  ;;  %7197 = vrcp.f32 %v3116_v54  ;;  %v3117_v47 = vadd.f32 1.0, %v7176_v11  ;;  %v11060_v38 = vpack.c.bf16 %v8974_v23, %v8947_v35  ;;  %v9119_v54 = vld [vmem:[%s10931_s4] sm:$0xff]  ;;  %v9125_v34 = vmul.f32 %v9040_v2, %v11061_v59  ;;  %v11067_v59 = vld [vmem:[#allocation16_spill] sm:$0xff] }
 0x2a3   : > { %v7180_v43 = vpop.eup %7179  ;;  %7199 = vrcp.f32 %v3115_v0  ;;  %v3070_v28 = vadd.f32 1.0, %v7178_v53  ;;  %6729 = vmatpush1.bf16.msra.mxu0 %v11059_v49  ;;  %v3016_v0 = vmul.f32 1.442695, %v2911_v6  ;;  %v9127_v35 = vmul.f32 1.442695, %v2926_v5  ;;  %v11063_v5 = vld [vmem:[#allocation25_spill] sm:$0xff] }
 0x2a4   : > { %v7182_v21 = vpop.eup %7181  ;;  %7201 = vrcp.f32 %v3117_v47  ;;  %v3072_v27 = vadd.f32 1.0, %v7180_v43  ;;  %6737 = vmatpush1.bf16.msra.mxu1 %v11060_v38  ;;  %v2928_v47 = vsub.f32 0.0, %v9100_v50  ;;  %v11062_v43 = vld [vmem:[#allocation23_spill] sm:$0xff]  ;;  %v2927_v42 = vsub.f32 0.0, %v9108_v13 }
 0x2a5   : > { %v7184_v48 = vpop.eup %7183  ;;  %7203 = vrcp.f32 %v3070_v28  ;;  %v3071_v11 = vadd.f32 1.0, %v7182_v21  ;;  %v9132_v28 = vadd.f32 %v11062_v43, %v8740_v26  ;;  %v9141_v21 = vadd.f32 %v11063_v5, %v8692_v33  ;;  %v11065_v49 = vld [vmem:[#allocation15_spill] sm:$0xff] }
 0x2a6   : > { %v7186_v4 = vpop.eup %7185  ;;  %7205 = vrcp.f32 %v3072_v27  ;;  %v3073_v53 = vadd.f32 1.0, %v7184_v48  ;;  %6529 = vmatmul.mubr.msk.f32.vlgmr.msra.gmra.mrb[64].mxu0 %vm2145_vm1, %v9119_v54  ;;  %v11064_v32 = vmov 0.0   ;;  %v9148_v27 = vld [vmem:[%s10931_s4 + $0x8] sm:$0xff]  ;;  %v3213_v38 = vmul.f32 %v9048_v16, %v11065_v49  ;;  %v11072_v49 = vld [vmem:[#allocation22_spill] sm:$0xff] }
 0x2a7   : > { %v7188_v23 = vpop.eup %7187  ;;  %7207 = vrcp.f32 %v3071_v11  ;;  %v3086_v9 = vadd.f32 1.0, %v7186_v4  ;;  %6533 = vmatmul.mubr.msk.f32.vlgmr.msra.gmra.mrb[64].mxu1 %vm2145_vm1, %v9119_v54  ;;  %3356 = vmatprep.mubr.f32.mxu0 %v11064_v32  ;;  %v9156_v11 = vadd.f32 %v8929_v10, %v8692_v33  ;;  %v9170_v16 = vadd.f32 %v8927_v41, %v8692_v33 }
 0x2a8   : > { %v7190_v2 = vpop.eup %7189  ;;  %7209 = vrcp.f32 %v3073_v53  ;;  %v3088_v6 = vadd.f32 1.0, %v7188_v23  ;;  %3445 = vmatprep.mubr.f32.mxu1 %v11064_v32  ;;  %v9162_v53 = vmul.f32 %v9052_v39, %v11067_v59  ;;  %v11068_v23 = vld [vmem:[#allocation17_spill] sm:$0xff]  ;;  %v2929_v10 = vsub.f32 0.0, %v9132_v28 }
 0x2a9   : > { %v9150_v45 = vpop.eup %7191  ;;  %7211 = vrcp.f32 %v3086_v9  ;;  %v3087_v48 = vadd.f32 1.0, %v7190_v2  ;;  %11066 = vst [vmem:[#allocation12_spill] sm:$0xff] %v9156_v11  ;;  %v9166_v43 = vmul.f32 %v9057_v58, %v11068_v23  ;;  %11069 = vst [vmem:[#allocation13_spill] sm:$0xff] %v9170_v16  ;;  %v3050_v2 = vmul.f32 1.442695, %v2928_v47  ;;  %v11071_v58 = vld [vmem:[#allocation20_spill] sm:$0xff] }
 0x2aa   : > { %v9158_v4 = vpop.eup %7193  ;;  %7213 = vrcp.f32 %v3088_v6  ;;  %v9175_v5 = vadd.f32 %v8936_v52, %v8692_v33  ;;  %6530 = vmatmul.mubr.msk.f32.gmra.mrb[66].mxu0 %vm2145_vm1, %v9148_v27  ;;  %v3048_v41 = vmul.f32 1.442695, %v2927_v42  ;;  %v2882_v47 = vsub.f32 0.0, %v9141_v21  ;;  %v9191_v33 = vld [vmem:[%s10931_s4 + $0x10] sm:$0xff]  ;;  %v11073_v42 = vld [vmem:[#allocation26_spill] sm:$0xff] }
 0x2ab   : > { %v7196_v9 = vpop.eup %7195  ;;  %7215 = vrcp.f32 %v3087_v48  ;;  %6534 = vmatmul.mubr.msk.f32.gmra.mrb[66].mxu1 %vm2145_vm1, %v9148_v27  ;;  %3362 = vmatprep.mubr.f32.mxu0 %v11064_v32  ;;  %v9200_v59 = vadd.f32 %v11073_v42, %v8697_v56  ;;  %v6738_v40 = vpack.c.bf16 %v9125_v34, %v9093_v19  ;;  %v9226_v19 = vld [vmem:[%s10931_s4 + $0x18] sm:$0xff] }
 0x2ac   : > { %11070 = vst [vmem:[#allocation21_spill] sm:$0xff] %v9175_v5  ;;  %v7198_v39 = vpop.eup %7197  ;;  %v9182_v6 = vmul.f32 %v7196_v9, %v11071_v58  ;;  %7217 = vpow2.f32 %v9080_v17  ;;  %3451 = vmatprep.mubr.f32.mxu1 %v11064_v32  ;;  %v2884_v17 = vsub.f32 0.0, %v9156_v11  ;;  %v2883_v58 = vsub.f32 0.0, %v9170_v16 }
 0x2ad   : > { %v7200_v52 = vpop.eup %7199  ;;  %v9194_v48 = vmul.f32 %v7198_v39, %v11072_v49  ;;  %7219 = vpow2.f32 %v9086_v25  ;;  %v9208_v39 = vadd.f32 %v11074_v22, %v8697_v56  ;;  %v2885_v42 = vsub.f32 0.0, %v9175_v5  ;;  %6739 = vmatprep.subr.bf16.mxu0 %v6738_v40 }
 0x2ae   : > { %v7202_v23 = vpop.eup %7201  ;;  %7221 = vpow2.f32 %v9096_v1  ;;  %6531 = vmatmul.mubr.msk.f32.gmra.mrb[68].mxu0 %vm2145_vm1, %v9191_v33  ;;  %v3052_v22 = vmul.f32 1.442695, %v2929_v10  ;;  %v6746_v9 = vpack.c.bf16 %v3213_v38, %v9104_v36  ;;  %v2958_v34 = vmul.f32 1.442695, %v2882_v47 }
 0x2af   : > { %v7204_v49 = vpop.eup %7203  ;;  %7223 = vpow2.f32 %v3016_v0  ;;  %6535 = vmatmul.mubr.msk.f32.gmra.mrb[68].mxu1 %vm2145_vm1, %v9191_v33  ;;  %3368 = vmatprep.mubr.f32.mxu0 %v11064_v32  ;;  %v2898_v36 = vsub.f32 0.0, %v9200_v59  ;;  %v11075_v38 = vpack.c.bf16 %v9034_v46, %v9031_v7  ;;  %v2960_v5 = vmul.f32 1.442695, %v2883_v58 }
 0x2b0   : > { %v7206_v1 = vpop.eup %7205  ;;  %7225 = vpow2.f32 %v9121_v24  ;;  %3457 = vmatprep.mubr.f32.mxu1 %v11064_v32  ;;  %v2962_v24 = vmul.f32 1.442695, %v2884_v17  ;;  %6747 = vmatprep.subr.bf16.mxu1 %v6746_v9  ;;  %v2964_v16 = vmul.f32 1.442695, %v2885_v42  ;;  %v2900_v11 = vsub.f32 0.0, %v9208_v39 }
 0x2b1   : > { %v7208_v0 = vpop.eup %7207  ;;  %7227 = vpow2.f32 %v9127_v35  ;;  %6741 = vmatpush1.bf16.msra.mxu0 %v11075_v38  ;;  %v11076_v40 = vpack.c.bf16 %v9046_v3, %v9043_v37  ;;  %v9243_v17 = vmul.f32 %v7204_v49, %v8941_v57  ;;  %v3245_v37 = vmul.f32 %v7202_v23, %v8934_v55  ;;  %v11079_v23 = vld [vmem:[#allocation19_spill] sm:$0xff] }
 0x2b2   : > { %v9229_v25 = vpop.eup %7209  ;;  %7229 = vpow2.f32 %v3050_v2  ;;  %6532 = vmatmul.mubr.msk.f32.gmra.mrb[70].mxu0 %vm2145_vm1, %v9226_v19  ;;  %v11077_v2 = vld [vmem:[#allocation24_spill] sm:$0xff]  ;;  %v9253_v3 = vmul.f32 %v7206_v1, %v8951_v62  ;;  %v3229_v62 = vmul.f32 %v9158_v4, %v11079_v23  ;;  %v11081_v4 = vld [vmem:[#allocation27_spill] sm:$0xff] }
 0x2b3   : > { %v7212_v10 = vpop.eup %7211  ;;  %7231 = vpow2.f32 %v3048_v41  ;;  %6749 = vmatpush1.bf16.msra.mxu1 %v11076_v40  ;;  %v3243_v47 = vmul.f32 %v7200_v52, %v11077_v2  ;;  %3528 = vmatprep.mubr.f32.mxu0 %v11064_v32  ;;  %v11080_v1 = vld [vmem:[#allocation28_spill] sm:$0xff] }
 0x2b4   : > { %v7214_v35 = vpop.eup %7213  ;;  %v9246_v7 = vmul.f32 %v7212_v10, %v8979_v12  ;;  %7233 = vpow2.f32 %v3052_v22  ;;  %6536 = vmatmul.mubr.msk.f32.gmra.mrb[70].mxu1 %vm2145_vm1, %v9226_v19  ;;  %v11078_v12 = vld [vmem:[#allocation18_spill] sm:$0xff]  ;;  %v3199_v22 = vmul.f32 %v7208_v0, %v11080_v1 }
 0x2b5   : > { %v7216_v46 = vpop.eup %7215  ;;  %v9256_v41 = vmul.f32 %v7214_v35, %v8989_v8  ;;  %7235 = vpow2.f32 %v2958_v34  ;;  %3617 = vmatprep.mubr.f32.mxu1 %v11064_v32  ;;  %v3227_v52 = vmul.f32 %v9150_v45, %v11078_v12  ;;  %v9271_v35 = vadd.f32 %v11081_v4, %v8697_v56 }
 0x2b6   : > { %v7218_v57 = vpop.eup %7217  ;;  %v6756_v9 = vpack.c.bf16 %v9246_v7, %v9243_v17  ;;  %v3215_v58 = vmul.f32 %v7216_v46, %v8997_v31  ;;  %7237 = vpow2.f32 %v2962_v24  ;;  %v6750_v31 = vpack.c.bf16 %v3245_v37, %v3229_v62  ;;  %v11088_v17 = vld [vmem:[#allocation35_spill] sm:$0xff] }
 0x2b7   : > { %v7220_v55 = vpop.eup %7219  ;;  %v6764_v8 = vpack.c.bf16 %v9256_v41, %v9253_v3  ;;  %v3089_v49 = vadd.f32 1.0, %v7218_v57  ;;  %7239 = vpow2.f32 %v2960_v5  ;;  %v6742_v45 = vpack.c.bf16 %v3243_v47, %v3227_v52 }
 0x2b8   : > { %v7222_v42 = vpop.eup %7221  ;;  %v3102_v34 = vadd.f32 1.0, %v7220_v55  ;;  %7241 = vpow2.f32 %v2964_v16  ;;  %v6754_v2 = vpack.c.bf16 %v3215_v58, %v3199_v22  ;;  %6751 = vmatprep.subr.bf16.mxu1 %v6750_v31  ;;  %v11082_v16 = vpack.c.bf16 %v9182_v6, %v9162_v53  ;;  %v11084_v55 = vld [vmem:[#allocation31_spill] sm:$0xff]  ;;  %v11085_v53 = vld [vmem:[#allocation32_spill] sm:$0xff]  ;;  %v11087_v22 = vld [vmem:[#allocation33_spill] sm:$0xff] }
 0x2b9   : > { %v7224_v38 = vpop.eup %7223  ;;  %7243 = vrcp.f32 %v3089_v49  ;;  %v3104_v10 = vadd.f32 1.0, %v7222_v42  ;;  %6743 = vmatprep.subr.bf16.mxu0 %v6742_v45  ;;  %v9276_v37 = vmul.f32 1.442695, %v2898_v36  ;;  %v9278_v57 = vmul.f32 1.442695, %v2900_v11 }
 0x2ba   : > { %v7226_v24 = vpop.eup %7225  ;;  %7245 = vrcp.f32 %v3102_v34  ;;  %v3103_v40 = vadd.f32 1.0, %v7224_v38  ;;  %6745 = vmatpush1.bf16.msra.mxu0 %v11082_v16  ;;  %v11083_v12 = vpack.c.bf16 %v9194_v48, %v9166_v43  ;;  %v9285_v23 = vadd.f32 %v11084_v55, %v8697_v56  ;;  %v11086_v48 = vld [vmem:[#allocation34_spill] sm:$0xff]  ;;  %v7829_v56 = vld [vmem:[%s10934_s7] sm:$0xff] }
 0x2bb   : > { %v7228_v5 = vpop.eup %7227  ;;  %7247 = vrcp.f32 %v3104_v10  ;;  %v3105_v46 = vadd.f32 1.0, %v7226_v24  ;;  %6755 = vmatprep.subr.bf16.mxu0 %v6754_v2  ;;  %v9289_v6 = vadd.f32 %v11085_v53, %v8715_v14  ;;  %v7953_v36 = vmov 1  }
 0x2bc   : > { %v7230_v0 = vpop.eup %7229  ;;  %7249 = vrcp.f32 %v3103_v40  ;;  %v3118_v47 = vadd.f32 1.0, %v7228_v5  ;;  %6753 = vmatpush1.bf16.msra.mxu1 %v11083_v12  ;;  %7057 = vset.pattern.permute.xlu0 %v7953_v36  ;;  %v2899_v43 = vsub.f32 0.0, %v9271_v35  ;;  %v9294_v49 = vadd.f32 %v11086_v48, %v8715_v14 }
 0x2bd   : > { %v7232_v52 = vpop.eup %7231  ;;  %7251 = vrcp.f32 %v3105_v46  ;;  %v3120_v58 = vadd.f32 1.0, %v7230_v0  ;;  %7058 = vset.pattern.permute.xlu1 %v7953_v36  ;;  %6537 = vmatmul.mubr.msk.f32.vlgmr.msra.gmra.mrb[72].mxu0 %vm2145_vm1, %v9119_v54  ;;  %v9303_v34 = vadd.f32 %v11087_v22, %v8715_v14  ;;  %v9307_v45 = vadd.f32 %v9001_v18, %v8715_v14  ;;  %v11089_v0 = vld [vmem:[#allocation29_spill] sm:$0xff] }
 0x2be   : > { %v7234_v11 = vpop.eup %7233  ;;  %7253 = vrcp.f32 %v3118_v47  ;;  %v3119_v62 = vadd.f32 1.0, %v7232_v52  ;;  %3259 = vperm.xlu0 %7057, %v7829_v56   ;;  %3534 = vmatprep.mubr.f32.mxu0 %v11064_v32  ;;  %v9314_v31 = vadd.f32 %v9005_v15, %v8740_v26  ;;  %v9318_v24 = vadd.f32 %v9018_v51, %v8740_v26  ;;  %v7830_v15 = vld [vmem:[%s10934_s7 + $0x8] sm:$0xff] }
 0x2bf   : > { %v7236_v42 = vpop.eup %7235  ;;  %7255 = vrcp.f32 %v3120_v58  ;;  %v3121_v1 = vadd.f32 1.0, %v7234_v11  ;;  %6541 = vmatmul.mubr.msk.f32.vlgmr.msra.gmra.mrb[72].mxu1 %vm2145_vm1, %v9119_v54  ;;  %6757 = vmatpush1.bf16.msra.mxu0 %v6756_v9  ;;  %v2901_v40 = vsub.f32 0.0, %v9285_v23  ;;  %v2914_v4 = vsub.f32 0.0, %v9289_v6  ;;  %v7831_v9 = vld [vmem:[%s10934_s7 + $0x18] sm:$0xff] }
 0x2c0   : > { %v7238_v38 = vpop.eup %7237  ;;  %7257 = vrcp.f32 %v3119_v62  ;;  %v3074_v10 = vadd.f32 1.0, %v7236_v42  ;;  %3623 = vmatprep.mubr.f32.mxu1 %v11064_v32  ;;  %3263 = vperm.xlu1 %7058, %v7830_v15   ;;  %v2992_v5 = vmul.f32 1.442695, %v2899_v43  ;;  %v2916_v46 = vsub.f32 0.0, %v9294_v49  ;;  %v7832_v43 = vld [vmem:[%s10934_s7 + $0x10] sm:$0xff] }
 0x2c1   : > { %v7240_v14 = vpop.eup %7239  ;;  %7259 = vrcp.f32 %v3121_v1  ;;  %v3076_v18 = vadd.f32 1.0, %v7238_v38  ;;  %v9334_v7 = vadd.f32 %v11088_v17, %v8740_v26  ;;  %6538 = vmatmul.mubr.msk.f32.gmra.mrb[74].mxu0 %vm2145_vm1, %v9148_v27  ;;  %v3201_v47 = vmul.f32 %v9229_v25, %v11089_v0 }
 0x2c2   : > { %v9329_v51 = vpop.eup %7241  ;;  %v3075_v2 = vadd.f32 1.0, %v7240_v14  ;;  %3271 = vperm.xlu0 %7057, %v7831_v9   ;;  %7261 = vrcp.f32 %v3074_v10  ;;  %v2915_v12 = vsub.f32 0.0, %v9303_v34  ;;  %v2917_v52 = vsub.f32 0.0, %v9307_v45  ;;  %3540 = vmatprep.mubr.f32.mxu0 %v11064_v32 }
 0x2c3   : > { %v7244_v16 = vpop.eup %7243  ;;  %6542 = vmatmul.mubr.msk.f32.gmra.mrb[74].mxu1 %vm2145_vm1, %v9148_v27  ;;  %7263 = vrcp.f32 %v3076_v18  ;;  %v2930_v53 = vsub.f32 0.0, %v9314_v31  ;;  %v2932_v36 = vsub.f32 0.0, %v9318_v24  ;;  %v2996_v11 = vmul.f32 1.442695, %v2901_v40 }
 0x2c4   : > { %v7246_v58 = vpop.eup %7245  ;;  %v3217_v55 = vmul.f32 %v7244_v16, %v9023_v20  ;;  %3629 = vmatprep.mubr.f32.mxu1 %v11064_v32  ;;  %7265 = vrcp.f32 %v3075_v2  ;;  %v9354_v62 = vadd.f32 %v9028_v61, %v8740_v26  ;;  %3267 = vperm.xlu1 %7058, %v7832_v43   ;;  %v3022_v48 = vmul.f32 1.442695, %v2914_v4 }
 0x2c5   : > { %v7248_v25 = vpop.eup %7247  ;;  %7267 = vpow2.f32 %v9276_v37  ;;  %v2931_v56 = vsub.f32 0.0, %v9334_v7  ;;  %6539 = vmatmul.mubr.msk.f32.gmra.mrb[76].mxu0 %vm2145_vm1, %v9191_v33  ;;  %v3026_v26 = vmul.f32 1.442695, %v2916_v46  ;;  %v3024_v61 = vmul.f32 1.442695, %v2915_v12 }
 0x2c6   : > { %v7250_v20 = vpop.eup %7249  ;;  %v6762_v42 = vpack.c.bf16 %v3217_v55, %v3201_v47  ;;  %7269 = vpow2.f32 %v9278_v57  ;;  %3546 = vmatprep.mubr.f32.mxu0 %v11064_v32  ;;  %v3028_v37 = vmul.f32 1.442695, %v2917_v52  ;;  %v3054_v38 = vmul.f32 1.442695, %v2930_v53 }
 0x2c7   : > { %v7252_v1 = vpop.eup %7251  ;;  %6543 = vmatmul.mubr.msk.f32.gmra.mrb[76].mxu1 %vm2145_vm1, %v9191_v33  ;;  %7271 = vpow2.f32 %v2992_v5  ;;  %v3058_v10 = vmul.f32 1.442695, %v2932_v36  ;;  %v3230_v18 = vmul.f32 %v7246_v58, %v9038_v60  ;;  %v2933_v40 = vsub.f32 0.0, %v9354_v62 }
 0x2c8   : > { %v7254_v22 = vpop.eup %7253  ;;  %6763 = vmatprep.subr.bf16.mxu1 %v6762_v42  ;;  %3635 = vmatprep.mubr.f32.mxu1 %v11064_v32  ;;  %7273 = vpow2.f32 %v2996_v11  ;;  %v3232_v15 = vmul.f32 %v7248_v25, %v9064_v44  ;;  %v3056_v5 = vmul.f32 1.442695, %v2931_v56  ;;  %v3233_v44 = vmul.f32 %v7252_v1, %v9074_v30 }
 0x2c9   : > { %v7256_v14 = vpop.eup %7255  ;;  %v3246_v57 = vmul.f32 %v7254_v22, %v9084_v29  ;;  %6765 = vmatpush1.bf16.msra.mxu1 %v6764_v8  ;;  %7275 = vpow2.f32 %v3022_v48  ;;  %6540 = vmatmul.mubr.msk.f32.gmra.mrb[78].mxu0 %vm2145_vm1, %v9226_v19  ;;  %v3231_v29 = vmul.f32 %v7250_v20, %v9070_v63  ;;  %v3060_v63 = vmul.f32 1.442695, %v2933_v40 }
 0x2ca   : > { %v7258_v4 = vpop.eup %7257  ;;  %v3248_v2 = vmul.f32 %v7256_v14, %v9100_v50  ;;  %7277 = vpow2.f32 %v3026_v26  ;;  %3706 = vmatprep.mubr.f32.mxu0 %v11064_v32  ;;  %v3077_v9 = vadd.f32 1.0, %v9329_v51 }
 0x2cb   : > { %v7260_v60 = vpop.eup %7259  ;;  %v6760_v46 = vpack.c.bf16 %v3246_v57, %v3230_v18  ;;  %v3247_v17 = vmul.f32 %v7258_v4, %v9108_v13  ;;  %6544 = vmatmul.mubr.msk.f32.gmra.mrb[78].mxu1 %vm2145_vm1, %v9226_v19  ;;  %7279 = vpow2.f32 %v3024_v61 }
 0x2cc   : > { %v6768_v50 = vpack.c.bf16 %v3248_v2, %v3232_v15  ;;  %v3249_v3 = vmul.f32 %v7260_v60, %v9132_v28  ;;  %3795 = vmatprep.mubr.f32.mxu1 %v11064_v32  ;;  %v9386_v41 = vpop.eup %7261  ;;  %7281 = vpow2.f32 %v3028_v37  ;;  %v11090_v2 = vld [vmem:[#allocation12_spill] sm:$0xff] }
 0x2cd   : > { %v6758_v8 = vpack.c.bf16 %v3247_v17, %v3231_v29  ;;  %v9388_v13 = vpop.eup %7263  ;;  %7283 = vpow2.f32 %v3054_v38  ;;  %v3202_v40 = vmul.f32 %v9386_v41, %v9141_v21 }
 0x2ce   : > { %v6766_v16 = vpack.c.bf16 %v3249_v3, %v3233_v44  ;;  %v9391_v0 = vpop.eup %7265  ;;  %7285 = vpow2.f32 %v3058_v10 }
 0x2cf   : > { %6759 = vmatprep.subr.bf16.mxu0 %v6758_v8  ;;  %v7268_v30 = vpop.eup %7267  ;;  %7287 = vpow2.f32 %v3056_v5  ;;  %v3204_v5 = vmul.f32 %v9388_v13, %v11090_v2 }
 0x2d0   : > { %6767 = vmatprep.subr.bf16.mxu1 %v6766_v16  ;;  %6761 = vmatpush1.bf16.msra.mxu0 %v6760_v46  ;;  %v7270_v28 = vpop.eup %7269  ;;  %v3090_v47 = vadd.f32 1.0, %v7268_v30  ;;  %7289 = vpow2.f32 %v3060_v63  ;;  %v11091_v46 = vld [vmem:[#allocation13_spill] sm:$0xff] }
 0x2d1   : > { %6769 = vmatpush1.bf16.msra.mxu1 %v6768_v50  ;;  %v7272_v12 = vpop.eup %7271  ;;  %7291 = vrcp.f32 %v3077_v9  ;;  %v3092_v52 = vadd.f32 1.0, %v7270_v28  ;;  %v3203_v17 = vmul.f32 %v9391_v0, %v11091_v46 }
 0x2d2   : > { %v7274_v58 = vpop.eup %7273  ;;  %7293 = vrcp.f32 %v3090_v47  ;;  %v3091_v51 = vadd.f32 1.0, %v7272_v12 }
 0x2d3   : > { %6545 = vmatmul.mubr.msk.f32.vlgmr.msra.gmra.mrb[80].mxu0 %vm2145_vm1, %v9119_v54  ;;  %v7276_v55 = vpop.eup %7275  ;;  %7295 = vrcp.f32 %v3092_v52  ;;  %v3093_v53 = vadd.f32 1.0, %v7274_v58 }
 0x2d4   : > { %6549 = vmatmul.mubr.msk.f32.vlgmr.msra.gmra.mrb[80].mxu1 %vm2145_vm1, %v9119_v54  ;;  %3712 = vmatprep.mubr.f32.mxu0 %v11064_v32  ;;  %v7278_v36 = vpop.eup %7277  ;;  %7297 = vrcp.f32 %v3091_v51  ;;  %v3106_v25 = vadd.f32 1.0, %v7276_v55 }
 0x2d5   : > { %3801 = vmatprep.mubr.f32.mxu1 %v11064_v32  ;;  %v7280_v11 = vpop.eup %7279  ;;  %7299 = vrcp.f32 %v3093_v53  ;;  %v3108_v43 = vadd.f32 1.0, %v7278_v36 }
 0x2d6   : > { %v7282_v20 = vpop.eup %7281  ;;  %7301 = vrcp.f32 %v3106_v25  ;;  %v3107_v48 = vadd.f32 1.0, %v7280_v11 }
 0x2d7   : > { %6546 = vmatmul.mubr.msk.f32.gmra.mrb[82].mxu0 %vm2145_vm1, %v9148_v27  ;;  %v7284_v56 = vpop.eup %7283  ;;  %7303 = vrcp.f32 %v3108_v43  ;;  %v3109_v42 = vadd.f32 1.0, %v7282_v20 }
 0x2d8   : > { %6550 = vmatmul.mubr.msk.f32.gmra.mrb[82].mxu1 %vm2145_vm1, %v9148_v27  ;;  %3718 = vmatprep.mubr.f32.mxu0 %v11064_v32  ;;  %v7286_v1 = vpop.eup %7285  ;;  %7305 = vrcp.f32 %v3107_v48  ;;  %v3122_v26 = vadd.f32 1.0, %v7284_v56 }
 0x2d9   : > { %3807 = vmatprep.mubr.f32.mxu1 %v11064_v32  ;;  %v7288_v61 = vpop.eup %7287  ;;  %7307 = vrcp.f32 %v3109_v42  ;;  %v3124_v22 = vadd.f32 1.0, %v7286_v1 }
 0x2da   : > { %v7290_v37 = vpop.eup %7289  ;;  %7309 = vrcp.f32 %v3122_v26  ;;  %v3123_v38 = vadd.f32 1.0, %v7288_v61 }
 0x2db   : > { %6547 = vmatmul.mubr.msk.f32.gmra.mrb[84].mxu0 %vm2145_vm1, %v9191_v33  ;;  %v7292_v10 = vpop.eup %7291  ;;  %7311 = vrcp.f32 %v3124_v22  ;;  %v3125_v14 = vadd.f32 1.0, %v7290_v37 }
 0x2dc   : > { %6551 = vmatmul.mubr.msk.f32.gmra.mrb[84].mxu1 %vm2145_vm1, %v9191_v33  ;;  %3724 = vmatprep.mubr.f32.mxu0 %v11064_v32  ;;  %v7294_v18 = vpop.eup %7293  ;;  %7313 = vrcp.f32 %v3123_v38 }
 0x2dd   : > { %3813 = vmatprep.mubr.f32.mxu1 %v11064_v32  ;;  %v7296_v57 = vpop.eup %7295  ;;  %v3218_v4 = vmul.f32 %v7294_v18, %v9200_v59  ;;  %7315 = vrcp.f32 %v3125_v14  ;;  %v11092_v59 = vld [vmem:[#allocation21_spill] sm:$0xff] }
 0x2de   : > { %v7298_v15 = vpop.eup %7297  ;;  %v3220_v60 = vmul.f32 %v7296_v57, %v9208_v39  ;;  %v3205_v3 = vmul.f32 %v7292_v10, %v11092_v59 }
 0x2df   : > { %6548 = vmatmul.mubr.msk.f32.gmra.mrb[86].mxu0 %vm2145_vm1, %v9226_v19  ;;  %v7300_v29 = vpop.eup %7299  ;;  %v6772_v44 = vpack.c.bf16 %v3218_v4, %v3202_v40  ;;  %v3219_v50 = vmul.f32 %v7298_v15, %v9271_v35 }
 0x2e0   : > { %6552 = vmatmul.mubr.msk.f32.gmra.mrb[86].mxu1 %vm2145_vm1, %v9226_v19  ;;  %3884 = vmatprep.mubr.f32.mxu0 %v11064_v32  ;;  %v7302_v21 = vpop.eup %7301  ;;  %v6780_v41 = vpack.c.bf16 %v3220_v60, %v3204_v5  ;;  %v3221_v39 = vmul.f32 %v7300_v29, %v9285_v23 }
 0x2e1   : > { %3973 = vmatprep.mubr.f32.mxu1 %v11064_v32  ;;  %v7304_v63 = vpop.eup %7303  ;;  %v6770_v8 = vpack.c.bf16 %v3219_v50, %v3203_v17  ;;  %v3234_v30 = vmul.f32 %v7302_v21, %v9289_v6 }
 0x2e2   : > { %v7306_v13 = vpop.eup %7305  ;;  %v6778_v9 = vpack.c.bf16 %v3221_v39, %v3205_v3  ;;  %v3236_v23 = vmul.f32 %v7304_v63, %v9294_v49 }
 0x2e3   : > { %v7308_v16 = vpop.eup %7307  ;;  %6771 = vmatprep.subr.bf16.mxu0 %v6770_v8  ;;  %v3235_v58 = vmul.f32 %v7306_v13, %v9303_v34 }
 0x2e4   : > { %v7310_v35 = vpop.eup %7309  ;;  %6779 = vmatprep.subr.bf16.mxu1 %v6778_v9  ;;  %6773 = vmatpush1.bf16.msra.mxu0 %v6772_v44  ;;  %v3237_v53 = vmul.f32 %v7308_v16, %v9307_v45 }
 0x2e5   : > { %v7312_v0 = vpop.eup %7311  ;;  %v3250_v28 = vmul.f32 %v7310_v35, %v9314_v31  ;;  %6781 = vmatpush1.bf16.msra.mxu1 %v6780_v41 }
 0x2e6   : > { %v7314_v47 = vpop.eup %7313  ;;  %v3252_v12 = vmul.f32 %v7312_v0, %v9318_v24 }
 0x2e7   : > { %v7316_v52 = vpop.eup %7315  ;;  %v6776_v51 = vpack.c.bf16 %v3250_v28, %v3234_v30  ;;  %v3251_v55 = vmul.f32 %v7314_v47, %v9334_v7 }
 0x2e8   : > { %v6784_v36 = vpack.c.bf16 %v3252_v12, %v3236_v23  ;;  %v3253_v25 = vmul.f32 %v7316_v52, %v9354_v62 }
 0x2e9   : > { %v6774_v6 = vpack.c.bf16 %v3251_v55, %v3235_v58 }
 0x2ea   : > { %v6782_v11 = vpack.c.bf16 %v3253_v25, %v3237_v53 }
 0x2eb   : > { %6775 = vmatprep.subr.bf16.mxu0 %v6774_v6 }
 0x2ec   : > { %6783 = vmatprep.subr.bf16.mxu1 %v6782_v11  ;;  %6777 = vmatpush1.bf16.msra.mxu0 %v6776_v51 }
 0x2ed   : > { %6785 = vmatpush1.bf16.msra.mxu1 %v6784_v36 }
 0x2ef   : > { %6553 = vmatmul.mubr.msk.f32.vlgmr.msra.gmra.mrb[88].mxu0 %vm2145_vm1, %v9119_v54 }
 0x2f0   : > { %6557 = vmatmul.mubr.msk.f32.vlgmr.msra.gmra.mrb[88].mxu1 %vm2145_vm1, %v9119_v54  ;;  %3890 = vmatprep.mubr.f32.mxu0 %v11064_v32 }
 0x2f1   : > { %3979 = vmatprep.mubr.f32.mxu1 %v11064_v32 }
 0x2f3   : > { %6554 = vmatmul.mubr.msk.f32.gmra.mrb[90].mxu0 %vm2145_vm1, %v9148_v27 }
 0x2f4   : > { %6558 = vmatmul.mubr.msk.f32.gmra.mrb[90].mxu1 %vm2145_vm1, %v9148_v27  ;;  %3896 = vmatprep.mubr.f32.mxu0 %v11064_v32 }
 0x2f5   : > { %3985 = vmatprep.mubr.f32.mxu1 %v11064_v32 }
 0x2f7   : > { %6555 = vmatmul.mubr.msk.f32.gmra.mrb[92].mxu0 %vm2145_vm1, %v9191_v33 }
 0x2f8   : > { %6559 = vmatmul.mubr.msk.f32.gmra.mrb[92].mxu1 %vm2145_vm1, %v9191_v33  ;;  %3902 = vmatprep.mubr.f32.mxu0 %v11064_v32 }
 0x2f9   : > { %3991 = vmatprep.mubr.f32.mxu1 %v11064_v32 }
 0x2fb   : > { %6556 = vmatmul.mubr.msk.f32.gmra.mrb[94].mxu0 %vm2145_vm1, %v9226_v19 }
 0x2fc   : > { %6560 = vmatmul.mubr.msk.f32.gmra.mrb[94].mxu1 %vm2145_vm1, %v9226_v19  ;;  %4478 = vmatprep.mubr.f32.mxu0 %v11064_v32 }
 0x2fd   : > { %4567 = vmatprep.mubr.f32.mxu1 %v11064_v32 }
 0x33d   : > { %v9460_v54 = vpop.permute.xlu0 %3259 }
 0x33f   : > { %v9462_v27 = vpop.permute.xlu1 %3263 }
 0x341   : > { %v9514_v51 = vpop.permute.xlu0 %3271 }
 0x343   : > { %v9486_v18 = vpop.permute.xlu1 %3267 }
 0x379   : > { %v3352_v49 = vpop.f32.mrb[64].mxu0 }
 0x37a   : > { %v3441_v33 = vpop.f32.mrb[64].mxu1  ;;  %v9465_v34 = vadd.f32 %v3352_v49, %v9460_v54  ;;  %v3354_v31 = vpop.f32.mrb[65].mxu0 }
 0x37b   : > { %v9468_v45 = vadd.f32 %v3441_v33, %v9460_v54  ;;  %v3443_v24 = vpop.f32.mrb[65].mxu1  ;;  %v9471_v19 = vadd.f32 %v3354_v31, %v9460_v54 }
 0x37c   : > { %v9474_v7 = vadd.f32 %v3443_v24, %v9460_v54  ;;  %v3998_v62 = vsub.f32 0.0, %v9465_v34 }
 0x37d   : > { %v4000_v43 = vsub.f32 0.0, %v9468_v45  ;;  %v3999_v20 = vsub.f32 0.0, %v9471_v19  ;;  %v3358_v56 = vpop.f32.mrb[66].mxu0 }
 0x37e   : > { %v4001_v48 = vsub.f32 0.0, %v9474_v7  ;;  %v3447_v42 = vpop.f32.mrb[66].mxu1  ;;  %v4062_v1 = vmul.f32 1.442695, %v3998_v62  ;;  %v9481_v61 = vadd.f32 %v3358_v56, %v9462_v27  ;;  %v3360_v37 = vpop.f32.mrb[67].mxu0 }
 0x37f   : > { %v4066_v26 = vmul.f32 1.442695, %v4000_v43  ;;  %v9484_v22 = vadd.f32 %v3447_v42, %v9462_v27  ;;  %v3449_v38 = vpop.f32.mrb[67].mxu1  ;;  %v4064_v10 = vmul.f32 1.442695, %v3999_v20  ;;  %v9489_v57 = vadd.f32 %v3360_v37, %v9462_v27 }
 0x380   : > { %v4068_v14 = vmul.f32 1.442695, %v4001_v48  ;;  %v9492_v40 = vadd.f32 %v3449_v38, %v9462_v27  ;;  %7317 = vpow2.f32 %v4062_v1  ;;  %v4014_v4 = vsub.f32 0.0, %v9481_v61 }
 0x381   : > { %v4016_v15 = vsub.f32 0.0, %v9484_v22  ;;  %7319 = vpow2.f32 %v4066_v26  ;;  %v4015_v2 = vsub.f32 0.0, %v9489_v57  ;;  %v3364_v60 = vpop.f32.mrb[68].mxu0 }
 0x382   : > { %v4017_v5 = vsub.f32 0.0, %v9492_v40  ;;  %v3453_v29 = vpop.f32.mrb[68].mxu1  ;;  %7321 = vpow2.f32 %v4064_v10  ;;  %v4094_v46 = vmul.f32 1.442695, %v4014_v4  ;;  %v9499_v44 = vadd.f32 %v3364_v60, %v9486_v18  ;;  %v3366_v50 = vpop.f32.mrb[69].mxu0 }
 0x383   : > { %v4098_v17 = vmul.f32 1.442695, %v4016_v15  ;;  %v3455_v21 = vpop.f32.mrb[69].mxu1  ;;  %7323 = vpow2.f32 %v4068_v14  ;;  %v4096_v59 = vmul.f32 1.442695, %v4015_v2  ;;  %v9502_v41 = vadd.f32 %v3453_v29, %v9486_v18 }
 0x384   : > { %v4100_v3 = vmul.f32 1.442695, %v4017_v5  ;;  %7325 = vpow2.f32 %v4094_v46  ;;  %v4030_v39 = vsub.f32 0.0, %v9499_v44  ;;  %v9506_v63 = vadd.f32 %v3366_v50, %v9486_v18 }
 0x385   : > { %v9509_v8 = vadd.f32 %v3455_v21, %v9486_v18  ;;  %7327 = vpow2.f32 %v4098_v17  ;;  %v4032_v13 = vsub.f32 0.0, %v9502_v41  ;;  %v3370_v9 = vpop.f32.mrb[70].mxu0 }
 0x386   : > { %7329 = vpow2.f32 %v4096_v59  ;;  %v4126_v16 = vmul.f32 1.442695, %v4030_v39  ;;  %v4031_v35 = vsub.f32 0.0, %v9506_v63  ;;  %v3372_v28 = vpop.f32.mrb[71].mxu0  ;;  %v9517_v36 = vadd.f32 %v3370_v9, %v9514_v51 }
 0x387   : > { %v4033_v0 = vsub.f32 0.0, %v9509_v8  ;;  %v3459_v30 = vpop.f32.mrb[70].mxu1  ;;  %7331 = vpow2.f32 %v4100_v3  ;;  %v4130_v47 = vmul.f32 1.442695, %v4032_v13  ;;  %v9523_v31 = vadd.f32 %v3372_v28, %v9514_v51 }
 0x388   : > { %v3461_v23 = vpop.f32.mrb[71].mxu1  ;;  %7333 = vpow2.f32 %v4126_v16  ;;  %v4128_v12 = vmul.f32 1.442695, %v4031_v35  ;;  %v9520_v11 = vadd.f32 %v3459_v30, %v9514_v51  ;;  %v4046_v48 = vsub.f32 0.0, %v9517_v36 }
 0x389   : > { %v4132_v52 = vmul.f32 1.442695, %v4033_v0  ;;  %7335 = vpow2.f32 %v4130_v47  ;;  %v9528_v26 = vadd.f32 %v3461_v23, %v9514_v51  ;;  %v4047_v14 = vsub.f32 0.0, %v9523_v31 }
 0x38a   : > { %v7318_v58 = vpop.eup %7317  ;;  %7337 = vpow2.f32 %v4128_v12  ;;  %v4048_v1 = vsub.f32 0.0, %v9520_v11  ;;  %v4158_v59 = vmul.f32 1.442695, %v4046_v48 }
 0x38b   : > { %v7320_v55 = vpop.eup %7319  ;;  %v4190_v53 = vadd.f32 1.0, %v7318_v58  ;;  %7339 = vpow2.f32 %v4132_v52  ;;  %v4049_v16 = vsub.f32 0.0, %v9528_v26  ;;  %v4160_v28 = vmul.f32 1.442695, %v4047_v14 }
 0x38c   : > { %v7322_v25 = vpop.eup %7321  ;;  %v4192_v6 = vadd.f32 1.0, %v7320_v55  ;;  %v4162_v9 = vmul.f32 1.442695, %v4048_v1 }
 0x38d   : > { %v7324_v49 = vpop.eup %7323  ;;  %7341 = vrcp.f32 %v4190_v53  ;;  %v4191_v33 = vadd.f32 1.0, %v7322_v25 }
 0x38e   : > { %v7326_v24 = vpop.eup %7325  ;;  %7343 = vrcp.f32 %v4192_v6  ;;  %v4193_v62 = vadd.f32 1.0, %v7324_v49 }
 0x38f   : > { %v7328_v43 = vpop.eup %7327  ;;  %7345 = vrcp.f32 %v4191_v33  ;;  %v4206_v20 = vadd.f32 1.0, %v7326_v24 }
 0x390   : > { %v7330_v56 = vpop.eup %7329  ;;  %7347 = vrcp.f32 %v4193_v62  ;;  %v4208_v42 = vadd.f32 1.0, %v7328_v43  ;;  %v3530_v37 = vpop.f32.mrb[72].mxu0  ;;  %v4164_v62 = vmul.f32 1.442695, %v4049_v16 }
 0x391   : > { %v7332_v38 = vpop.eup %7331  ;;  %7349 = vrcp.f32 %v4206_v20  ;;  %v4207_v10 = vadd.f32 1.0, %v7330_v56  ;;  %v9532_v4 = vadd.f32 %v3530_v37, %v9460_v54  ;;  %v3532_v2 = vpop.f32.mrb[73].mxu0 }
 0x392   : > { %v3619_v15 = vpop.f32.mrb[72].mxu1  ;;  %v7334_v5 = vpop.eup %7333  ;;  %7351 = vrcp.f32 %v4208_v42  ;;  %v4209_v60 = vadd.f32 1.0, %v7332_v38  ;;  %v9538_v46 = vadd.f32 %v3532_v2, %v9460_v54 }
 0x393   : > { %v9535_v29 = vadd.f32 %v3619_v15, %v9460_v54  ;;  %v3621_v17 = vpop.f32.mrb[73].mxu1  ;;  %v7336_v50 = vpop.eup %7335  ;;  %7353 = vrcp.f32 %v4207_v10  ;;  %v4222_v21 = vadd.f32 1.0, %v7334_v5  ;;  %v4002_v47 = vsub.f32 0.0, %v9532_v4 }
 0x394   : > { %v9541_v3 = vadd.f32 %v3621_v17, %v9460_v54  ;;  %v7338_v39 = vpop.eup %7337  ;;  %7355 = vrcp.f32 %v4209_v60  ;;  %v4224_v13 = vadd.f32 1.0, %v7336_v50  ;;  %v3536_v35 = vpop.f32.mrb[74].mxu0  ;;  %v4003_v55 = vsub.f32 0.0, %v9538_v46 }
 0x395   : > { %v7340_v0 = vpop.eup %7339  ;;  %7357 = vrcp.f32 %v4222_v21  ;;  %v4223_v30 = vadd.f32 1.0, %v7338_v39  ;;  %v3538_v12 = vpop.f32.mrb[75].mxu0  ;;  %v4004_v58 = vsub.f32 0.0, %v9535_v29  ;;  %v9549_v49 = vadd.f32 %v3536_v35, %v9462_v27 }
 0x396   : > { %11093 = vst [vmem:[#allocation14_spill] sm:$0xff] %v9541_v3  ;;  %v3625_v23 = vpop.f32.mrb[74].mxu1  ;;  %7359 = vrcp.f32 %v4224_v13  ;;  %v4225_v52 = vadd.f32 1.0, %v7340_v0  ;;  %v4005_v6 = vsub.f32 0.0, %v9541_v3  ;;  %v9555_v43 = vadd.f32 %v3538_v12, %v9462_v27 }
 0x397   : > { %v3627_v53 = vpop.f32.mrb[75].mxu1  ;;  %v7342_v25 = vpop.eup %7341  ;;  %7361 = vrcp.f32 %v4223_v30  ;;  %v9552_v33 = vadd.f32 %v3625_v23, %v9462_v27  ;;  %v4070_v42 = vmul.f32 1.442695, %v4002_v47  ;;  %v4018_v1 = vsub.f32 0.0, %v9549_v49 }
 0x398   : > { %v7344_v24 = vpop.eup %7343  ;;  %7363 = vrcp.f32 %v4225_v52  ;;  %11094 = vst [vmem:[#allocation23_spill] sm:$0xff] %v9555_v43  ;;  %v9558_v20 = vadd.f32 %v3627_v53, %v9462_v27  ;;  %v3542_v48 = vpop.f32.mrb[76].mxu0  ;;  %v4074_v14 = vmul.f32 1.442695, %v4004_v58  ;;  %v4072_v15 = vmul.f32 1.442695, %v4003_v55 }
 0x399   : > { %v9560_v56 = vpop.eup %7345  ;;  %7365 = vpow2.f32 %v4158_v59  ;;  %v3544_v38 = vpop.f32.mrb[77].mxu0  ;;  %v4020_v2 = vsub.f32 0.0, %v9552_v33  ;;  %v9567_v17 = vmul.f32 %v7342_v25, %v9465_v34  ;;  %v4076_v50 = vmul.f32 1.442695, %v4005_v6 }
 0x39a   : > { %11095 = vst [vmem:[#allocation25_spill] sm:$0xff] %v9558_v20  ;;  %v3631_v37 = vpop.f32.mrb[76].mxu1  ;;  %v9563_v10 = vpop.eup %7347  ;;  %7367 = vpow2.f32 %v4162_v9  ;;  %v4019_v21 = vsub.f32 0.0, %v9555_v43  ;;  %v9571_v39 = vmul.f32 %v7344_v24, %v9468_v45  ;;  %v4021_v9 = vsub.f32 0.0, %v9558_v20 }
 0x39b   : > { %v3633_v5 = vpop.f32.mrb[77].mxu1  ;;  %v7350_v60 = vpop.eup %7349  ;;  %7369 = vpow2.f32 %v4160_v28  ;;  %v4102_v34 = vmul.f32 1.442695, %v4018_v1  ;;  %v9581_v30 = vadd.f32 %v3542_v48, %v9486_v18  ;;  %v4106_v23 = vmul.f32 1.442695, %v4020_v2 }
 0x39c   : > { %v7352_v59 = vpop.eup %7351  ;;  %v9574_v13 = vmul.f32 %v7350_v60, %v9481_v61  ;;  %7371 = vpow2.f32 %v4164_v62  ;;  %v3548_v16 = vpop.f32.mrb[78].mxu0  ;;  %v4104_v58 = vmul.f32 1.442695, %v4019_v21  ;;  %v4108_v25 = vmul.f32 1.442695, %v4021_v9 }
 0x39d   : > { %v7354_v35 = vpop.eup %7353  ;;  %v9578_v0 = vmul.f32 %v7352_v59, %v9484_v22  ;;  %7373 = vpow2.f32 %v4070_v42  ;;  %11096 = vst [vmem:[#allocation15_spill] sm:$0xff] %v9581_v30  ;;  %v3550_v47 = vpop.f32.mrb[79].mxu0  ;;  %v4034_v55 = vsub.f32 0.0, %v9581_v30  ;;  %v9597_v42 = vadd.f32 %v3631_v37, %v9486_v18 }
 0x39e   : > { %v3637_v28 = vpop.f32.mrb[78].mxu1  ;;  %v9583_v45 = vpop.eup %7355  ;;  %7375 = vpow2.f32 %v4074_v14  ;;  %v9603_v2 = vadd.f32 %v3633_v5, %v9486_v18  ;;  %v9606_v9 = vmul.f32 %v7354_v35, %v9489_v57  ;;  %v4321_v43 = vmul.f32 %v9563_v10, %v9474_v7 }
 0x39f   : > { %v9587_v12 = vpop.f32.mrb[79].mxu1  ;;  %v7358_v52 = vpop.eup %7357  ;;  %7377 = vpow2.f32 %v4072_v15  ;;  %v4134_v24 = vmul.f32 1.442695, %v4034_v55  ;;  %11097 = vst [vmem:[#allocation16_spill] sm:$0xff] %v9597_v42  ;;  %v9600_v15 = vadd.f32 %v3544_v38, %v9486_v18  ;;  %v4036_v5 = vsub.f32 0.0, %v9597_v42 }
 0x3a0   : > { %v7360_v53 = vpop.eup %7359  ;;  %7379 = vpow2.f32 %v4076_v50  ;;  %11099 = vst [vmem:[#allocation20_spill] sm:$0xff] %v9603_v2  ;;  %v9635_v42 = vadd.f32 %v9587_v12, %v9514_v51 }
 0x3a1   : > { %v9592_v6 = vpop.eup %7361  ;;  %7381 = vpow2.f32 %v4102_v34  ;;  %11098 = vst [vmem:[#allocation17_spill] sm:$0xff] %v9600_v15  ;;  %v9609_v34 = vadd.f32 %v3548_v16, %v9514_v51  ;;  %v4035_v35 = vsub.f32 0.0, %v9600_v15  ;;  %v9624_v22 = vmul.f32 %v7360_v53, %v9502_v41 }
 0x3a2   : > { %v9594_v62 = vpop.eup %7363  ;;  %7383 = vpow2.f32 %v4106_v23  ;;  %11103 = vst [vmem:[#allocation24_spill] sm:$0xff] %v9635_v42 }
 0x3a3   : > { %v7366_v48 = vpop.eup %7365  ;;  %7385 = vpow2.f32 %v4104_v58  ;;  %11100 = vst [vmem:[#allocation22_spill] sm:$0xff] %v9609_v34  ;;  %v4136_v41 = vmul.f32 1.442695, %v4035_v35 }
 0x3a4   : > { %v7368_v1 = vpop.eup %7367  ;;  %v4238_v14 = vadd.f32 1.0, %v7366_v48  ;;  %7387 = vpow2.f32 %v4108_v25  ;;  %v9613_v25 = vadd.f32 %v3637_v28, %v9514_v51 }
 0x3a5   : > { %v7370_v60 = vpop.eup %7369  ;;  %v4240_v50 = vadd.f32 1.0, %v7368_v1  ;;  %7389 = vpow2.f32 %v4134_v24  ;;  %v4037_v1 = vsub.f32 0.0, %v9603_v2 }
 0x3a6   : > { %v3708_v21 = vpop.f32.mrb[80].mxu0  ;;  %v7372_v59 = vpop.eup %7371  ;;  %7391 = vrcp.f32 %v4238_v14  ;;  %v4239_v37 = vadd.f32 1.0, %v7370_v60  ;;  %11101 = vst [vmem:[#allocation26_spill] sm:$0xff] %v9613_v25  ;;  %v9618_v14 = vmul.f32 %v7358_v52, %v9499_v44  ;;  %v4138_v52 = vmul.f32 1.442695, %v4036_v5 }
 0x3a7   : > { %v3797_v23 = vpop.f32.mrb[80].mxu1  ;;  %v3710_v58 = vpop.f32.mrb[81].mxu0  ;;  %7393 = vrcp.f32 %v4240_v50  ;;  %v4241_v55 = vadd.f32 1.0, %v7372_v59  ;;  %v9621_v50 = vadd.f32 %v3550_v47, %v9514_v51  ;;  %v4140_v53 = vmul.f32 1.442695, %v4037_v1 }
 0x3a8   : > { %v7374_v38 = vpop.eup %7373  ;;  %v3799_v24 = vpop.f32.mrb[81].mxu1  ;;  %7395 = vrcp.f32 %v4239_v37 }
 0x3a9   : > { %v7376_v48 = vpop.eup %7375  ;;  %v4194_v57 = vadd.f32 1.0, %v7374_v38  ;;  %7397 = vrcp.f32 %v4241_v55  ;;  %11102 = vst [vmem:[#allocation30_spill] sm:$0xff] %v9621_v50  ;;  %v4050_v38 = vsub.f32 0.0, %v9609_v34  ;;  %v4052_v55 = vsub.f32 0.0, %v9613_v25 }
 0x3aa   : > { %v7378_v16 = vpop.eup %7377  ;;  %v4196_v60 = vadd.f32 1.0, %v7376_v48  ;;  %v3714_v59 = vpop.f32.mrb[82].mxu0  ;;  %v4051_v3 = vsub.f32 0.0, %v9621_v50 }
 0x3ab   : > { %v7380_v28 = vpop.eup %7379  ;;  %7399 = vrcp.f32 %v4194_v57  ;;  %v4195_v37 = vadd.f32 1.0, %v7378_v16  ;;  %v3803_v61 = vpop.f32.mrb[82].mxu1  ;;  %v4166_v25 = vmul.f32 1.442695, %v4050_v38  ;;  %v9652_v38 = vadd.f32 %v3710_v58, %v9460_v54 }
 0x3ac   : > { %v9627_v2 = vpop.f32.mrb[83].mxu0  ;;  %v7382_v15 = vpop.eup %7381  ;;  %7401 = vrcp.f32 %v4196_v60  ;;  %v4197_v44 = vadd.f32 1.0, %v7380_v28 }
 0x3ad   : > { %v9630_v47 = vpop.f32.mrb[83].mxu1  ;;  %v7384_v48 = vpop.eup %7383  ;;  %7403 = vrcp.f32 %v4195_v37  ;;  %v4210_v20 = vadd.f32 1.0, %v7382_v15  ;;  %v9640_v37 = vadd.f32 %v3708_v21, %v9460_v54  ;;  %11106 = vst [vmem:[#allocation28_spill] sm:$0xff] %v9652_v38  ;;  %v9655_v21 = vadd.f32 %v3799_v24, %v9460_v54 }
 0x3ae   : > { %v7386_v57 = vpop.eup %7385  ;;  %7405 = vrcp.f32 %v4197_v44  ;;  %v4212_v16 = vadd.f32 1.0, %v7384_v48  ;;  %v9637_v60 = vpop.f32.mrb[84].mxu0  ;;  %v4170_v44 = vmul.f32 1.442695, %v4052_v55  ;;  %v9645_v48 = vadd.f32 %v3797_v23, %v9460_v54 }
 0x3af   : > { %v7388_v5 = vpop.eup %7387  ;;  %7407 = vrcp.f32 %v4210_v20  ;;  %v4211_v28 = vadd.f32 1.0, %v7386_v57  ;;  %11104 = vst [vmem:[#allocation18_spill] sm:$0xff] %v9640_v37  ;;  %v9642_v15 = vpop.f32.mrb[84].mxu1  ;;  %11107 = vst [vmem:[#allocation27_spill] sm:$0xff] %v9655_v21  ;;  %v4168_v23 = vmul.f32 1.442695, %v4051_v3  ;;  %v9670_v24 = vadd.f32 %v3714_v59, %v9462_v27 }
 0x3b0   : > { %v7390_v35 = vpop.eup %7389  ;;  %7409 = vrcp.f32 %v4212_v16  ;;  %v4213_v1 = vadd.f32 1.0, %v7388_v5  ;;  %11105 = vst [vmem:[#allocation19_spill] sm:$0xff] %v9645_v48  ;;  %v9647_v12 = vpop.f32.mrb[85].mxu0  ;;  %v4053_v55 = vsub.f32 0.0, %v9635_v42  ;;  %v4006_v58 = vsub.f32 0.0, %v9640_v37 }
 0x3b1   : > { %v9649_v50 = vpop.f32.mrb[85].mxu1  ;;  %v7392_v32 = vpop.eup %7391  ;;  %7411 = vrcp.f32 %v4211_v28  ;;  %v4226_v20 = vadd.f32 1.0, %v7390_v35  ;;  %v4007_v42 = vsub.f32 0.0, %v9652_v38  ;;  %v4009_v37 = vsub.f32 0.0, %v9655_v21 }
 0x3b2   : > { %v7394_v57 = vpop.eup %7393  ;;  %v9658_v16 = vmul.f32 %v7392_v32, %v9517_v36  ;;  %7413 = vrcp.f32 %v4213_v1  ;;  %v9661_v5 = vpop.f32.mrb[86].mxu0  ;;  %v4008_v1 = vsub.f32 0.0, %v9645_v48  ;;  %v4337_v3 = vmul.f32 %v9583_v45, %v9492_v40 }
 0x3b3   : > { %v9663_v34 = vpop.eup %7395  ;;  %v9666_v28 = vmul.f32 %v7394_v57, %v9520_v11  ;;  %7415 = vrcp.f32 %v4226_v20  ;;  %v9672_v35 = vpop.f32.mrb[86].mxu1  ;;  %v9682_v11 = vadd.f32 %v3803_v61, %v9462_v27  ;;  %v4172_v61 = vmul.f32 1.442695, %v4053_v55 }
 0x3b4   : > { %v9674_v32 = vpop.f32.mrb[87].mxu0  ;;  %v9676_v36 = vpop.eup %7397  ;;  %7417 = vpow2.f32 %v4138_v52  ;;  %v4319_v52 = vmul.f32 %v9560_v56, %v9471_v19  ;;  %v4022_v59 = vsub.f32 0.0, %v9670_v24  ;;  %v4082_v21 = vmul.f32 1.442695, %v4008_v1 }
 0x3b5   : > { %v9684_v20 = vpop.f32.mrb[87].mxu1  ;;  %v7400_v57 = vpop.eup %7399  ;;  %7419 = vpow2.f32 %v4136_v41  ;;  %v4078_v41 = vmul.f32 1.442695, %v4006_v58  ;;  %v4024_v19 = vsub.f32 0.0, %v9682_v11  ;;  %v4080_v45 = vmul.f32 1.442695, %v4007_v42 }
 0x3b6   : > { %v7402_v30 = vpop.eup %7401  ;;  %7421 = vpow2.f32 %v4140_v53  ;;  %v6786_v56 = vpack.c.bf16 %v9606_v9, %v4319_v52  ;;  %v4084_v53 = vmul.f32 1.442695, %v4009_v37  ;;  %v9705_v55 = vadd.f32 %v9627_v2, %v9462_v27 }
 0x3b7   : > { %v9694_v48 = vpop.eup %7403  ;;  %7423 = vpow2.f32 %v4166_v25  ;;  %v9708_v10 = vmul.f32 %v7400_v57, %v9532_v4  ;;  %v9716_v9 = vmul.f32 %v7402_v30, %v9535_v29  ;;  %v4110_v2 = vmul.f32 1.442695, %v4022_v59 }
 0x3b8   : > { %v9699_v38 = vpop.eup %7405  ;;  %7425 = vpow2.f32 %v4170_v44  ;;  %6787 = vmatprep.subr.bf16.mxu0 %v6786_v56  ;;  %v6794_v44 = vpack.c.bf16 %v4337_v3, %v4321_v43  ;;  %v11108_v4 = vpack.c.bf16 %v9574_v13, %v9567_v17  ;;  %v4114_v43 = vmul.f32 1.442695, %v4024_v19 }
 0x3b9   : > { %v7408_v40 = vpop.eup %7407  ;;  %7427 = vpow2.f32 %v4168_v23  ;;  %v11109_v17 = vpack.c.bf16 %v9578_v0, %v9571_v39  ;;  %v4023_v30 = vsub.f32 0.0, %v9705_v55  ;;  %v9746_v1 = vmul.f32 %v9592_v6, %v9506_v63 }
 0x3ba   : > { %v7410_v7 = vpop.eup %7409  ;;  %v9711_v25 = vmul.f32 %v7408_v40, %v9549_v49  ;;  %7429 = vpow2.f32 %v4172_v61  ;;  %6789 = vmatpush1.bf16.msra.mxu0 %v11108_v4  ;;  %6795 = vmatprep.subr.bf16.mxu1 %v6794_v44  ;;  %v9754_v0 = vmul.f32 %v9594_v62, %v9509_v8  ;;  %v9760_v63 = vmul.f32 %v9676_v36, %v9528_v26 }
 0x3bb   : > { %v9713_v58 = vpop.eup %7411  ;;  %v9719_v42 = vmul.f32 %v7410_v7, %v9552_v33  ;;  %7431 = vpow2.f32 %v4078_v41  ;;  %v9734_v33 = vadd.f32 %v9630_v47, %v9462_v27  ;;  %6797 = vmatpush1.bf16.msra.mxu1 %v11109_v17  ;;  %v9750_v47 = vadd.f32 %v9642_v15, %v9486_v18 }
 0x3bc   : > { %v9724_v37 = vpop.eup %7413  ;;  %7433 = vpow2.f32 %v4082_v21  ;;  %v9742_v21 = vadd.f32 %v9637_v60, %v9486_v18  ;;  %v4367_v60 = vmul.f32 %v9663_v34, %v9523_v31  ;;  %v9763_v19 = vmul.f32 1.442695, %v4023_v30 }
 0x3bd   : > { %v9728_v23 = vpop.eup %7415  ;;  %7435 = vpow2.f32 %v4080_v45  ;;  %v4025_v15 = vsub.f32 0.0, %v9734_v33  ;;  %v4040_v34 = vsub.f32 0.0, %v9750_v47  ;;  %v9769_v26 = vadd.f32 %v9647_v12, %v9486_v18 }
 0x3be   : > { %v7418_v13 = vpop.eup %7417  ;;  %7437 = vpow2.f32 %v4084_v53  ;;  %v4038_v8 = vsub.f32 0.0, %v9742_v21  ;;  %v9773_v40 = vmul.f32 %v9694_v48, %v9538_v46  ;;  %v9777_v53 = vadd.f32 %v9649_v50, %v9486_v18 }
 0x3bf   : > { %v7420_v3 = vpop.eup %7419  ;;  %v4228_v57 = vadd.f32 1.0, %v7418_v13  ;;  %7439 = vpow2.f32 %v4110_v2  ;;  %v9781_v12 = vmul.f32 1.442695, %v4025_v15  ;;  %v9793_v50 = vadd.f32 %v9672_v35, %v9514_v51 }
 0x3c0   : > { %v7422_v39 = vpop.eup %7421  ;;  %v4227_v59 = vadd.f32 1.0, %v7420_v3  ;;  %7441 = vpow2.f32 %v4114_v43  ;;  %11110 = vst [vmem:[#allocation31_spill] sm:$0xff] %v9777_v53  ;;  %v9785_v43 = vadd.f32 %v9661_v5, %v9514_v51  ;;  %v9789_v13 = vmul.f32 1.442695, %v4038_v8 }
 0x3c1   : > { %v7424_v52 = vpop.eup %7423  ;;  %7443 = vrcp.f32 %v4228_v57  ;;  %v4229_v6 = vadd.f32 1.0, %v7422_v39  ;;  %v9795_v57 = vmul.f32 1.442695, %v4040_v34  ;;  %v4039_v39 = vsub.f32 0.0, %v9769_v26 }
 0x3c2   : > { %v7426_v61 = vpop.eup %7425  ;;  %7445 = vrcp.f32 %v4227_v59  ;;  %v4242_v41 = vadd.f32 1.0, %v7424_v52  ;;  %v3886_v36 = vpop.f32.mrb[88].mxu0  ;;  %v6790_v15 = vpack.c.bf16 %v4367_v60, %v9746_v1  ;;  %v9814_v1 = vadd.f32 %v9674_v32, %v9514_v51  ;;  %v9829_v32 = vld [vmem:[%s10932_s5] sm:$0xff] }
 0x3c3   : > { %v7428_v62 = vpop.eup %7427  ;;  %7447 = vrcp.f32 %v4229_v6  ;;  %v4244_v31 = vadd.f32 1.0, %v7426_v61  ;;  %v3975_v7 = vpop.f32.mrb[88].mxu1  ;;  %v4041_v6 = vsub.f32 0.0, %v9777_v53 }
 0x3c4   : > { %v7430_v56 = vpop.eup %7429  ;;  %7449 = vrcp.f32 %v4242_v41  ;;  %v4243_v45 = vadd.f32 1.0, %v7428_v62  ;;  %v9779_v44 = vpop.f32.mrb[89].mxu0  ;;  %v4054_v62 = vsub.f32 0.0, %v9785_v43  ;;  %6791 = vmatprep.subr.bf16.mxu0 %v6790_v15 }
 0x3c5   : > { %v7432_v2 = vpop.eup %7431  ;;  %7451 = vrcp.f32 %v4244_v31  ;;  %v4245_v4 = vadd.f32 1.0, %v7430_v56  ;;  %v9787_v46 = vpop.f32.mrb[89].mxu1  ;;  %v6798_v31 = vpack.c.bf16 %v9760_v63, %v9754_v0  ;;  %v9821_v0 = vadd.f32 %v3886_v36, %v9460_v54 }
 0x3c6   : > { %v7434_v48 = vpop.eup %7433  ;;  %7453 = vrcp.f32 %v4243_v45  ;;  %v4198_v17 = vadd.f32 1.0, %v7432_v2  ;;  %v9798_v5 = vpop.f32.mrb[90].mxu0  ;;  %v4056_v2 = vsub.f32 0.0, %v9793_v50  ;;  %v11113_v63 = vpack.c.bf16 %v9658_v16, %v9618_v14 }
 0x3c7   : > { %v7436_v30 = vpop.eup %7435  ;;  %7455 = vrcp.f32 %v4245_v4  ;;  %v4200_v3 = vadd.f32 1.0, %v7434_v48  ;;  %v9802_v61 = vpop.f32.mrb[90].mxu1  ;;  %v9818_v48 = vadd.f32 %v9684_v20, %v9514_v51  ;;  %11112 = vst [vmem:[#allocation34_spill] sm:$0xff] %v9821_v0  ;;  %6799 = vmatprep.subr.bf16.mxu1 %v6798_v31  ;;  %v4144_v36 = vmul.f32 1.442695, %v4039_v39 }
 0x3c8   : > { %v7438_v59 = vpop.eup %7437  ;;  %7457 = vrcp.f32 %v4198_v17  ;;  %v4199_v52 = vadd.f32 1.0, %v7436_v30  ;;  %v9804_v35 = vpop.f32.mrb[91].mxu0  ;;  %6793 = vmatpush1.bf16.msra.mxu0 %v11113_v63  ;;  %v11116_v14 = vpack.c.bf16 %v9666_v28, %v9624_v22  ;;  %v4174_v39 = vmul.f32 1.442695, %v4054_v62 }
 0x3c9   : > { %v7440_v41 = vpop.eup %7439  ;;  %7459 = vrcp.f32 %v4200_v3  ;;  %v4201_v8 = vadd.f32 1.0, %v7438_v59  ;;  %v9809_v34 = vpop.f32.mrb[91].mxu1  ;;  %11111 = vst [vmem:[#allocation32_spill] sm:$0xff] %v9818_v48  ;;  %v11114_v3 = vld [vmem:[#allocation23_spill] sm:$0xff]  ;;  %v9840_v59 = vadd.f32 %v3975_v7, %v9460_v54  ;;  %v4178_v22 = vmul.f32 1.442695, %v4056_v2 }
 0x3ca   : > { %v7442_v56 = vpop.eup %7441  ;;  %7461 = vrcp.f32 %v4199_v52  ;;  %v4214_v45 = vadd.f32 1.0, %v7440_v41  ;;  %v9831_v17 = vpop.f32.mrb[92].mxu0  ;;  %v9837_v20 = vmul.f32 %v9713_v58, %v11114_v3  ;;  %6801 = vmatpush1.bf16.msra.mxu1 %v11116_v14  ;;  %v11117_v41 = vld [vmem:[#allocation15_spill] sm:$0xff]  ;;  %v4148_v58 = vmul.f32 1.442695, %v4041_v6  ;;  %v11121_v3 = vld [vmem:[#allocation16_spill] sm:$0xff] }
 0x3cb   : > { %v7444_v60 = vpop.eup %7443  ;;  %7463 = vrcp.f32 %v4201_v8  ;;  %v4216_v4 = vadd.f32 1.0, %v7442_v56  ;;  %11115 = vst [vmem:[#allocation33_spill] sm:$0xff] %v9840_v59  ;;  %v9845_v16 = vpop.f32.mrb[92].mxu1  ;;  %v9853_v8 = vmul.f32 %v9728_v23, %v11117_v41  ;;  %v4055_v28 = vsub.f32 0.0, %v9814_v1  ;;  %6561 = vmatmul.mubr.msk.f32.vlgmr.msra.gmra.mrb[96].mxu0 %vm2145_vm1, %v9829_v32  ;;  %v11122_v14 = vld [vmem:[#allocation26_spill] sm:$0xff] }
 0x3cc   : > { %v9833_v30 = vpop.eup %7445  ;;  %7465 = vrcp.f32 %v4214_v45  ;;  %v9847_v52 = vpop.f32.mrb[93].mxu0  ;;  %v9861_v56 = vadd.f32 %v9779_v44, %v9460_v54  ;;  %v11119_v45 = vld [vmem:[#allocation22_spill] sm:$0xff]  ;;  %v4057_v6 = vsub.f32 0.0, %v9818_v48  ;;  %v11120_v62 = vmov 0.0   ;;  %v9877_v44 = vld [vmem:[%s10932_s5 + $0x8] sm:$0xff]  ;;  %v11125_v48 = vld [vmem:[#allocation25_spill] sm:$0xff] }
 0x3cd   : > { %v9849_v15 = vpop.eup %7447  ;;  %7467 = vrcp.f32 %v4216_v4  ;;  %v9855_v31 = vpop.f32.mrb[93].mxu1  ;;  %6565 = vmatmul.mubr.msk.f32.vlgmr.msra.gmra.mrb[96].mxu1 %vm2145_vm1, %v9829_v32  ;;  %4484 = vmatprep.mubr.f32.mxu0 %v11120_v62 }
 0x3ce   : > { %v7450_v7 = vpop.eup %7449  ;;  %7469 = vpow2.f32 %v9763_v19  ;;  %11118 = vst [vmem:[#allocation35_spill] sm:$0xff] %v9861_v56  ;;  %v4010_v19 = vsub.f32 0.0, %v9821_v0  ;;  %v9879_v2 = vpop.f32.mrb[94].mxu0  ;;  %4573 = vmatprep.mubr.f32.mxu1 %v11120_v62  ;;  %v4011_v0 = vsub.f32 0.0, %v9861_v56  ;;  %v4180_v53 = vmul.f32 1.442695, %v4057_v6 }
 0x3cf   : > { %v7452_v23 = vpop.eup %7451  ;;  %v9866_v4 = vmul.f32 %v7450_v7, %v11119_v45  ;;  %7471 = vpow2.f32 %v9781_v12  ;;  %v9884_v12 = vmul.f32 %v7444_v60, %v11121_v3  ;;  %v4012_v7 = vsub.f32 0.0, %v9840_v59  ;;  %v9892_v45 = vpop.f32.mrb[94].mxu1  ;;  %6562 = vmatmul.mubr.msk.f32.gmra.mrb[98].mxu0 %vm2145_vm1, %v9877_v44 }
 0x3d0   : > { %v9881_v63 = vpop.eup %7453  ;;  %v9887_v41 = vmul.f32 %v7452_v23, %v11122_v14  ;;  %7473 = vpow2.f32 %v9789_v13  ;;  %v9894_v29 = vpop.f32.mrb[95].mxu0  ;;  %v9903_v60 = vadd.f32 %v9787_v46, %v9460_v54  ;;  %v9907_v13 = vadd.f32 %v9798_v5, %v9462_v27  ;;  %v11124_v54 = vld [vmem:[#allocation14_spill] sm:$0xff]  ;;  %4490 = vmatprep.mubr.f32.mxu0 %v11120_v62 }
 0x3d1   : > { %v9896_v49 = vpop.eup %7455  ;;  %7475 = vpow2.f32 %v9795_v57  ;;  %v9909_v23 = vpop.f32.mrb[95].mxu1  ;;  %v4176_v59 = vmul.f32 1.442695, %v4055_v28  ;;  %v4325_v46 = vmul.f32 %v9699_v38, %v11124_v54  ;;  %v4341_v5 = vmul.f32 %v9724_v37, %v11125_v48  ;;  %6566 = vmatmul.mubr.msk.f32.gmra.mrb[98].mxu1 %vm2145_vm1, %v9877_v44 }
 0x3d2   : > { %11123 = vst [vmem:[#allocation29_spill] sm:$0xff] %v9903_v60  ;;  %v7458_v3 = vpop.eup %7457  ;;  %7477 = vpow2.f32 %v4144_v36  ;;  %v9926_v36 = vld [vmem:[%s10932_s5 + $0x10] sm:$0xff]  ;;  %v4086_v14 = vmul.f32 1.442695, %v4010_v19  ;;  %v4090_v38 = vmul.f32 1.442695, %v4012_v7  ;;  %v9932_v37 = vadd.f32 %v9802_v61, %v9462_v27  ;;  %4579 = vmatprep.mubr.f32.mxu1 %v11120_v62 }
 0x3d3   : > { %v7460_v57 = vpop.eup %7459  ;;  %7479 = vpow2.f32 %v4148_v58  ;;  %v11126_v58 = vld [vmem:[#allocation17_spill] sm:$0xff]  ;;  %v4013_v54 = vsub.f32 0.0, %v9903_v60  ;;  %v4026_v56 = vsub.f32 0.0, %v9907_v13  ;;  %v4088_v19 = vmul.f32 1.442695, %v4011_v0  ;;  %6563 = vmatmul.mubr.msk.f32.gmra.mrb[100].mxu0 %vm2145_vm1, %v9926_v36  ;;  %v11128_v0 = vld [vmem:[#allocation19_spill] sm:$0xff] }
 0x3d4   : > { %v9928_v28 = vpop.eup %7461  ;;  %7481 = vpow2.f32 %v4174_v39  ;;  %v9939_v6 = vmul.f32 %v9833_v30, %v11126_v58  ;;  %v9945_v61 = vadd.f32 %v9804_v35, %v9462_v27  ;;  %v6802_v7 = vpack.c.bf16 %v9837_v20, %v9773_v40  ;;  %v11127_v58 = vld [vmem:[#allocation18_spill] sm:$0xff]  ;;  %4496 = vmatprep.mubr.f32.mxu0 %v11120_v62 }
 0x3d5   : > { %v9935_v48 = vpop.eup %7463  ;;  %7483 = vpow2.f32 %v4178_v22  ;;  %v9952_v22 = vmul.f32 %v7458_v3, %v11127_v58  ;;  %6567 = vmatmul.mubr.msk.f32.gmra.mrb[100].mxu1 %vm2145_vm1, %v9926_v36  ;;  %v9963_v40 = vld [vmem:[%s10932_s5 + $0x18] sm:$0xff]  ;;  %v9966_v20 = vmul.f32 %v7460_v57, %v11128_v0 }
 0x3d6   : > { %v7466_v39 = vpop.eup %7465  ;;  %7485 = vpow2.f32 %v4176_v59  ;;  %v6810_v59 = vpack.c.bf16 %v4341_v5, %v4325_v46  ;;  %6803 = vmatprep.subr.bf16.mxu0 %v6802_v7  ;;  %4585 = vmatprep.mubr.f32.mxu1 %v11120_v62  ;;  %v11129_v46 = vld [vmem:[#allocation20_spill] sm:$0xff] }
 0x3d7   : > { %v7468_v30 = vpop.eup %7467  ;;  %v9955_v60 = vmul.f32 %v7466_v39, %v9670_v24  ;;  %7487 = vpow2.f32 %v4180_v53  ;;  %v4028_v24 = vsub.f32 0.0, %v9932_v37  ;;  %v9975_v5 = vmul.f32 %v9849_v15, %v11129_v46  ;;  %6564 = vmatmul.mubr.msk.f32.gmra.mrb[102].mxu0 %vm2145_vm1, %v9963_v40 }
 0x3d8   : > { %v7470_v35 = vpop.eup %7469  ;;  %v9969_v3 = vmul.f32 %v7468_v30, %v9682_v11  ;;  %7489 = vpow2.f32 %v4086_v14  ;;  %6811 = vmatprep.subr.bf16.mxu1 %v6810_v59  ;;  %v11130_v11 = vpack.c.bf16 %v9711_v25, %v9708_v10  ;;  %v9986_v15 = vadd.f32 %v9809_v34, %v9462_v27  ;;  %4656 = vmatprep.mubr.f32.mxu0 %v11120_v62 }
 0x3d9   : > { %v7472_v53 = vpop.eup %7471  ;;  %v6820_v39 = vpack.c.bf16 %v9955_v60, %v9952_v22  ;;  %v4215_v58 = vadd.f32 1.0, %v7470_v35  ;;  %7491 = vpow2.f32 %v4090_v38  ;;  %v11131_v30 = vpack.c.bf16 %v9719_v42, %v9716_v9  ;;  %6568 = vmatmul.mubr.msk.f32.gmra.mrb[102].mxu1 %vm2145_vm1, %v9963_v40  ;;  %v11132_v35 = vld [vmem:[#allocation30_spill] sm:$0xff]  ;;  %v11138_v22 = vld [vmem:[#allocation31_spill] sm:$0xff] }
 0x3da   : > { %6805 = vmatpush1.bf16.msra.mxu0 %v11130_v11  ;;  %v7474_v14 = vpop.eup %7473  ;;  %v6828_v57 = vpack.c.bf16 %v9969_v3, %v9966_v20  ;;  %v4217_v7 = vadd.f32 1.0, %v7472_v53  ;;  %7493 = vpow2.f32 %v4088_v19  ;;  %v4027_v25 = vsub.f32 0.0, %v9945_v61  ;;  %4745 = vmatprep.mubr.f32.mxu1 %v11120_v62 }
 0x3db   : > { %6813 = vmatpush1.bf16.msra.mxu1 %v11131_v30  ;;  %v7476_v38 = vpop.eup %7475  ;;  %7495 = vrcp.f32 %v4215_v58  ;;  %v4230_v10 = vadd.f32 1.0, %v7474_v14  ;;  %v9996_v59 = vadd.f32 %v9831_v17, %v9486_v18  ;;  %v10001_v42 = vmul.f32 1.442695, %v4013_v54  ;;  %v11133_v58 = vld [vmem:[#allocation24_spill] sm:$0xff] }
 0x3dc   : > { %v7478_v27 = vpop.eup %7477  ;;  %7497 = vrcp.f32 %v4217_v7  ;;  %v4232_v9 = vadd.f32 1.0, %v7476_v38  ;;  %v10003_v34 = vmul.f32 1.442695, %v4026_v56  ;;  %v4371_v0 = vmul.f32 %v9881_v63, %v11132_v35 }
 0x3dd   : > { %v7480_v19 = vpop.eup %7479  ;;  %7499 = vrcp.f32 %v4230_v10  ;;  %v4231_v17 = vadd.f32 1.0, %v7478_v27  ;;  %v10008_v53 = vmul.f32 1.442695, %v4028_v24  ;;  %v4373_v11 = vmul.f32 %v9896_v49, %v11133_v58 }
 0x3de   : > { %v7482_v46 = vpop.eup %7481  ;;  %7501 = vrcp.f32 %v4232_v9  ;;  %v4233_v14 = vadd.f32 1.0, %v7480_v19  ;;  %v4029_v54 = vsub.f32 0.0, %v9986_v15  ;;  %v10013_v30 = vmul.f32 1.442695, %v4027_v25 }
 0x3df   : > { %v7484_v56 = vpop.eup %7483  ;;  %7503 = vrcp.f32 %v4231_v17  ;;  %v4246_v7 = vadd.f32 1.0, %v7482_v46  ;;  %v4042_v38 = vsub.f32 0.0, %v9996_v59  ;;  %v10018_v24 = vadd.f32 %v9845_v16, %v9486_v18 }
 0x3e0   : > { %v7486_v63 = vpop.eup %7485  ;;  %7505 = vrcp.f32 %v4233_v14  ;;  %v4248_v10 = vadd.f32 1.0, %v7484_v56  ;;  %v10022_v49 = vadd.f32 %v9847_v52, %v9486_v18  ;;  %v10026_v25 = vadd.f32 %v9855_v31, %v9486_v18  ;;  %v11134_v31 = vld [vmem:[#allocation28_spill] sm:$0xff] }
 0x3e1   : > { %v7488_v27 = vpop.eup %7487  ;;  %7507 = vrcp.f32 %v4246_v7  ;;  %v4247_v9 = vadd.f32 1.0, %v7486_v63  ;;  %v6806_v19 = vpack.c.bf16 %v4371_v0, %v9939_v6  ;;  %v10031_v16 = vadd.f32 %v9879_v2, %v9514_v51  ;;  %v11135_v0 = vld [vmem:[#allocation27_spill] sm:$0xff] }
 0x3e2   : > { %v7490_v35 = vpop.eup %7489  ;;  %7509 = vrcp.f32 %v4248_v10  ;;  %v4249_v17 = vadd.f32 1.0, %v7488_v27  ;;  %v6814_v46 = vpack.c.bf16 %v4373_v11, %v9975_v5  ;;  %v10036_v14 = vadd.f32 %v9892_v45, %v9514_v51 }
 0x3e3   : > { %v7492_v52 = vpop.eup %7491  ;;  %7511 = vrcp.f32 %v4247_v9  ;;  %v4202_v58 = vadd.f32 1.0, %v7490_v35  ;;  %6807 = vmatprep.subr.bf16.mxu0 %v6806_v19  ;;  %v4327_v6 = vmul.f32 %v9928_v28, %v11134_v31  ;;  %v4329_v56 = vmul.f32 %v9935_v48, %v11135_v0  ;;  %v7833_v9 = vld [vmem:[%s10934_s7] sm:$0xff]  ;;  %v7835_v31 = vld [vmem:[%s10934_s7 + $0x10] sm:$0xff] }
 0x3e4   : > { %v7494_v18 = vpop.eup %7493  ;;  %7513 = vrcp.f32 %v4249_v17  ;;  %v4204_v2 = vadd.f32 1.0, %v7492_v52  ;;  %6815 = vmatprep.subr.bf16.mxu1 %v6814_v46  ;;  %v11136_v5 = vpack.c.bf16 %v9866_v4, %v9853_v8  ;;  %v4044_v45 = vsub.f32 0.0, %v10018_v24 }
 0x3e5   : > { %v7496_v11 = vpop.eup %7495  ;;  %7515 = vrcp.f32 %v4202_v58  ;;  %v4203_v7 = vadd.f32 1.0, %v7494_v18  ;;  %v10048_v63 = vadd.f32 %v9894_v29, %v9514_v51  ;;  %v11137_v28 = vpack.c.bf16 %v9887_v41, %v9884_v12 }
 0x3e6   : > { %6809 = vmatpush1.bf16.msra.mxu0 %v11136_v5  ;;  %v7954_v48 = vmov 2   ;;  %v7498_v10 = vpop.eup %7497  ;;  %v4343_v27 = vmul.f32 %v7496_v11, %v9705_v55  ;;  %7517 = vrcp.f32 %v4204_v2  ;;  %v4043_v8 = vsub.f32 0.0, %v10022_v49  ;;  %v7834_v55 = vld [vmem:[%s10934_s7 + $0x8] sm:$0xff] }
 0x3e7   : > { %6817 = vmatpush1.bf16.msra.mxu1 %v11137_v28  ;;  %7059 = vset.pattern.permute.xlu1 %v7954_v48  ;;  %v4045_v4 = vsub.f32 0.0, %v10026_v25  ;;  %v7500_v29 = vpop.eup %7499  ;;  %v4345_v12 = vmul.f32 %v7498_v10, %v9734_v33  ;;  %7519 = vrcp.f32 %v4203_v7  ;;  %v4058_v41 = vsub.f32 0.0, %v10031_v16 }
 0x3e8   : > { %4387 = vperm.xlu1 %7059, %v7833_v9   ;;  %7060 = vset.pattern.permute.xlu0 %v7954_v48  ;;  %v4060_v19 = vsub.f32 0.0, %v10036_v14  ;;  %v7502_v35 = vpop.eup %7501  ;;  %7521 = vpow2.f32 %v10001_v42  ;;  %v4124_v17 = vmul.f32 1.442695, %v4029_v54  ;;  %v10070_v33 = vadd.f32 %v9909_v23, %v9514_v51 }
 0x3e9   : > { %6569 = vmatmul.mubr.msk.f32.vlgmr.msra.gmra.mrb[104].mxu0 %vm2145_vm1, %v9829_v32  ;;  %4391 = vperm.xlu0 %7060, %v7834_v55   ;;  %v6818_v46 = vpack.c.bf16 %v4343_v27, %v4327_v6  ;;  %v7504_v52 = vpop.eup %7503  ;;  %7523 = vpow2.f32 %v10003_v34  ;;  %v4150_v58 = vmul.f32 1.442695, %v4042_v38  ;;  %v4059_v18 = vsub.f32 0.0, %v10048_v63 }
 0x3ea   : > { %6573 = vmatmul.mubr.msk.f32.vlgmr.msra.gmra.mrb[104].mxu1 %vm2145_vm1, %v9829_v32  ;;  %4662 = vmatprep.mubr.f32.mxu0 %v11120_v62  ;;  %v6826_v42 = vpack.c.bf16 %v4345_v12, %v4329_v56  ;;  %v7506_v54 = vpop.eup %7505  ;;  %7525 = vpow2.f32 %v10008_v53  ;;  %v4154_v51 = vmul.f32 1.442695, %v4044_v45  ;;  %v4152_v23 = vmul.f32 1.442695, %v4043_v8 }
 0x3eb   : > { %4751 = vmatprep.mubr.f32.mxu1 %v11120_v62  ;;  %6819 = vmatprep.subr.bf16.mxu0 %v6818_v46  ;;  %v7508_v6 = vpop.eup %7507  ;;  %7527 = vpow2.f32 %v10013_v30  ;;  %v4156_v34 = vmul.f32 1.442695, %v4045_v4  ;;  %v4182_v38 = vmul.f32 1.442695, %v4058_v41  ;;  %v4186_v0 = vmul.f32 1.442695, %v4060_v19 }
 0x3ec   : > { %4395 = vperm.xlu1 %7059, %v7835_v31   ;;  %6827 = vmatprep.subr.bf16.mxu1 %v6826_v42  ;;  %v7510_v56 = vpop.eup %7509  ;;  %v4358_v53 = vmul.f32 %v7500_v29, %v9742_v21  ;;  %v4374_v2 = vmul.f32 %v7508_v6, %v9785_v43  ;;  %7529 = vpow2.f32 %v4124_v17  ;;  %v4061_v5 = vsub.f32 0.0, %v10070_v33 }
 0x3ed   : > { %6570 = vmatmul.mubr.msk.f32.gmra.mrb[106].mxu0 %vm2145_vm1, %v9877_v44  ;;  %v7512_v30 = vpop.eup %7511  ;;  %v4360_v11 = vmul.f32 %v7502_v35, %v9750_v47  ;;  %v4376_v7 = vmul.f32 %v7510_v56, %v9793_v50  ;;  %7531 = vpow2.f32 %v4150_v58  ;;  %v4184_v45 = vmul.f32 1.442695, %v4059_v18  ;;  %6829 = vmatpush1.bf16.msra.mxu1 %v6828_v57  ;;  %v7836_v47 = vld [vmem:[%s10934_s7 + $0x18] sm:$0xff] }
 0x3ee   : > { %6574 = vmatmul.mubr.msk.f32.gmra.mrb[106].mxu1 %vm2145_vm1, %v9877_v44  ;;  %6821 = vmatpush1.bf16.msra.mxu0 %v6820_v39  ;;  %v7514_v21 = vpop.eup %7513  ;;  %v4359_v43 = vmul.f32 %v7504_v52, %v9769_v26  ;;  %v6824_v28 = vpack.c.bf16 %v4374_v2, %v4358_v53  ;;  %v4375_v60 = vmul.f32 %v7512_v30, %v9814_v1  ;;  %7533 = vpow2.f32 %v4154_v51  ;;  %v11139_v39 = vld [vmem:[#allocation32_spill] sm:$0xff] }
 0x3ef   : > { %4668 = vmatprep.mubr.f32.mxu0 %v11120_v62  ;;  %4757 = vmatprep.mubr.f32.mxu1 %v11120_v62  ;;  %v10105_v50 = vpop.eup %7515  ;;  %v4361_v20 = vmul.f32 %v7506_v54, %v11138_v22  ;;  %v6832_v3 = vpack.c.bf16 %v4376_v7, %v4360_v11  ;;  %v4377_v57 = vmul.f32 %v7514_v21, %v11139_v39  ;;  %7535 = vpow2.f32 %v4152_v23  ;;  %v11140_v7 = vld [vmem:[#allocation34_spill] sm:$0xff] }
 0x3f0   : > { %4399 = vperm.xlu1 %7059, %v7836_v47   ;;  %v10111_v26 = vpop.eup %7517  ;;  %7537 = vpow2.f32 %v4156_v34  ;;  %v4188_v1 = vmul.f32 1.442695, %v4061_v5  ;;  %v6822_v48 = vpack.c.bf16 %v4375_v60, %v4359_v43 }
 0x3f1   : > { %6571 = vmatmul.mubr.msk.f32.gmra.mrb[108].mxu0 %vm2145_vm1, %v9926_v36  ;;  %v10116_v10 = vpop.eup %7519  ;;  %7539 = vpow2.f32 %v4182_v38  ;;  %v6830_v27 = vpack.c.bf16 %v4377_v57, %v4361_v20  ;;  %v11142_v20 = vld [vmem:[#allocation35_spill] sm:$0xff] }
 0x3f2   : > { %6575 = vmatmul.mubr.msk.f32.gmra.mrb[108].mxu1 %vm2145_vm1, %v9926_v36  ;;  %4674 = vmatprep.mubr.f32.mxu0 %v11120_v62  ;;  %v7522_v8 = vpop.eup %7521  ;;  %7541 = vpow2.f32 %v4186_v0 }
 0x3f3   : > { %4763 = vmatprep.mubr.f32.mxu1 %v11120_v62  ;;  %6823 = vmatprep.subr.bf16.mxu0 %v6822_v48  ;;  %v7524_v4 = vpop.eup %7523  ;;  %v4205_v9 = vadd.f32 1.0, %v7522_v8  ;;  %7543 = vpow2.f32 %v4184_v45  ;;  %v4330_v45 = vmul.f32 %v10105_v50, %v11140_v7  ;;  %v11143_v50 = vld [vmem:[#allocation29_spill] sm:$0xff] }
 0x3f4   : > { %6831 = vmatprep.subr.bf16.mxu1 %v6830_v27  ;;  %v7526_v29 = vpop.eup %7525  ;;  %v4218_v12 = vadd.f32 1.0, %v7524_v4  ;;  %7545 = vpow2.f32 %v4188_v1  ;;  %6825 = vmatpush1.bf16.msra.mxu0 %v6824_v28  ;;  %v11141_v28 = vld [vmem:[#allocation33_spill] sm:$0xff] }
 0x3f5   : > { %6572 = vmatmul.mubr.msk.f32.gmra.mrb[110].mxu0 %vm2145_vm1, %v9963_v40  ;;  %v7528_v41 = vpop.eup %7527  ;;  %7547 = vrcp.f32 %v4205_v9  ;;  %v4220_v19 = vadd.f32 1.0, %v7526_v29  ;;  %6833 = vmatpush1.bf16.msra.mxu1 %v6832_v3  ;;  %v4332_v60 = vmul.f32 %v10111_v26, %v11141_v28  ;;  %v4331_v3 = vmul.f32 %v10116_v10, %v11142_v20 }
 0x3f6   : > { %6576 = vmatmul.mubr.msk.f32.gmra.mrb[110].mxu1 %vm2145_vm1, %v9963_v40  ;;  %4834 = vmatprep.mubr.f32.mxu0 %v11120_v62  ;;  %v7530_v55 = vpop.eup %7529  ;;  %7549 = vrcp.f32 %v4218_v12  ;;  %v4219_v35 = vadd.f32 1.0, %v7528_v41 }
 0x3f7   : > { %4923 = vmatprep.mubr.f32.mxu1 %v11120_v62  ;;  %v7532_v17 = vpop.eup %7531  ;;  %7551 = vrcp.f32 %v4220_v19  ;;  %v4221_v46 = vadd.f32 1.0, %v7530_v55 }
 0x3f8   : > { %v7534_v52 = vpop.eup %7533  ;;  %7553 = vrcp.f32 %v4219_v35  ;;  %v4234_v58 = vadd.f32 1.0, %v7532_v17 }
 0x3f9   : > { %6577 = vmatmul.mubr.msk.f32.vlgmr.msra.gmra.mrb[112].mxu0 %vm2145_vm1, %v9829_v32  ;;  %v7536_v18 = vpop.eup %7535  ;;  %7555 = vrcp.f32 %v4221_v46  ;;  %v4236_v42 = vadd.f32 1.0, %v7534_v52 }
 0x3fa   : > { %6581 = vmatmul.mubr.msk.f32.vlgmr.msra.gmra.mrb[112].mxu1 %vm2145_vm1, %v9829_v32  ;;  %4840 = vmatprep.mubr.f32.mxu0 %v11120_v62  ;;  %v7538_v54 = vpop.eup %7537  ;;  %7557 = vrcp.f32 %v4234_v58  ;;  %v4235_v51 = vadd.f32 1.0, %v7536_v18 }
 0x3fb   : > { %4929 = vmatprep.mubr.f32.mxu1 %v11120_v62  ;;  %v7540_v23 = vpop.eup %7539  ;;  %7559 = vrcp.f32 %v4236_v42  ;;  %v4237_v31 = vadd.f32 1.0, %v7538_v54 }
 0x3fc   : > { %v7542_v6 = vpop.eup %7541  ;;  %7561 = vrcp.f32 %v4235_v51  ;;  %v4250_v34 = vadd.f32 1.0, %v7540_v23 }
 0x3fd   : > { %6578 = vmatmul.mubr.msk.f32.gmra.mrb[114].mxu0 %vm2145_vm1, %v9877_v44  ;;  %v7544_v38 = vpop.eup %7543  ;;  %7563 = vrcp.f32 %v4237_v31  ;;  %v4252_v0 = vadd.f32 1.0, %v7542_v6 }
 0x3fe   : > { %6582 = vmatmul.mubr.msk.f32.gmra.mrb[114].mxu1 %vm2145_vm1, %v9877_v44  ;;  %4846 = vmatprep.mubr.f32.mxu0 %v11120_v62  ;;  %v7546_v56 = vpop.eup %7545  ;;  %7565 = vrcp.f32 %v4250_v34  ;;  %v4251_v53 = vadd.f32 1.0, %v7544_v38 }
 0x3ff   : > { %4935 = vmatprep.mubr.f32.mxu1 %v11120_v62  ;;  %v7548_v2 = vpop.eup %7547  ;;  %7567 = vrcp.f32 %v4252_v0  ;;  %v4253_v5 = vadd.f32 1.0, %v7546_v56 }
 0x400   : > { %v7550_v30 = vpop.eup %7549  ;;  %7569 = vrcp.f32 %v4251_v53  ;;  %v4333_v1 = vmul.f32 %v7548_v2, %v11143_v50 }
 0x401   : > { %6579 = vmatmul.mubr.msk.f32.gmra.mrb[116].mxu0 %vm2145_vm1, %v9926_v36  ;;  %v7552_v11 = vpop.eup %7551  ;;  %v4346_v21 = vmul.f32 %v7550_v30, %v9907_v13  ;;  %7571 = vrcp.f32 %v4253_v5 }
 0x402   : > { %6583 = vmatmul.mubr.msk.f32.gmra.mrb[116].mxu1 %vm2145_vm1, %v9926_v36  ;;  %4852 = vmatprep.mubr.f32.mxu0 %v11120_v62  ;;  %v7554_v43 = vpop.eup %7553  ;;  %v4348_v47 = vmul.f32 %v7552_v11, %v9932_v37 }
 0x403   : > { %4941 = vmatprep.mubr.f32.mxu1 %v11120_v62  ;;  %v7556_v22 = vpop.eup %7555  ;;  %v6836_v39 = vpack.c.bf16 %v4346_v21, %v4330_v45  ;;  %v4347_v57 = vmul.f32 %v7554_v43, %v9945_v61 }
 0x404   : > { %v7558_v13 = vpop.eup %7557  ;;  %v6844_v48 = vpack.c.bf16 %v4348_v47, %v4332_v60  ;;  %v4349_v27 = vmul.f32 %v7556_v22, %v9986_v15 }
 0x405   : > { %6580 = vmatmul.mubr.msk.f32.gmra.mrb[118].mxu0 %vm2145_vm1, %v9963_v40  ;;  %v7560_v37 = vpop.eup %7559  ;;  %v6834_v26 = vpack.c.bf16 %v4347_v57, %v4331_v3  ;;  %v4362_v29 = vmul.f32 %v7558_v13, %v9996_v59 }
 0x406   : > { %6584 = vmatmul.mubr.msk.f32.gmra.mrb[118].mxu1 %vm2145_vm1, %v9963_v40  ;;  %5012 = vmatprep.mubr.f32.mxu0 %v11120_v62  ;;  %v7562_v10 = vpop.eup %7561  ;;  %v6842_v61 = vpack.c.bf16 %v4349_v27, %v4333_v1  ;;  %v4364_v41 = vmul.f32 %v7560_v37, %v10018_v24 }
 0x407   : > { %5101 = vmatprep.mubr.f32.mxu1 %v11120_v62  ;;  %v7564_v8 = vpop.eup %7563  ;;  %6835 = vmatprep.subr.bf16.mxu0 %v6834_v26  ;;  %v4363_v35 = vmul.f32 %v7562_v10, %v10022_v49 }
 0x408   : > { %v7566_v4 = vpop.eup %7565  ;;  %6843 = vmatprep.subr.bf16.mxu1 %v6842_v61  ;;  %6837 = vmatpush1.bf16.msra.mxu0 %v6836_v39  ;;  %v4365_v52 = vmul.f32 %v7564_v8, %v10026_v25 }
 0x409   : > { %v7568_v9 = vpop.eup %7567  ;;  %v4378_v15 = vmul.f32 %v7566_v4, %v10031_v16  ;;  %6845 = vmatpush1.bf16.msra.mxu1 %v6844_v48 }
 0x40a   : > { %v7570_v12 = vpop.eup %7569  ;;  %v4380_v19 = vmul.f32 %v7568_v9, %v10036_v14 }
 0x40b   : > { %v7572_v55 = vpop.eup %7571  ;;  %v6840_v17 = vpack.c.bf16 %v4378_v15, %v4362_v29  ;;  %v4379_v46 = vmul.f32 %v7570_v12, %v10048_v63 }
 0x40c   : > { %v6848_v58 = vpack.c.bf16 %v4380_v19, %v4364_v41  ;;  %v4381_v18 = vmul.f32 %v7572_v55, %v10070_v33 }
 0x40d   : > { %v6838_v59 = vpack.c.bf16 %v4379_v46, %v4363_v35 }
 0x40e   : > { %v6846_v42 = vpack.c.bf16 %v4381_v18, %v4365_v52 }
 0x40f   : > { %6839 = vmatprep.subr.bf16.mxu0 %v6838_v59 }
 0x410   : > { %6847 = vmatprep.subr.bf16.mxu1 %v6846_v42  ;;  %6841 = vmatpush1.bf16.msra.mxu0 %v6840_v17 }
 0x411   : > { %6849 = vmatpush1.bf16.msra.mxu1 %v6848_v58 }
 0x413   : > { %6585 = vmatmul.mubr.msk.f32.vlgmr.msra.gmra.mrb[120].mxu0 %vm2145_vm1, %v9829_v32 }
 0x414   : > { %6589 = vmatmul.mubr.msk.f32.vlgmr.msra.gmra.mrb[120].mxu1 %vm2145_vm1, %v9829_v32  ;;  %5018 = vmatprep.mubr.f32.mxu0 %v11120_v62 }
 0x415   : > { %5107 = vmatprep.mubr.f32.mxu1 %v11120_v62 }
 0x417   : > { %6586 = vmatmul.mubr.msk.f32.gmra.mrb[122].mxu0 %vm2145_vm1, %v9877_v44 }
 0x418   : > { %6590 = vmatmul.mubr.msk.f32.gmra.mrb[122].mxu1 %vm2145_vm1, %v9877_v44  ;;  %5024 = vmatprep.mubr.f32.mxu0 %v11120_v62 }
 0x419   : > { %5113 = vmatprep.mubr.f32.mxu1 %v11120_v62 }
 0x41b   : > { %6587 = vmatmul.mubr.msk.f32.gmra.mrb[124].mxu0 %vm2145_vm1, %v9926_v36 }
 0x41c   : > { %6591 = vmatmul.mubr.msk.f32.gmra.mrb[124].mxu1 %vm2145_vm1, %v9926_v36  ;;  %5030 = vmatprep.mubr.f32.mxu0 %v11120_v62 }
 0x41d   : > { %5119 = vmatprep.mubr.f32.mxu1 %v11120_v62 }
 0x41f   : > { %6588 = vmatmul.mubr.msk.f32.gmra.mrb[126].mxu0 %vm2145_vm1, %v9963_v40 }
 0x420   : > { %6592 = vmatmul.mubr.msk.f32.gmra.mrb[126].mxu1 %vm2145_vm1, %v9963_v40  ;;  %5580 = vmatprep.mubr.f32.mxu0 %v11120_v62 }
 0x421   : > { %5651 = vmatprep.mubr.f32.mxu1 %v11120_v62 }
 0x467   : > { %v10192_v32 = vpop.permute.xlu1 %4387 }
 0x468   : > { %11144 = vst [vmem:[#allocation12_spill] sm:$0xff] %v10192_v32  ;;  %v10203_v40 = vpop.permute.xlu0 %4391 }
 0x46b   : > { %v10211_v31 = vpop.permute.xlu1 %4395 }
 0x46f   : > { %v10236_v48 = vpop.permute.xlu1 %4399 }
 0x49e   : > { %v4480_v44 = vpop.f32.mrb[96].mxu0 }
 0x49f   : > { %v10195_v24 = vadd.f32 %v4480_v44, %v10192_v32  ;;  %v4482_v49 = vpop.f32.mrb[97].mxu0 }
 0x4a0   : > { %v4569_v36 = vpop.f32.mrb[96].mxu1  ;;  %v10201_v16 = vadd.f32 %v4482_v49, %v10192_v32 }
 0x4a1   : > { %v10198_v25 = vadd.f32 %v4569_v36, %v10192_v32  ;;  %v4571_v14 = vpop.f32.mrb[97].mxu1  ;;  %v5126_v63 = vsub.f32 0.0, %v10195_v24 }
 0x4a2   : > { %v10207_v33 = vadd.f32 %v4571_v14, %v10192_v32  ;;  %v5127_v51 = vsub.f32 0.0, %v10201_v16  ;;  %v4486_v23 = vpop.f32.mrb[98].mxu0 }
 0x4a3   : > { %v5128_v54 = vsub.f32 0.0, %v10198_v25  ;;  %v5190_v6 = vmul.f32 1.442695, %v5126_v63  ;;  %v10215_v38 = vadd.f32 %v4486_v23, %v10203_v40  ;;  %v4488_v56 = vpop.f32.mrb[99].mxu0 }
 0x4a4   : > { %v5129_v34 = vsub.f32 0.0, %v10207_v33  ;;  %v4575_v0 = vpop.f32.mrb[98].mxu1  ;;  %v5192_v2 = vmul.f32 1.442695, %v5127_v51  ;;  %v10221_v30 = vadd.f32 %v4488_v56, %v10203_v40 }
 0x4a5   : > { %v5194_v53 = vmul.f32 1.442695, %v5128_v54  ;;  %v10218_v5 = vadd.f32 %v4575_v0, %v10203_v40  ;;  %v4577_v11 = vpop.f32.mrb[99].mxu1  ;;  %7573 = vpow2.f32 %v5190_v6  ;;  %v5142_v45 = vsub.f32 0.0, %v10215_v38 }
 0x4a6   : > { %v5196_v7 = vmul.f32 1.442695, %v5129_v34  ;;  %v10225_v21 = vadd.f32 %v4577_v11, %v10203_v40  ;;  %v5143_v28 = vsub.f32 0.0, %v10221_v30  ;;  %v4492_v60 = vpop.f32.mrb[100].mxu0 }
 0x4a7   : > { %7575 = vpow2.f32 %v5194_v53  ;;  %v5144_v43 = vsub.f32 0.0, %v10218_v5  ;;  %v5222_v47 = vmul.f32 1.442695, %v5142_v45  ;;  %v10231_v20 = vadd.f32 %v4492_v60, %v10211_v31  ;;  %v4494_v39 = vpop.f32.mrb[101].mxu0 }
 0x4a8   : > { %7577 = vpow2.f32 %v5192_v2  ;;  %v5145_v22 = vsub.f32 0.0, %v10225_v21  ;;  %v4581_v3 = vpop.f32.mrb[100].mxu1  ;;  %v5224_v13 = vmul.f32 1.442695, %v5143_v28  ;;  %v10240_v26 = vadd.f32 %v4494_v39, %v10211_v31 }
 0x4a9   : > { %7579 = vpow2.f32 %v5196_v7  ;;  %v5226_v57 = vmul.f32 1.442695, %v5144_v43  ;;  %v10234_v50 = vadd.f32 %v4581_v3, %v10211_v31  ;;  %v4583_v1 = vpop.f32.mrb[101].mxu1  ;;  %v5158_v37 = vsub.f32 0.0, %v10231_v20 }
 0x4aa   : > { %7581 = vpow2.f32 %v5222_v47  ;;  %v5228_v27 = vmul.f32 1.442695, %v5145_v22  ;;  %v10244_v61 = vadd.f32 %v4583_v1, %v10211_v31  ;;  %v4498_v8 = vpop.f32.mrb[102].mxu0  ;;  %v5159_v9 = vsub.f32 0.0, %v10240_v26 }
 0x4ab   : > { %7583 = vpow2.f32 %v5226_v57  ;;  %v5160_v10 = vsub.f32 0.0, %v10234_v50  ;;  %v5254_v4 = vmul.f32 1.442695, %v5158_v37  ;;  %v10248_v29 = vadd.f32 %v4498_v8, %v10236_v48  ;;  %v4500_v12 = vpop.f32.mrb[103].mxu0 }
 0x4ac   : > { %7585 = vpow2.f32 %v5224_v13  ;;  %v4587_v15 = vpop.f32.mrb[102].mxu1  ;;  %v5161_v19 = vsub.f32 0.0, %v10244_v61  ;;  %v5256_v35 = vmul.f32 1.442695, %v5159_v9  ;;  %v10256_v54 = vadd.f32 %v4500_v12, %v10236_v48 }
 0x4ad   : > { %7587 = vpow2.f32 %v5228_v27  ;;  %v5258_v41 = vmul.f32 1.442695, %v5160_v10  ;;  %v4589_v55 = vpop.f32.mrb[103].mxu1  ;;  %v5174_v17 = vsub.f32 0.0, %v10248_v29  ;;  %v10253_v63 = vadd.f32 %v4587_v15, %v10236_v48 }
 0x4ae   : > { %7589 = vpow2.f32 %v5254_v4  ;;  %v5260_v59 = vmul.f32 1.442695, %v5161_v19  ;;  %v10259_v34 = vadd.f32 %v4589_v55, %v10236_v48  ;;  %v5175_v43 = vsub.f32 0.0, %v10256_v54 }
 0x4af   : > { %7591 = vpow2.f32 %v5258_v41  ;;  %v7574_v46 = vpop.eup %7573  ;;  %v5286_v52 = vmul.f32 1.442695, %v5174_v17  ;;  %v5176_v45 = vsub.f32 0.0, %v10253_v63 }
 0x4b0   : > { %7593 = vpow2.f32 %v5256_v35  ;;  %v5318_v18 = vadd.f32 1.0, %v7574_v46  ;;  %v5177_v22 = vsub.f32 0.0, %v10259_v34  ;;  %v5288_v46 = vmul.f32 1.442695, %v5175_v43 }
 0x4b1   : > { %v7576_v58 = vpop.eup %7575  ;;  %7595 = vpow2.f32 %v5286_v52  ;;  %v5290_v12 = vmul.f32 1.442695, %v5176_v45 }
 0x4b2   : > { %v7578_v42 = vpop.eup %7577  ;;  %v5320_v44 = vadd.f32 1.0, %v7576_v58  ;;  %7597 = vrcp.f32 %v5318_v18 }
 0x4b3   : > { %v7580_v36 = vpop.eup %7579  ;;  %v5319_v49 = vadd.f32 1.0, %v7578_v42 }
 0x4b4   : > { %v7582_v14 = vpop.eup %7581  ;;  %7599 = vrcp.f32 %v5320_v44  ;;  %v5321_v23 = vadd.f32 1.0, %v7580_v36  ;;  %v5292_v44 = vmul.f32 1.442695, %v5177_v22 }
 0x4b5   : > { %v7584_v51 = vpop.eup %7583  ;;  %v5334_v6 = vadd.f32 1.0, %v7582_v14  ;;  %7601 = vpow2.f32 %v5260_v59 }
 0x4b6   : > { %v7586_v0 = vpop.eup %7585  ;;  %7603 = vrcp.f32 %v5319_v49  ;;  %v5336_v56 = vadd.f32 1.0, %v7584_v51 }
 0x4b7   : > { %v7588_v53 = vpop.eup %7587  ;;  %7605 = vrcp.f32 %v5334_v6  ;;  %v5335_v2 = vadd.f32 1.0, %v7586_v0 }
 0x4b8   : > { %v7590_v11 = vpop.eup %7589  ;;  %7607 = vrcp.f32 %v5336_v56  ;;  %v5337_v7 = vadd.f32 1.0, %v7588_v53 }
 0x4b9   : > { %v7592_v60 = vpop.eup %7591  ;;  %7609 = vrcp.f32 %v5321_v23  ;;  %v5350_v47 = vadd.f32 1.0, %v7590_v11 }
 0x4ba   : > { %v7594_v13 = vpop.eup %7593  ;;  %7611 = vrcp.f32 %v5335_v2  ;;  %v5352_v1 = vadd.f32 1.0, %v7592_v60 }
 0x4bb   : > { %7613 = vrcp.f32 %v5337_v7  ;;  %v5351_v8 = vadd.f32 1.0, %v7594_v13  ;;  %v7596_v15 = vpop.eup %7595 }
 0x4bc   : > { %v4658_v28 = vpop.f32.mrb[104].mxu0  ;;  %7615 = vrcp.f32 %v5350_v47  ;;  %v7598_v35 = vpop.eup %7597  ;;  %v5366_v17 = vadd.f32 1.0, %v7596_v15 }
 0x4bd   : > { %v10265_v3 = vadd.f32 %v4658_v28, %v10192_v32  ;;  %v4747_v39 = vpop.f32.mrb[104].mxu1  ;;  %v4660_v57 = vpop.f32.mrb[105].mxu0  ;;  %7617 = vrcp.f32 %v5352_v1  ;;  %v10281_v42 = vmul.f32 %v7598_v35, %v10195_v24 }
 0x4be   : > { %v10268_v27 = vadd.f32 %v4747_v39, %v10192_v32  ;;  %v10271_v37 = vadd.f32 %v4660_v57, %v10192_v32  ;;  %v4749_v10 = vpop.f32.mrb[105].mxu1  ;;  %v7600_v59 = vpop.eup %7599  ;;  %7619 = vrcp.f32 %v5351_v8 }
 0x4bf   : > { %v5130_v4 = vsub.f32 0.0, %v10265_v3  ;;  %v10275_v9 = vadd.f32 %v4749_v10, %v10192_v32  ;;  %v7602_v14 = vpop.eup %7601  ;;  %7621 = vrcp.f32 %v5366_v17  ;;  %v10289_v56 = vmul.f32 %v7600_v59, %v10198_v25 }
 0x4c0   : > { %v5132_v41 = vsub.f32 0.0, %v10268_v27  ;;  %v5131_v19 = vsub.f32 0.0, %v10271_v37  ;;  %v4664_v55 = vpop.f32.mrb[106].mxu0  ;;  %v10286_v0 = vpop.eup %7603  ;;  %7623 = vpow2.f32 %v5290_v12  ;;  %v5353_v59 = vadd.f32 1.0, %v7602_v14 }
 0x4c1   : > { %11145 = vst [vmem:[#allocation13_spill] sm:$0xff] %v10275_v9  ;;  %v5133_v52 = vsub.f32 0.0, %v10275_v9  ;;  %v4753_v58 = vpop.f32.mrb[106].mxu1  ;;  %v4666_v18 = vpop.f32.mrb[107].mxu0  ;;  %v5198_v36 = vmul.f32 1.442695, %v5130_v4  ;;  %v10284_v6 = vadd.f32 %v4664_v55, %v10203_v40  ;;  %7625 = vpow2.f32 %v5288_v46 }
 0x4c2   : > { %v4755_v49 = vpop.f32.mrb[107].mxu1  ;;  %v5202_v51 = vmul.f32 1.442695, %v5132_v41  ;;  %v5200_v23 = vmul.f32 1.442695, %v5131_v19  ;;  %v10292_v24 = vadd.f32 %v4753_v58, %v10203_v40  ;;  %v10295_v53 = vadd.f32 %v4666_v18, %v10203_v40  ;;  %v7606_v11 = vpop.eup %7605 }
 0x4c3   : > { %v5204_v7 = vmul.f32 1.442695, %v5133_v52  ;;  %v5146_v45 = vsub.f32 0.0, %v10284_v6  ;;  %v10299_v43 = vadd.f32 %v4755_v49, %v10203_v40  ;;  %v7608_v25 = vpop.eup %7607  ;;  %v10302_v47 = vmul.f32 %v7606_v11, %v10215_v38 }
 0x4c4   : > { %11146 = vst [vmem:[#allocation21_spill] sm:$0xff] %v10295_v53  ;;  %v4670_v2 = vpop.f32.mrb[108].mxu0  ;;  %7627 = vpow2.f32 %v5292_v44  ;;  %v5148_v22 = vsub.f32 0.0, %v10292_v24  ;;  %v5147_v39 = vsub.f32 0.0, %v10295_v53  ;;  %v10306_v13 = vpop.eup %7609  ;;  %v10309_v1 = vmul.f32 %v7608_v25, %v10218_v5 }
 0x4c5   : > { %11147 = vst [vmem:[#allocation23_spill] sm:$0xff] %v10299_v43  ;;  %v4759_v28 = vpop.f32.mrb[108].mxu1  ;;  %v4672_v60 = vpop.f32.mrb[109].mxu0  ;;  %7629 = vpow2.f32 %v5198_v36  ;;  %v5230_v10 = vmul.f32 1.442695, %v5146_v45  ;;  %v5149_v8 = vsub.f32 0.0, %v10299_v43  ;;  %v10321_v52 = vadd.f32 %v4670_v2, %v10211_v31 }
 0x4c6   : > { %v4761_v57 = vpop.f32.mrb[109].mxu1  ;;  %v10312_v4 = vpop.eup %7611  ;;  %7631 = vpow2.f32 %v5202_v51  ;;  %v5234_v15 = vmul.f32 1.442695, %v5148_v22  ;;  %v5232_v5 = vmul.f32 1.442695, %v5147_v39  ;;  %v10334_v2 = vadd.f32 %v4759_v28, %v10211_v31 }
 0x4c7   : > { %v10316_v41 = vpop.eup %7613  ;;  %7633 = vpow2.f32 %v5200_v23  ;;  %v5236_v46 = vmul.f32 1.442695, %v5149_v8  ;;  %v5162_v36 = vsub.f32 0.0, %v10321_v52  ;;  %v10344_v22 = vadd.f32 %v4672_v60, %v10211_v31 }
 0x4c8   : > { %v4676_v12 = vpop.f32.mrb[110].mxu0  ;;  %v7616_v17 = vpop.eup %7615  ;;  %7635 = vpow2.f32 %v5204_v7  ;;  %11149 = vst [vmem:[#allocation22_spill] sm:$0xff] %v10334_v2  ;;  %v10354_v60 = vadd.f32 %v4761_v57, %v10211_v31 }
 0x4c9   : > { %v4765_v55 = vpop.f32.mrb[110].mxu1  ;;  %v4678_v35 = vpop.f32.mrb[111].mxu0  ;;  %7637 = vpow2.f32 %v5230_v10  ;;  %v10331_v23 = vmul.f32 %v7616_v17, %v10231_v20  ;;  %v5262_v25 = vmul.f32 1.442695, %v5162_v36  ;;  %11151 = vst [vmem:[#allocation26_spill] sm:$0xff] %v10344_v22 }
 0x4ca   : > { %v10323_v58 = vpop.f32.mrb[111].mxu1  ;;  %v7618_v18 = vpop.eup %7617  ;;  %7639 = vpow2.f32 %v5234_v15  ;;  %11152 = vst [vmem:[#allocation14_spill] sm:$0xff] %v10354_v60  ;;  %v10367_v57 = vadd.f32 %v4765_v55, %v10236_v48 }
 0x4cb   : > { %v10325_v44 = vpop.eup %7619  ;;  %11148 = vst [vmem:[#allocation15_spill] sm:$0xff] %v10331_v23  ;;  %7641 = vpow2.f32 %v5232_v5  ;;  %v10370_v38 = vmul.f32 %v7618_v18, %v10234_v50 }
 0x4cc   : > { %v10328_v49 = vpop.f32.mrb[112].mxu0  ;;  %v7622_v51 = vpop.eup %7621  ;;  %7643 = vpow2.f32 %v5236_v46  ;;  %v5164_v46 = vsub.f32 0.0, %v10334_v2  ;;  %11154 = vst [vmem:[#allocation17_spill] sm:$0xff] %v10367_v57 }
 0x4cd   : > { %v10336_v11 = vpop.f32.mrb[112].mxu1  ;;  %v10338_v7 = vpop.f32.mrb[113].mxu0  ;;  %v10341_v45 = vmul.f32 %v7622_v51, %v10248_v29  ;;  %7645 = vrcp.f32 %v5353_v59  ;;  %11155 = vst [vmem:[#allocation18_spill] sm:$0xff] %v10370_v38 }
 0x4ce   : > { %v7624_v14 = vpop.eup %7623  ;;  %v10346_v39 = vpop.f32.mrb[113].mxu1  ;;  %7647 = vpow2.f32 %v5262_v25  ;;  %v10362_v25 = vadd.f32 %v4676_v12, %v10236_v48  ;;  %v5266_v53 = vmul.f32 1.442695, %v5164_v46  ;;  %v10388_v46 = vadd.f32 %v10323_v58, %v10236_v48 }
 0x4cf   : > { %11150 = vst [vmem:[#allocation16_spill] sm:$0xff] %v10341_v45  ;;  %v7626_v20 = vpop.eup %7625  ;;  %v5368_v10 = vadd.f32 1.0, %v7624_v14  ;;  %v10405_v58 = vadd.f32 %v10338_v7, %v10192_v32 }
 0x4d0   : > { %v7628_v28 = vpop.eup %7627  ;;  %v5367_v15 = vadd.f32 1.0, %v7626_v20  ;;  %v10350_v5 = vpop.f32.mrb[114].mxu0  ;;  %v5163_v20 = vsub.f32 0.0, %v10344_v22  ;;  %11153 = vst [vmem:[#allocation25_spill] sm:$0xff] %v10362_v25  ;;  %11157 = vst [vmem:[#allocation20_spill] sm:$0xff] %v10388_v46  ;;  %v5181_v7 = vsub.f32 0.0, %v10388_v46 }
 0x4d1   : > { %v7630_v29 = vpop.eup %7629  ;;  %7649 = vrcp.f32 %v5368_v10  ;;  %v5369_v17 = vadd.f32 1.0, %v7628_v28  ;;  %v10356_v36 = vpop.f32.mrb[114].mxu1  ;;  %11160 = vst [vmem:[#allocation28_spill] sm:$0xff] %v10405_v58  ;;  %v10420_v23 = vadd.f32 %v10350_v5, %v10203_v40  ;;  %v5135_v46 = vsub.f32 0.0, %v10405_v58 }
 0x4d2   : > { %v10358_v59 = vpop.f32.mrb[115].mxu0  ;;  %v7632_v51 = vpop.eup %7631  ;;  %7651 = vrcp.f32 %v5367_v15  ;;  %v5322_v14 = vadd.f32 1.0, %v7630_v29  ;;  %v10373_v29 = vadd.f32 %v4678_v35, %v10236_v48  ;;  %v5264_v18 = vmul.f32 1.442695, %v5163_v20 }
 0x4d3   : > { %v10364_v8 = vpop.f32.mrb[115].mxu1  ;;  %v7634_v10 = vpop.eup %7633  ;;  %7653 = vrcp.f32 %v5369_v17  ;;  %v5324_v28 = vadd.f32 1.0, %v7632_v51  ;;  %v5165_v17 = vsub.f32 0.0, %v10354_v60  ;;  %v10393_v20 = vadd.f32 %v10328_v49, %v10192_v32  ;;  %11162 = vst [vmem:[#allocation31_spill] sm:$0xff] %v10420_v23 }
 0x4d4   : > { %v7636_v19 = vpop.eup %7635  ;;  %7655 = vrcp.f32 %v5322_v14  ;;  %v5323_v15 = vadd.f32 1.0, %v7634_v10  ;;  %11156 = vst [vmem:[#allocation19_spill] sm:$0xff] %v10373_v29  ;;  %v10375_v22 = vpop.f32.mrb[116].mxu0  ;;  %v5178_v14 = vsub.f32 0.0, %v10362_v25  ;;  %v5463_v58 = vmul.f32 %v10312_v4, %v10221_v30 }
 0x4d5   : > { %v7638_v12 = vpop.eup %7637  ;;  %7657 = vrcp.f32 %v5324_v28  ;;  %v5325_v43 = vadd.f32 1.0, %v7636_v19  ;;  %v10378_v51 = vpop.f32.mrb[116].mxu1  ;;  %v5180_v19 = vsub.f32 0.0, %v10367_v57  ;;  %11158 = vst [vmem:[#allocation30_spill] sm:$0xff] %v10393_v20 }
 0x4d6   : > { %v10380_v55 = vpop.f32.mrb[117].mxu0  ;;  %v7640_v9 = vpop.eup %7639  ;;  %7659 = vrcp.f32 %v5323_v15  ;;  %v5338_v50 = vadd.f32 1.0, %v7638_v12  ;;  %v5179_v15 = vsub.f32 0.0, %v10373_v29  ;;  %v5268_v29 = vmul.f32 1.442695, %v5165_v17 }
 0x4d7   : > { %v10383_v35 = vpop.f32.mrb[117].mxu1  ;;  %v7642_v10 = vpop.eup %7641  ;;  %7661 = vrcp.f32 %v5325_v43  ;;  %v5340_v62 = vadd.f32 1.0, %v7640_v9  ;;  %v10401_v43 = vadd.f32 %v10336_v11, %v10192_v32  ;;  %v5294_v57 = vmul.f32 1.442695, %v5178_v14 }
 0x4d8   : > { %v7644_v28 = vpop.eup %7643  ;;  %7663 = vrcp.f32 %v5338_v50  ;;  %v5339_v60 = vadd.f32 1.0, %v7642_v10  ;;  %v10395_v12 = vpop.f32.mrb[118].mxu0  ;;  %v5298_v17 = vmul.f32 1.442695, %v5180_v19 }
 0x4d9   : > { %v10397_v2 = vpop.eup %7645  ;;  %7665 = vrcp.f32 %v5340_v62  ;;  %v5341_v9 = vadd.f32 1.0, %v7644_v28  ;;  %11159 = vst [vmem:[#allocation24_spill] sm:$0xff] %v10401_v43  ;;  %v10407_v50 = vpop.f32.mrb[118].mxu1  ;;  %v10413_v62 = vadd.f32 %v10346_v39, %v10192_v32  ;;  %v5134_v39 = vsub.f32 0.0, %v10393_v20 }
 0x4da   : > { %v10409_v10 = vpop.f32.mrb[119].mxu0  ;;  %v7648_v49 = vpop.eup %7647  ;;  %7667 = vrcp.f32 %v5339_v60 }
 0x4db   : > { %11161 = vst [vmem:[#allocation27_spill] sm:$0xff] %v10413_v62  ;;  %v10415_v28 = vpop.f32.mrb[119].mxu1  ;;  %v7650_v11 = vpop.eup %7649  ;;  %7669 = vrcp.f32 %v5341_v9  ;;  %v5354_v25 = vadd.f32 1.0, %v7648_v49  ;;  %v5296_v9 = vmul.f32 1.442695, %v5179_v15  ;;  %v5136_v49 = vsub.f32 0.0, %v10401_v43 }
 0x4dc   : > { %v10422_v45 = vpop.eup %7651  ;;  %v10425_v60 = vmul.f32 %v7650_v11, %v10253_v63  ;;  %7671 = vpow2.f32 %v5266_v53  ;;  %v5137_v63 = vsub.f32 0.0, %v10413_v62  ;;  %v10437_v53 = vadd.f32 %v10356_v36, %v10203_v40 }
 0x4dd   : > { %v10428_v14 = vpop.eup %7653  ;;  %7673 = vrcp.f32 %v5354_v25  ;;  %v5300_v11 = vmul.f32 1.442695, %v5181_v7  ;;  %v5150_v25 = vsub.f32 0.0, %v10420_v23  ;;  %v5206_v43 = vmul.f32 1.442695, %v5134_v39 }
 0x4de   : > { %v7656_v32 = vpop.eup %7655  ;;  %7675 = vpow2.f32 %v5264_v18  ;;  %v5447_v18 = vmul.f32 %v10286_v0, %v10201_v16  ;;  %v5465_v36 = vmul.f32 %v10316_v41, %v10225_v21  ;;  %v5210_v5 = vmul.f32 1.442695, %v5136_v49 }
 0x4df   : > { %v7658_v19 = vpop.eup %7657  ;;  %7677 = vpow2.f32 %v5268_v29  ;;  %v5208_v7 = vmul.f32 1.442695, %v5135_v46  ;;  %v5212_v62 = vmul.f32 1.442695, %v5137_v63  ;;  %v5152_v23 = vsub.f32 0.0, %v10437_v53 }
 0x4e0   : > { %v7660_v15 = vpop.eup %7659  ;;  %7679 = vpow2.f32 %v5294_v57  ;;  %v10450_v30 = vmul.f32 %v7656_v32, %v10265_v3  ;;  %v5238_v16 = vmul.f32 1.442695, %v5150_v25  ;;  %v10458_v21 = vmul.f32 %v7658_v19, %v10268_v27 }
 0x4e1   : > { %v10442_v20 = vpop.eup %7661  ;;  %7681 = vpow2.f32 %v5298_v17  ;;  %v6850_v57 = vpack.c.bf16 %v5463_v58, %v5447_v18  ;;  %v5449_v32 = vmul.f32 %v10306_v13, %v10207_v33  ;;  %v10483_v58 = vadd.f32 %v10375_v22, %v10211_v31 }
 0x4e2   : > { %v7664_v29 = vpop.eup %7663  ;;  %7683 = vpow2.f32 %v5296_v9  ;;  %v11163_v17 = vpack.c.bf16 %v10302_v47, %v10281_v42  ;;  %v10504_v42 = vmul.f32 %v10422_v45, %v10256_v54  ;;  %v10516_v49 = vmul.f32 %v7660_v15, %v10271_v37 }
 0x4e3   : > { %v7666_v38 = vpop.eup %7665  ;;  %v10453_v4 = vmul.f32 %v7664_v29, %v10284_v6  ;;  %7685 = vpow2.f32 %v5300_v11  ;;  %v10471_v6 = vadd.f32 %v10358_v59, %v10203_v40  ;;  %6851 = vmatprep.subr.bf16.mxu0 %v6850_v57  ;;  %v6858_v59 = vpack.c.bf16 %v5465_v36, %v5449_v32 }
 0x4e4   : > { %v10455_v0 = vpop.eup %7667  ;;  %v10461_v41 = vmul.f32 %v7666_v38, %v10292_v24  ;;  %7687 = vpow2.f32 %v5206_v43  ;;  %v5242_v38 = vmul.f32 1.442695, %v5152_v23  ;;  %v10477_v43 = vadd.f32 %v10364_v8, %v10203_v40  ;;  %6853 = vmatpush1.bf16.msra.mxu0 %v11163_v17  ;;  %v11174_v24 = vld [vmem:[#allocation16_spill] sm:$0xff] }
 0x4e5   : > { %v10463_v46 = vpop.eup %7669  ;;  %7689 = vpow2.f32 %v5210_v5  ;;  %v10490_v23 = vmul.f32 %v10325_v44, %v10240_v26  ;;  %v10494_v8 = vmul.f32 %v10397_v2, %v10244_v61  ;;  %v5151_v26 = vsub.f32 0.0, %v10471_v6  ;;  %6859 = vmatprep.subr.bf16.mxu1 %v6858_v59 }
 0x4e6   : > { %v7672_v27 = vpop.eup %7671  ;;  %7691 = vpow2.f32 %v5208_v7  ;;  %v10500_v22 = vpop.f32.mrb[120].mxu0  ;;  %v11165_v54 = vpack.c.bf16 %v10309_v1, %v10289_v56  ;;  %v5153_v11 = vsub.f32 0.0, %v10477_v43  ;;  %v5166_v25 = vsub.f32 0.0, %v10483_v58 }
 0x4e7   : > { %v10479_v33 = vpop.eup %7673  ;;  %v5356_v13 = vadd.f32 1.0, %v7672_v27  ;;  %7693 = vpow2.f32 %v5212_v62  ;;  %v10498_v62 = vadd.f32 %v10378_v51, %v10211_v31  ;;  %v10507_v44 = vpop.f32.mrb[120].mxu1  ;;  %v10513_v51 = vmul.f32 %v10428_v14, %v10259_v34 }
 0x4e8   : > { %v7676_v39 = vpop.eup %7675  ;;  %7695 = vpow2.f32 %v5238_v16  ;;  %v10509_v61 = vpop.f32.mrb[121].mxu0  ;;  %6861 = vmatpush1.bf16.msra.mxu1 %v11165_v54  ;;  %v10528_v15 = vadd.f32 %v10380_v55, %v10211_v31  ;;  %v5240_v36 = vmul.f32 1.442695, %v5151_v26  ;;  %v10534_v29 = vadd.f32 %v10383_v35, %v10211_v31 }
 0x4e9   : > { %11164 = vst [vmem:[#allocation32_spill] sm:$0xff] %v10498_v62  ;;  %v7678_v9 = vpop.eup %7677  ;;  %7697 = vrcp.f32 %v5356_v13  ;;  %v5355_v47 = vadd.f32 1.0, %v7676_v39  ;;  %v10521_v45 = vpop.f32.mrb[121].mxu1  ;;  %v5168_v37 = vsub.f32 0.0, %v10498_v62  ;;  %v10542_v55 = vadd.f32 %v10395_v12, %v10236_v48 }
 0x4ea   : > { %v7680_v2 = vpop.eup %7679  ;;  %v5357_v5 = vadd.f32 1.0, %v7678_v9  ;;  %7699 = vpow2.f32 %v5242_v38  ;;  %11166 = vst [vmem:[#allocation34_spill] sm:$0xff] %v10528_v15  ;;  %v10530_v56 = vpop.f32.mrb[122].mxu0  ;;  %11167 = vst [vmem:[#allocation33_spill] sm:$0xff] %v10534_v29  ;;  %v10546_v27 = vadd.f32 %v10407_v50, %v10236_v48  ;;  %v5244_v59 = vmul.f32 1.442695, %v5153_v11 }
 0x4eb   : > { %v7682_v63 = vpop.eup %7681  ;;  %7701 = vrcp.f32 %v5355_v47  ;;  %v5370_v19 = vadd.f32 1.0, %v7680_v2  ;;  %v10536_v7 = vpop.f32.mrb[122].mxu1  ;;  %v5270_v17 = vmul.f32 1.442695, %v5166_v25  ;;  %v10550_v47 = vmul.f32 1.442695, %v5168_v37 }
 0x4ec   : > { %v7684_v34 = vpop.eup %7683  ;;  %7703 = vrcp.f32 %v5357_v5  ;;  %v5372_v14 = vadd.f32 1.0, %v7682_v63  ;;  %v10538_v16 = vpop.f32.mrb[123].mxu0  ;;  %11168 = vst [vmem:[#allocation35_spill] sm:$0xff] %v10546_v27  ;;  %v5167_v26 = vsub.f32 0.0, %v10528_v15  ;;  %v5169_v5 = vsub.f32 0.0, %v10534_v29 }
 0x4ed   : > { %v7686_v1 = vpop.eup %7685  ;;  %7705 = vrcp.f32 %v5370_v19  ;;  %v5371_v18 = vadd.f32 1.0, %v7684_v34  ;;  %v10548_v38 = vpop.f32.mrb[123].mxu1  ;;  %v10558_v54 = vadd.f32 %v10409_v10, %v10236_v48  ;;  %v5182_v34 = vsub.f32 0.0, %v10542_v55 }
 0x4ee   : > { %v7688_v57 = vpop.eup %7687  ;;  %7707 = vrcp.f32 %v5372_v14  ;;  %v5373_v32 = vadd.f32 1.0, %v7686_v1  ;;  %v10553_v12 = vpop.f32.mrb[124].mxu0  ;;  %v5184_v14 = vsub.f32 0.0, %v10546_v27  ;;  %v10570_v10 = vadd.f32 %v10415_v28, %v10236_v48  ;;  %v10587_v28 = vld [vmem:[%s10933_s6] sm:$0x1]  ;;  %v11188_v27 = vld [vmem:[#allocation14_spill] sm:$0xff] }
 0x4ef   : > { %v7690_v13 = vpop.eup %7689  ;;  %7709 = vrcp.f32 %v5371_v18  ;;  %v5326_v35 = vadd.f32 1.0, %v7688_v57  ;;  %11169 = vst [vmem:[#allocation29_spill] sm:$0xff] %v10558_v54  ;;  %v10560_v63 = vpop.f32.mrb[124].mxu1  ;;  %v6854_v57 = vpack.c.bf16 %v10504_v42, %v10490_v23 }
 0x4f0   : > { %v7692_v39 = vpop.eup %7691  ;;  %7711 = vrcp.f32 %v5373_v32  ;;  %v5328_v9 = vadd.f32 1.0, %v7690_v13  ;;  %v10562_v19 = vpop.f32.mrb[125].mxu0  ;;  %11170 = vst [vmem:[#allocation36_spill] sm:$0xff] %v10570_v10  ;;  %v10576_v13 = vmul.f32 %v10479_v33, %v10321_v52  ;;  %v5272_v52 = vmul.f32 1.442695, %v5167_v26 }
 0x4f1   : > { %v7694_v2 = vpop.eup %7693  ;;  %7713 = vrcp.f32 %v5326_v35  ;;  %v5327_v50 = vadd.f32 1.0, %v7692_v39  ;;  %v10566_v37 = vpop.f32.mrb[125].mxu1  ;;  %v11171_v35 = vld [vmem:[#allocation12_spill] sm:$0xff]  ;;  %v5183_v33 = vsub.f32 0.0, %v10558_v54  ;;  %6855 = vmatprep.subr.bf16.mxu0 %v6854_v57  ;;  %v5306_v3 = vmul.f32 1.442695, %v5184_v14 }
 0x4f2   : > { %v7696_v11 = vpop.eup %7695  ;;  %7715 = vrcp.f32 %v5328_v9  ;;  %v5329_v25 = vadd.f32 1.0, %v7694_v2  ;;  %v10580_v39 = vadd.f32 %v10500_v22, %v11171_v35  ;;  %v6862_v9 = vpack.c.bf16 %v10513_v51, %v10494_v8  ;;  %v10589_v2 = vpop.f32.mrb[126].mxu0 }
 0x4f3   : > { %v7698_v1 = vpop.eup %7697  ;;  %7717 = vrcp.f32 %v5327_v50  ;;  %v5342_v18 = vadd.f32 1.0, %v7696_v11  ;;  %v10592_v50 = vpop.f32.mrb[126].mxu1  ;;  %v5276_v8 = vmul.f32 1.442695, %v5169_v5  ;;  %v5302_v51 = vmul.f32 1.442695, %v5182_v34 }
 0x4f4   : > { %v7700_v32 = vpop.eup %7699  ;;  %7719 = vrcp.f32 %v5329_v25  ;;  %11172 = vst [vmem:[#allocation12_spill] sm:$0xff] %v10580_v39  ;;  %v10594_v22 = vpop.f32.mrb[127].mxu0  ;;  %v10598_v25 = vadd.f32 %v10507_v44, %v11171_v35  ;;  %6863 = vmatprep.subr.bf16.mxu1 %v6862_v9  ;;  %v5185_v29 = vsub.f32 0.0, %v10570_v10  ;;  %v11178_v5 = vld [vmem:[#allocation18_spill] sm:$0xff]  ;;  %v11180_v9 = vld [vmem:[#allocation25_spill] sm:$0xff]  ;;  %v10619_v14 = vadd.f32 %v10521_v45, %v11171_v35 }
 0x4f5   : > { %v7702_v23 = vpop.eup %7701  ;;  %7721 = vrcp.f32 %v5342_v18  ;;  %v5344_v42 = vadd.f32 1.0, %v7700_v32  ;;  %v11175_v18 = vld [vmem:[#allocation15_spill] sm:$0xff]  ;;  %v10603_v26 = vpop.f32.mrb[127].mxu1  ;;  %v11179_v44 = vpack.c.bf16 %v10425_v60, %v11178_v5  ;;  %v5304_v60 = vmul.f32 1.442695, %v5183_v33 }
 0x4f6   : > { %v7704_v11 = vpop.eup %7703  ;;  %7723 = vpow2.f32 %v5240_v36  ;;  %11173 = vst [vmem:[#allocation37_spill] sm:$0xff] %v10598_v25  ;;  %v11176_v32 = vpack.c.bf16 %v11174_v24, %v11175_v18  ;;  %v10608_v36 = vadd.f32 %v10509_v61, %v11171_v35  ;;  %v5138_v24 = vsub.f32 0.0, %v10580_v39  ;;  %v11181_v18 = vld [vmem:[#allocation22_spill] sm:$0xff]  ;;  %v11186_v33 = vld [vmem:[#allocation23_spill] sm:$0xff] }
 0x4f7   : > { %v7706_v57 = vpop.eup %7705  ;;  %7725 = vrcp.f32 %v5344_v42  ;;  %6865 = vmatpush1.bf16.msra.mxu1 %v11179_v44  ;;  %v10624_v61 = vmul.f32 %v7698_v1, %v11181_v18  ;;  %v5140_v45 = vsub.f32 0.0, %v10598_v25  ;;  %v10639_v1 = vadd.f32 %v10530_v56, %v10203_v40  ;;  %v11184_v44 = vld [vmem:[#allocation13_spill] sm:$0xff]  ;;  %v11187_v39 = vld [vmem:[#allocation26_spill] sm:$0xff] }
 0x4f8   : > { %6857 = vmatpush1.bf16.msra.mxu0 %v11176_v32  ;;  %11177 = vst [vmem:[#allocation16_spill] sm:$0xff] %v10608_v36  ;;  %v7708_v34 = vpop.eup %7707  ;;  %v10614_v54 = vmul.f32 %v7706_v57, %v11180_v9  ;;  %7727 = vpow2.f32 %v5244_v59  ;;  %v11182_v32 = vld [vmem:[#allocation17_spill] sm:$0xff]  ;;  %v5139_v5 = vsub.f32 0.0, %v10608_v36  ;;  %v5308_v9 = vmul.f32 1.442695, %v5185_v29 }
 0x4f9   : > { %v10621_v42 = vpop.eup %7709  ;;  %v10627_v10 = vmul.f32 %v7708_v34, %v11182_v32  ;;  %7729 = vpow2.f32 %v5270_v17  ;;  %v11183_v17 = vmov 0.0   ;;  %v5453_v34 = vmul.f32 %v10442_v20, %v11184_v44  ;;  %v11185_v57 = vld [vmem:[#allocation21_spill] sm:$0xff] }
 0x4fa   : > { %v10631_v59 = vpop.eup %7711  ;;  %7731 = vpow2.f32 %v10550_v47  ;;  %6594 = vmatmul.mubr.msk.f32.vlgmr.msra.gmra.mrb[128].mxu1 %vm2145_vm1, %v10587_v28  ;;  %v10649_v47 = vadd.f32 %v10536_v7, %v10203_v40  ;;  %v5141_v18 = vsub.f32 0.0, %v10619_v14  ;;  %v5469_v36 = vmul.f32 %v10463_v46, %v11186_v33  ;;  %v11189_v46 = vld [vmem:[#allocation30_spill] sm:$0xff] }
 0x4fb   : > { %6593 = vmatmul.mubr.msk.f32.vlgmr.msra.gmra.mrb[128].mxu0 %vm2145_vm1, %v10587_v28  ;;  %v7714_v35 = vpop.eup %7713  ;;  %7733 = vpow2.f32 %v5272_v52  ;;  %5793 = vmatprep.mubr.f32.mxu1 %v11183_v17  ;;  %v5467_v52 = vmul.f32 %v10455_v0, %v11185_v57  ;;  %v5214_v7 = vmul.f32 1.442695, %v5138_v24  ;;  %v10660_v15 = vmul.f32 %v7702_v23, %v11187_v39  ;;  %v11190_v24 = vld [vmem:[#allocation31_spill] sm:$0xff] }
 0x4fc   : > { %5722 = vmatprep.mubr.f32.mxu0 %v11183_v17  ;;  %v7716_v56 = vpop.eup %7715  ;;  %7735 = vpow2.f32 %v5276_v8  ;;  %v10663_v62 = vmul.f32 %v7704_v11, %v11188_v27  ;;  %v5218_v20 = vmul.f32 1.442695, %v5140_v45  ;;  %v5216_v8 = vmul.f32 1.442695, %v5139_v5 }
 0x4fd   : > { %v7718_v32 = vpop.eup %7717  ;;  %7737 = vpow2.f32 %v5302_v51  ;;  %v5154_v44 = vsub.f32 0.0, %v10639_v1  ;;  %v5156_v0 = vsub.f32 0.0, %v10649_v47  ;;  %v10668_v51 = vmul.f32 %v7714_v35, %v11189_v46 }
 0x4fe   : > { %v7720_v25 = vpop.eup %7719  ;;  %7739 = vpow2.f32 %v5306_v3  ;;  %v10673_v39 = vmul.f32 1.442695, %v5141_v18  ;;  %v11191_v3 = vld [vmem:[#allocation24_spill] sm:$0xff] }
 0x4ff   : > { %v7722_v29 = vpop.eup %7721  ;;  %7741 = vpow2.f32 %v5304_v60  ;;  %v10676_v23 = vmul.f32 %v7716_v56, %v11191_v3  ;;  %v6866_v60 = vpack.c.bf16 %v5467_v52, %v10516_v49  ;;  %v10684_v46 = vmul.f32 1.442695, %v5154_v44 }
 0x500   : > { %v7724_v57 = vpop.eup %7723  ;;  %v10671_v33 = vmul.f32 %v7722_v29, %v11190_v24  ;;  %7743 = vpow2.f32 %v5308_v9  ;;  %v6874_v29 = vpack.c.bf16 %v5469_v36, %v5453_v34  ;;  %v10688_v56 = vadd.f32 %v10538_v16, %v10203_v40 }
 0x501   : > { %v7726_v27 = vpop.eup %7725  ;;  %v5343_v11 = vadd.f32 1.0, %v7724_v57  ;;  %7745 = vpow2.f32 %v5214_v7  ;;  %6867 = vmatprep.subr.bf16.mxu0 %v6866_v60  ;;  %v11192_v36 = vpack.c.bf16 %v10453_v4, %v10450_v30  ;;  %v10703_v57 = vadd.f32 %v10553_v12, %v10211_v31 }
 0x502   : > { %v7728_v45 = vpop.eup %7727  ;;  %v6884_v5 = vpack.c.bf16 %v10671_v33, %v10668_v51  ;;  %v10682_v35 = vmul.f32 %v7726_v27, %v10437_v53  ;;  %7747 = vpow2.f32 %v5218_v20  ;;  %v10694_v53 = vadd.f32 %v10548_v38, %v10203_v40  ;;  %6875 = vmatprep.subr.bf16.mxu1 %v6874_v29  ;;  %v11193_v20 = vld [vmem:[#allocation19_spill] sm:$0xff]  ;;  %v11195_v38 = vld [vmem:[#allocation20_spill] sm:$0xff] }
 0x503   : > { %v7730_v9 = vpop.eup %7729  ;;  %7749 = vrcp.f32 %v5343_v11  ;;  %v5345_v18 = vadd.f32 1.0, %v7728_v45  ;;  %6869 = vmatpush1.bf16.msra.mxu0 %v11192_v36  ;;  %v5499_v16 = vmul.f32 %v10621_v42, %v11193_v20  ;;  %v5501_v24 = vmul.f32 %v10631_v59, %v11195_v38  ;;  %v11197_v29 = vld [vmem:[#allocation27_spill] sm:$0xff]  ;;  %v11200_v33 = vld [vmem:[#allocation32_spill] sm:$0xff] }
 0x504   : > { %v7732_v49 = vpop.eup %7731  ;;  %v6892_v52 = vpack.c.bf16 %v10682_v35, %v10676_v23  ;;  %v5358_v7 = vadd.f32 1.0, %v7730_v9  ;;  %7751 = vpow2.f32 %v5216_v8  ;;  %v11194_v8 = vpack.c.bf16 %v10461_v41, %v10458_v21  ;;  %v11196_v21 = vld [vmem:[#allocation28_spill] sm:$0xff] }
 0x505   : > { %v7734_v34 = vpop.eup %7733  ;;  %7753 = vrcp.f32 %v5345_v18  ;;  %v5360_v44 = vadd.f32 1.0, %v7732_v49  ;;  %v10710_v4 = vmul.f32 1.442695, %v5156_v0  ;;  %v5155_v3 = vsub.f32 0.0, %v10688_v56  ;;  %v11205_v35 = vld [vmem:[#allocation36_spill] sm:$0xff] }
 0x506   : > { %6877 = vmatpush1.bf16.msra.mxu1 %v11194_v8  ;;  %v7736_v40 = vpop.eup %7735  ;;  %7755 = vrcp.f32 %v5358_v7  ;;  %v5359_v30 = vadd.f32 1.0, %v7734_v34  ;;  %v10715_v12 = vadd.f32 %v10560_v63, %v10211_v31  ;;  %v5455_v41 = vmul.f32 %v7718_v32, %v11196_v21 }
 0x507   : > { %v7738_v27 = vpop.eup %7737  ;;  %7757 = vrcp.f32 %v5360_v44  ;;  %v5361_v42 = vadd.f32 1.0, %v7736_v40  ;;  %v5157_v59 = vsub.f32 0.0, %v10694_v53  ;;  %v10720_v0 = vmul.f32 %v7720_v25, %v11197_v29 }
 0x508   : > { %v7740_v11 = vpop.eup %7739  ;;  %7759 = vrcp.f32 %v5359_v30  ;;  %v5374_v60 = vadd.f32 1.0, %v7738_v27  ;;  %v5170_v18 = vsub.f32 0.0, %v10703_v57  ;;  %v10725_v63 = vadd.f32 %v10562_v19, %v10211_v31 }
 0x509   : > { %v7742_v45 = vpop.eup %7741  ;;  %7761 = vrcp.f32 %v5361_v42  ;;  %v5376_v9 = vadd.f32 1.0, %v7740_v11  ;;  %v6870_v32 = vpack.c.bf16 %v5499_v16, %v10660_v15  ;;  %v10730_v25 = vadd.f32 %v10566_v37, %v10211_v31 }
 0x50a   : > { %v7744_v49 = vpop.eup %7743  ;;  %7763 = vrcp.f32 %v5374_v60  ;;  %v5375_v7 = vadd.f32 1.0, %v7742_v45  ;;  %v10734_v20 = vadd.f32 %v10589_v2, %v10236_v48  ;;  %v10738_v19 = vadd.f32 %v10592_v50, %v10236_v48 }
 0x50b   : > { %v7746_v36 = vpop.eup %7745  ;;  %7765 = vrcp.f32 %v5376_v9  ;;  %v5377_v34 = vadd.f32 1.0, %v7744_v49  ;;  %6871 = vmatprep.subr.bf16.mxu0 %v6870_v32  ;;  %v6878_v15 = vpack.c.bf16 %v5501_v24, %v10663_v62  ;;  %v5248_v38 = vmul.f32 1.442695, %v5155_v3 }
 0x50c   : > { %v7748_v44 = vpop.eup %7747  ;;  %7767 = vrcp.f32 %v5375_v7  ;;  %v5330_v8 = vadd.f32 1.0, %v7746_v36  ;;  %v5172_v31 = vsub.f32 0.0, %v10715_v12  ;;  %v11198_v37 = vpack.c.bf16 %v10614_v54, %v10576_v13  ;;  %v11201_v7 = vld [vmem:[#allocation35_spill] sm:$0xff] }
 0x50d   : > { %v7750_v16 = vpop.eup %7749  ;;  %7769 = vrcp.f32 %v5377_v34  ;;  %v5332_v40 = vadd.f32 1.0, %v7748_v44  ;;  %v5171_v50 = vsub.f32 0.0, %v10725_v63  ;;  %v10749_v27 = vadd.f32 %v10594_v22, %v10236_v48  ;;  %6879 = vmatprep.subr.bf16.mxu1 %v6878_v15  ;;  %v11202_v44 = vld [vmem:[#allocation34_spill] sm:$0xff]  ;;  %v11203_v15 = vld [vmem:[#allocation29_spill] sm:$0xff] }
 0x50e   : > { %6873 = vmatpush1.bf16.msra.mxu0 %v11198_v37  ;;  %v7752_v2 = vpop.eup %7751  ;;  %v5471_v30 = vmul.f32 %v7750_v16, %v10471_v6  ;;  %7771 = vrcp.f32 %v5330_v8  ;;  %v5173_v42 = vsub.f32 0.0, %v10730_v25  ;;  %v5186_v3 = vsub.f32 0.0, %v10734_v20 }
 0x50f   : > { %v7754_v62 = vpop.eup %7753  ;;  %7773 = vrcp.f32 %v5332_v40  ;;  %v5331_v24 = vadd.f32 1.0, %v7752_v2  ;;  %v11199_v54 = vpack.c.bf16 %v10627_v10, %v10624_v61  ;;  %v5188_v22 = vsub.f32 0.0, %v10738_v19  ;;  %v11204_v40 = vld [vmem:[#allocation33_spill] sm:$0xff] }
 0x510   : > { %v7756_v6 = vpop.eup %7755  ;;  %v5473_v13 = vmul.f32 %v7754_v62, %v10477_v43  ;;  %7775 = vpow2.f32 %v10673_v39  ;;  %v6882_v11 = vpack.c.bf16 %v5471_v30, %v5455_v41  ;;  %v5252_v60 = vmul.f32 1.442695, %v5157_v59 }
 0x511   : > { %6881 = vmatpush1.bf16.msra.mxu1 %v11199_v54  ;;  %6595 = vmatmul.mubr.msk.f32.vlgmr.msra.gmra.mrb[130].mxu0 %vm2145_vm1, %v10587_v28  ;;  %v7758_v21 = vpop.eup %7757  ;;  %7777 = vrcp.f32 %v5331_v24  ;;  %v10763_v45 = vadd.f32 %v10603_v26, %v10236_v48  ;;  %v5278_v43 = vmul.f32 1.442695, %v5170_v18  ;;  %v5187_v61 = vsub.f32 0.0, %v10749_v27 }
 0x512   : > { %5864 = vmatprep.mubr.f32.mxu0 %v11183_v17  ;;  %v7760_v10 = vpop.eup %7759  ;;  %7779 = vpow2.f32 %v10684_v46  ;;  %6883 = vmatprep.subr.bf16.mxu0 %v6882_v11  ;;  %v6890_v39 = vpack.c.bf16 %v5473_v13, %v10720_v0  ;;  %v5282_v59 = vmul.f32 1.442695, %v5172_v31  ;;  %v5280_v48 = vmul.f32 1.442695, %v5171_v50 }
 0x513   : > { %v7762_v41 = vpop.eup %7761  ;;  %7781 = vpow2.f32 %v10710_v4  ;;  %6885 = vmatpush1.bf16.msra.mxu0 %v6884_v5  ;;  %v5284_v46 = vmul.f32 1.442695, %v5173_v42  ;;  %v5310_v29 = vmul.f32 1.442695, %v5186_v3  ;;  %v5314_v9 = vmul.f32 1.442695, %v5188_v22 }
 0x514   : > { %6596 = vmatmul.mubr.msk.f32.vlgmr.msra.gmra.mrb[130].mxu1 %vm2145_vm1, %v10587_v28  ;;  %v7764_v26 = vpop.eup %7763  ;;  %7783 = vpow2.f32 %v5248_v38  ;;  %6891 = vmatprep.subr.bf16.mxu1 %v6890_v39  ;;  %v5486_v18 = vmul.f32 %v7756_v6, %v10483_v58  ;;  %v5189_v4 = vsub.f32 0.0, %v10763_v45  ;;  %v5488_v5 = vmul.f32 %v7758_v21, %v11200_v33 }
 0x515   : > { %5935 = vmatprep.mubr.f32.mxu1 %v11183_v17  ;;  %v7766_v0 = vpop.eup %7765  ;;  %v5502_v49 = vmul.f32 %v7764_v26, %v10542_v55  ;;  %7785 = vpow2.f32 %v5252_v60  ;;  %6893 = vmatpush1.bf16.msra.mxu1 %v6892_v52  ;;  %v5312_v36 = vmul.f32 1.442695, %v5187_v61  ;;  %v5487_v8 = vmul.f32 %v7760_v10, %v11202_v44 }
 0x516   : > { %v7768_v51 = vpop.eup %7767  ;;  %v5504_v32 = vmul.f32 %v7766_v0, %v11201_v7  ;;  %7787 = vpow2.f32 %v5278_v43  ;;  %v5489_v38 = vmul.f32 %v7762_v41, %v11204_v40  ;;  %v5316_v30 = vmul.f32 1.442695, %v5189_v4 }
 0x517   : > { %v7770_v34 = vpop.eup %7769  ;;  %v6888_v58 = vpack.c.bf16 %v5502_v49, %v5486_v18  ;;  %v5503_v55 = vmul.f32 %v7768_v51, %v11203_v15  ;;  %7789 = vpow2.f32 %v5282_v59  ;;  %v11208_v15 = vld [vmem:[#allocation16_spill] sm:$0xff] }
 0x518   : > { %v10786_v16 = vpop.eup %7771  ;;  %v6896_v23 = vpack.c.bf16 %v5504_v32, %v5488_v5  ;;  %v5505_v52 = vmul.f32 %v7770_v34, %v11205_v35  ;;  %7791 = vpow2.f32 %v5280_v48  ;;  %v11206_v5 = vld [vmem:[#allocation12_spill] sm:$0xff]  ;;  %v11207_v34 = vld [vmem:[#allocation37_spill] sm:$0xff] }
 0x519   : > { %v7774_v31 = vpop.eup %7773  ;;  %7793 = vpow2.f32 %v5284_v46  ;;  %v6886_v37 = vpack.c.bf16 %v5503_v55, %v5487_v8  ;;  %v5458_v7 = vmul.f32 %v10786_v16, %v11206_v5 }
 0x51a   : > { %v7776_v2 = vpop.eup %7775  ;;  %7795 = vpow2.f32 %v5310_v29  ;;  %v6894_v50 = vpack.c.bf16 %v5505_v52, %v5489_v38  ;;  %v5460_v44 = vmul.f32 %v7774_v31, %v11207_v34  ;;  %v7841_v34 = vld [vmem:[%s8106_s25 + $0x20] sm:$0x3f] }
 0x51b   : > { %v7778_v62 = vpop.eup %7777  ;;  %v5333_v24 = vadd.f32 1.0, %v7776_v2  ;;  %7797 = vpow2.f32 %v5314_v9  ;;  %6887 = vmatprep.subr.bf16.mxu0 %v6886_v37 }
 0x51c   : > { %v7780_v42 = vpop.eup %7779  ;;  %7799 = vpow2.f32 %v5312_v36  ;;  %6895 = vmatprep.subr.bf16.mxu1 %v6894_v50  ;;  %6889 = vmatpush1.bf16.msra.mxu0 %v6888_v58  ;;  %v5459_v55 = vmul.f32 %v7778_v62, %v11208_v15 }
 0x51d   : > { %v7782_v3 = vpop.eup %7781  ;;  %7801 = vrcp.f32 %v5333_v24  ;;  %v5346_v54 = vadd.f32 1.0, %v7780_v42  ;;  %6897 = vmatpush1.bf16.msra.mxu1 %v6896_v23 }
 0x51e   : > { %v7784_v6 = vpop.eup %7783  ;;  %v5348_v13 = vadd.f32 1.0, %v7782_v3  ;;  %7803 = vpow2.f32 %v5316_v30 }
 0x51f   : > { %v7786_v22 = vpop.eup %7785  ;;  %7805 = vrcp.f32 %v5346_v54  ;;  %v5347_v11 = vadd.f32 1.0, %v7784_v6  ;;  %6597 = vmatmul.mubr.msk.f32.vlgmr.msra.gmra.mrb[132].mxu0 %vm2145_vm1, %v10587_v28 }
 0x520   : > { %v7788_v21 = vpop.eup %7787  ;;  %7807 = vrcp.f32 %v5348_v13  ;;  %v5349_v60 = vadd.f32 1.0, %v7786_v22  ;;  %6598 = vmatmul.mubr.msk.f32.vlgmr.msra.gmra.mrb[132].mxu1 %vm2145_vm1, %v10587_v28  ;;  %6006 = vmatprep.mubr.f32.mxu0 %v11183_v17 }
 0x521   : > { %v7790_v10 = vpop.eup %7789  ;;  %7809 = vrcp.f32 %v5347_v11  ;;  %v5362_v43 = vadd.f32 1.0, %v7788_v21  ;;  %6077 = vmatprep.mubr.f32.mxu1 %v11183_v17  ;;  %v7838_v21 = vld [vmem:[%s8106_s25 + $0x10] sm:$0x3f] }
 0x522   : > { %v7792_v61 = vpop.eup %7791  ;;  %7811 = vrcp.f32 %v5349_v60  ;;  %v5364_v39 = vadd.f32 1.0, %v7790_v10  ;;  %v6086_v60 = vrot.slane %v7838_v21, 4  ;;  %v7839_v10 = vld [vmem:[%s8106_s25 + $0x8] sm:$0x3f]  ;;  %v7848_v21 = vld [vmem:[%s8106_s25 + $0x58] sm:$0x3f] }
 0x523   : > { %v7794_v41 = vpop.eup %7793  ;;  %7813 = vrcp.f32 %v5362_v43  ;;  %v5363_v59 = vadd.f32 1.0, %v7792_v61  ;;  %v6085_v43 = vrot.slane %v7839_v10, 4 }
 0x524   : > { %v7796_v48 = vpop.eup %7795  ;;  %7815 = vrcp.f32 %v5364_v39  ;;  %v5365_v26 = vadd.f32 1.0, %v7794_v41 }
 0x525   : > { %v7798_v46 = vpop.eup %7797  ;;  %7817 = vrcp.f32 %v5363_v59  ;;  %v5378_v29 = vadd.f32 1.0, %v7796_v48  ;;  %v7840_v48 = vld [vmem:[%s8106_s25 + $0x18] sm:$0x3f] }
 0x526   : > { %v7800_v9 = vpop.eup %7799  ;;  %7819 = vrcp.f32 %v5365_v26  ;;  %v5380_v0 = vadd.f32 1.0, %v7798_v46 }
 0x527   : > { %v7802_v18 = vpop.eup %7801  ;;  %7821 = vrcp.f32 %v5378_v29  ;;  %v5379_v49 = vadd.f32 1.0, %v7800_v9 }
 0x528   : > { %v7804_v4 = vpop.eup %7803  ;;  %7823 = vrcp.f32 %v5380_v0  ;;  %v5461_v35 = vmul.f32 %v7802_v18, %v10619_v14 }
 0x529   : > { %v7806_v17 = vpop.eup %7805  ;;  %7825 = vrcp.f32 %v5379_v49  ;;  %v5381_v51 = vadd.f32 1.0, %v7804_v4  ;;  %v11209_v4 = vld [vmem:[#allocation11_spill] sm:$0xff] }
 0x52a   : > { %v7808_v33 = vpop.eup %7807  ;;  %v5474_v32 = vmul.f32 %v7806_v17, %v10639_v1 }
 0x52b   : > { %v7810_v36 = vpop.eup %7809  ;;  %v5476_v8 = vmul.f32 %v7808_v33, %v10649_v47  ;;  %7827 = vrcp.f32 %v5381_v51 }
 0x52c   : > { %v7812_v58 = vpop.eup %7811  ;;  %v6900_v40 = vpack.c.bf16 %v5474_v32, %v5458_v7  ;;  %v5475_v38 = vmul.f32 %v7810_v36, %v10688_v56 }
 0x52d   : > { %v7814_v23 = vpop.eup %7813  ;;  %v6908_v52 = vpack.c.bf16 %v5476_v8, %v5460_v44  ;;  %v5477_v16 = vmul.f32 %v7812_v58, %v10694_v53  ;;  %v6088_v44 = vrot.slane %v7841_v34, 4  ;;  %v7842_v58 = vld [vmem:[%s8106_s25 + $0x28] sm:$0x3f] }
 0x52e   : > { %v7816_v37 = vpop.eup %7815  ;;  %v6898_v1 = vpack.c.bf16 %v5475_v38, %v5459_v55  ;;  %v5490_v62 = vmul.f32 %v7814_v23, %v10703_v57  ;;  %v6089_v15 = vrot.slane %v7842_v58, 4 }
 0x52f   : > { %v7818_v2 = vpop.eup %7817  ;;  %v6906_v30 = vpack.c.bf16 %v5477_v16, %v5461_v35  ;;  %v5492_v14 = vmul.f32 %v7816_v37, %v10715_v12  ;;  %v7955_v12 = vmov 1966171168   ;;  %v7844_v16 = vld [vmem:[%s8106_s25 + $0x38] sm:$0x3f] }
 0x530   : > { %v7820_v31 = vpop.eup %7819  ;;  %6899 = vmatprep.subr.bf16.mxu0 %v6898_v1  ;;  %v5491_v42 = vmul.f32 %v7818_v2, %v10725_v63  ;;  %v6153_v63 = vunpack.c.l.s4 %v7955_v12  ;;  %v6091_v37 = vrot.slane %v7844_v16, 4 }
 0x531   : > { %v7822_v47 = vpop.eup %7821  ;;  %6907 = vmatprep.subr.bf16.mxu1 %v6906_v30  ;;  %6901 = vmatpush1.bf16.msra.mxu0 %v6900_v40  ;;  %v5493_v22 = vmul.f32 %v7820_v31, %v10730_v25  ;;  %v10817_v25 = vstv %s5511_s27  ;;  %v7843_v40 = vld [vmem:[%s8106_s25 + $0x30] sm:$0x3f] }
 0x532   : > { %v7824_v50 = vpop.eup %7823  ;;  %v5506_v56 = vmul.f32 %v7822_v47, %v10734_v20  ;;  %6909 = vmatpush1.bf16.msra.mxu1 %v6908_v52  ;;  %v6154_v61 = vunpack.c.0.s8 %v6153_v63  ;;  %v6090_v38 = vrot.slane %v7843_v40, 4 }
 0x533   : > { %v7826_v24 = vpop.eup %7825  ;;  %v5508_v53 = vmul.f32 %v7824_v50, %v10738_v19  ;;  %v7837_v19 = vld [vmem:[%s8106_s25] sm:$0x3f] }
 0x534   : > { %v6904_v3 = vpack.c.bf16 %v5506_v56, %v5490_v62  ;;  %v5507_v54 = vmul.f32 %v7826_v24, %v10749_v27  ;;  %v6084_v27 = vrot.slane %v7837_v19, 4  ;;  %v10828_v17 = vsub.s32 %v6154_v61, %v11209_v4 }
 0x535   : > { %v7828_v6 = vpop.eup %7827  ;;  %v6912_v13 = vpack.c.bf16 %v5508_v53, %v5492_v14 }
 0x536   : > { %v5509_v57 = vmul.f32 %v7828_v6, %v10763_v45  ;;  %v6902_v20 = vpack.c.bf16 %v5507_v54, %v5491_v42  ;;  %v7845_v6 = vld [vmem:[%s8106_s25 + $0x40] sm:$0x3f] }
 0x538   : > { %6903 = vmatprep.subr.bf16.mxu0 %v6902_v20  ;;  %v6910_v11 = vpack.c.bf16 %v5509_v57, %v5493_v22  ;;  %v7846_v57 = vld [vmem:[%s8106_s25 + $0x50] sm:$0x3f] }
 0x539   : > { %6905 = vmatpush1.bf16.msra.mxu0 %v6904_v3  ;;  %v6094_v20 = vrot.slane %v7846_v57, 4 }
 0x53a   : > { %6911 = vmatprep.subr.bf16.mxu1 %v6910_v11  ;;  %v7847_v11 = vld [vmem:[%s8106_s25 + $0x48] sm:$0x3f] }
 0x53b   : > { %6913 = vmatpush1.bf16.msra.mxu1 %v6912_v13  ;;  %v6092_v13 = vrot.slane %v7845_v6, 4  ;;  %v6093_v12 = vrot.slane %v7847_v11, 4 }
 0x53c   : > { %6599 = vmatmul.mubr.msk.f32.vlgmr.msra.gmra.mrb[134].mxu0 %vm2145_vm1, %v10587_v28 }
 0x53e   : > { %6600 = vmatmul.mubr.msk.f32.vlgmr.msra.gmra.mrb[134].mxu1 %vm2145_vm1, %v10587_v28  ;;  %v6087_v28 = vrot.slane %v7840_v48, 4 }
 0x5cd   : > { %v5653_v41 = vpop.f32.mrb[128].mxu1 }
 0x5ce   : > { %v5582_v45 = vpop.f32.mrb[128].mxu0  ;;  %v5654_v26 = vadd.f32 %v5653_v41, %v10817_v25  ;;  %v5655_v29 = vpop.f32.mrb[129].mxu1 }
 0x5cf   : > { %v5583_v39 = vadd.f32 %v5582_v45, %v10817_v25  ;;  %v5584_v59 = vpop.f32.mrb[129].mxu0  ;;  %v5656_v0 = vadd.f32 %v5655_v29, %v10817_v25 }
 0x5d0   : > { %v5585_v46 = vadd.f32 %v5584_v59, %v10817_v25  ;;  %v6118_v18 = vadd.f32 %v6086_v60, %v5654_v26  ;;  %v6095_v60 = vrot.slane %v7848_v21, 4 }
 0x5d1   : > { %v6116_v9 = vadd.f32 %v6084_v27, %v5583_v39  ;;  %v6119_v51 = vadd.f32 %v6087_v28, %v5656_v0 }
 0x5d2   : > { %v6117_v49 = vadd.f32 %v6085_v43, %v5585_v46 }
 0x5d3   : > { %v6149_v5 = vcombine.low %v6118_v18, %v6119_v51  ;;  %v7849_v18 = vld [vmem:[%s8106_s25 + $0x60] sm:$0x3f]  ;;  %v7850_v51 = vld [vmem:[%s8106_s25 + $0x68] sm:$0x3f] }
 0x5d4   : > { %v6148_v33 = vcombine.low %v6116_v9, %v6117_v49  ;;  %v6096_v49 = vrot.slane %v7849_v18, 4 }
 0x5d5   : > { %v6165_v32 = vrot.slane %v6149_v5, %v10828_v17 }
 0x5d6   : > { %v6158_v7 = vrot.slane %v6148_v33, %v10828_v17  ;;  %v6097_v33 = vrot.slane %v7850_v51, 4 }
 0x5d8   : > { %v6180_v36 = vcombine.low %v6158_v7, %v6165_v32  ;;  %v7851_v7 = vld [vmem:[%s8106_s25 + $0x70] sm:$0x3f] }
 0x5d9   : > { %v6098_v32 = vrot.slane %v7851_v7, 4 }
 0x5da   : > { %v6188_v42 = vrot.slane %v6180_v36, %v10828_v17 }
 0x5e4   : > { %v5724_v8 = vpop.f32.mrb[130].mxu0 }
 0x5e5   : > { %v5725_v55 = vadd.f32 %v5724_v8, %v10817_v25  ;;  %v5726_v23 = vpop.f32.mrb[131].mxu0  ;;  %v7852_v8 = vld [vmem:[%s8106_s25 + $0x78] sm:$0x3f]  ;;  %s6251_s25 = scalar_lea.sflag [#allocation5], %s8102_s13 }
 0x5e6   : > { %v5727_v52 = vadd.f32 %v5726_v23, %v10817_v25  ;;  %v6099_v58 = vrot.slane %v7852_v8, 4 }
 0x5e7   : > { %v5795_v35 = vpop.f32.mrb[130].mxu1  ;;  %v6120_v1 = vadd.f32 %v6088_v44, %v5725_v55 }
 0x5e8   : > { %v5796_v2 = vadd.f32 %v5795_v35, %v10817_v25  ;;  %v5797_v30 = vpop.f32.mrb[131].mxu1  ;;  %v6121_v31 = vadd.f32 %v6089_v15, %v5727_v52 }
 0x5e9   : > { %v5798_v47 = vadd.f32 %v5797_v30, %v10817_v25 }
 0x5ea   : > { %v6122_v50 = vadd.f32 %v6090_v38, %v5796_v2  ;;  %v6150_v62 = vcombine.low %v6120_v1, %v6121_v31 }
 0x5eb   : > { %v6123_v56 = vadd.f32 %v6091_v37, %v5798_v47 }
 0x5ec   : > { %v6172_v24 = vrot.slane %v6150_v62, %v10828_v17 }
 0x5ed   : > { %v6151_v14 = vcombine.low %v6122_v50, %v6123_v56 }
 0x5ef   : > { %v6179_v53 = vrot.slane %v6151_v14, %v10828_v17 }
 0x5f1   : > { %v6181_v3 = vcombine.low %v6172_v24, %v6179_v53 }
 0x5f2   : > { %v5866_v22 = vpop.f32.mrb[132].mxu0 }
 0x5f3   : > { %v6195_v54 = vrot.slane %v6181_v3, %v10828_v17  ;;  %v5867_v19 = vadd.f32 %v5866_v22, %v10817_v25  ;;  %v5937_v27 = vpop.f32.mrb[132].mxu1  ;;  %v5868_v45 = vpop.f32.mrb[133].mxu0 }
 0x5f4   : > { %v5938_v10 = vadd.f32 %v5937_v27, %v10817_v25  ;;  %v5869_v43 = vadd.f32 %v5868_v45, %v10817_v25  ;;  %v5939_v61 = vpop.f32.mrb[133].mxu1 }
 0x5f5   : > { %v6196_v63 = vcombine.low %v6188_v42, %v6195_v54  ;;  %v6124_v39 = vadd.f32 %v6092_v13, %v5867_v19  ;;  %v5940_v41 = vadd.f32 %v5939_v61, %v10817_v25 }
 0x5f6   : > { %v6126_v59 = vadd.f32 %v6094_v20, %v5938_v10  ;;  %v6125_v48 = vadd.f32 %v6093_v12, %v5869_v43 }
 0x5f7   : > { %6248 = vst [vmem:[%s10852_s18] sm:$0xff] %v6196_v63  ;;  %v6127_v28 = vadd.f32 %v6095_v60, %v5940_v41 }
 0x5f8   : > { %v6197_v26 = vcombine.low %v6124_v39, %v6125_v48 }
 0x5f9   : > { %v6198_v46 = vcombine.low %v6126_v59, %v6127_v28 }
 0x5fa   : > { %v6207_v29 = vrot.slane %v6197_v26, %v10828_v17 }
 0x5fb   : > { %v6214_v9 = vrot.slane %v6198_v46, %v10828_v17 }
 0x5fd   : > { %v6229_v0 = vcombine.low %v6207_v29, %v6214_v9 }
 0x5ff   : > { %v6237_v31 = vrot.slane %v6229_v0, %v10828_v17 }
 0x60f   : > { %v6008_v4 = vpop.f32.mrb[134].mxu0 }
 0x610   : > { %v6009_v5 = vadd.f32 %v6008_v4, %v10817_v25  ;;  %v6010_v36 = vpop.f32.mrb[135].mxu0 }
 0x611   : > { %v6079_v34 = vpop.f32.mrb[134].mxu1  ;;  %v6011_v44 = vadd.f32 %v6010_v36, %v10817_v25 }
 0x612   : > { %v6128_v15 = vadd.f32 %v6096_v49, %v6009_v5  ;;  %v6080_v55 = vadd.f32 %v6079_v34, %v10817_v25  ;;  %v6081_v40 = vpop.f32.mrb[135].mxu1 }
 0x613   : > { %v6129_v38 = vadd.f32 %v6097_v33, %v6011_v44  ;;  %v6082_v23 = vadd.f32 %v6081_v40, %v10817_v25 }
 0x614   : > { %v6130_v35 = vadd.f32 %v6098_v32, %v6080_v55 }
 0x615   : > { %v6199_v52 = vcombine.low %v6128_v15, %v6129_v38  ;;  %v6131_v16 = vadd.f32 %v6099_v58, %v6082_v23 }
 0x617   : > { %v6221_v37 = vrot.slane %v6199_v52, %v10828_v17  ;;  %v6200_v1 = vcombine.low %v6130_v35, %v6131_v16 }
 0x619   : > { %v6228_v2 = vrot.slane %v6200_v1, %v10828_v17 }
 0x61b   : > { %v6230_v30 = vcombine.low %v6221_v37, %v6228_v2  ;;  %6257 = sbr.rel (!%p11210_p9) target bundleno = 1597 (0x63d), region = 64 }
 0x61d   : > { %v6244_v47 = vrot.slane %v6230_v30, %v10828_v17 }
 0x61f   : > { %v6245_v50 = vcombine.low %v6237_v31, %v6244_v47 }
 0x621   : > { %6249 = vst [vmem:[%s10852_s18 + $0x8] sm:$0xff] %v6245_v50 }
 0x622   : > { %s11220_s26 = smov (!%p6260_p10, %s6259_s26), 16 }
 0x623   : > { %s10875_s28 = sshll.u32 %s11220_s26, 4 }
 0x624   : > { %s6264_s30 = ssub.s32 256, %s10875_s28 }
 0x625   : > { %6265 = vsyncadd %s6251_s25, %s6264_s30  ;;  %p6604_p13 = scmp.ne.s32.totalorder %s10875_s28, 0  ;;  %s6609_s21 = sshll.u32 %s8031_s8, 8 }
 0x626   : > { %s10885_s17 = scalar_lea.hbm %s10936_s9, %s6609_s21  ;;  %s6270_s19 = sshll.u32 %s10852_s18, 4  ;;  %s6271_s19 = int_to_ptr.vmem [resolvable:$true] %s6270_s19 }
 0x627   : > { %s7881_s24 = scalar_lea.vmem %s6271_s19, %s10875_s28  ;;  %s7956_s20 = smov [#allocation6]  }
 0x628   : > { %p7882_p7 = scmp.ne.s32.totalorder %s6271_s19, %s7881_s24  ;;  %s7885_s27 = sshll.u32 %s7956_s20, 4  ;;  %s7886_s27 = int_to_ptr.vmem [resolvable:$false] %s7885_s27 }
 0x629   : > { %s7887_s29 = scalar_lea.vmem %s7886_s27, 512  ;;  %p7888_p12 = scmp.lt.s32.totalorder %s6271_s19, %s7886_s27 }
 0x62a   : > { %p7883_p8 = pnand %p7882_p7, %p6604_p13  ;;  %p7889_p0 = scmp.lt.s32.totalorder %s7887_s29, %s7881_s24 }
 0x62c   : > { %p7884_p11 = pneg %p7883_p8  ;;  %p7890_p1 = por %p7889_p0, %p7888_p12 }
 0x62e   : > { %p7891_p3 = pnand %p7890_p1, %p7884_p11 }
 0x630   : > { %7894 = shalt.err (!%p7891_p3)
}
 0x631   : > { %s7895_s8 = scalar_lea.hbm %s10885_s17, %s10875_s28  ;;  %s7899_s26 = scalar_lea.hbm %s10936_s9, 640 }
 0x632   : > { %p7896_p2 = scmp.ne.s32.totalorder %s10885_s17, %s7895_s8  ;;  %p7900_p6 = scmp.lt.u32.totalorder %s10885_s17, %s10936_s9 }
 0x633   : > { %p7901_p9 = scmp.lt.u32.totalorder %s7899_s26, %s7895_s8  ;;  %p7903_p7 = scmp.lt.u32.totalorder %s7895_s8, %s10885_s17 }
 0x634   : > { %p7897_p4 = pnand %p7896_p2, %p6604_p13 }
 0x635   : > { %p7902_p10 = por %p7901_p9, %p7900_p6 }
 0x636   : > { %p7898_p5 = pneg %p7897_p4 }
 0x637   : > { %p7904_p8 = por %p7903_p7, %p7902_p10 }
 0x639   : > { %p7905_p11 = pnand %p7904_p8, %p7898_p5 }
 0x63b   : > { %7908 = shalt.err (!%p7905_p11)
}
 0x63c   : > { %6273 = dma.vmem_to_hbm [thread:$0]  (%p6604_p13), %s6271_s19, %s10875_s28, %s10885_s17, %s6251_s25  }
 0x63d PF: > { %p7016_p12 = scmp.ge.s32.totalorder %s7947_s14, 2  ;;  %s6282_s10 = sand.u32 1, %s7935_s11  }
 0x63e   : > { %p11211_p0 = scmp.ne.s32.totalorder %s11015_s22, 0  ;;  %s6283_s15 = scalar_lea.sflag [#allocation5], %s6282_s10 }
 0x640   : > { %p7013_p1 = pnand %p7016_p12, %p11211_p0 }
 0x642   : > { %7930 = dma.done.wait (!%p7013_p1), %s6283_s15, 256  }
 0x643   : > { %7932 = vsyncadd (!%p7013_p1), %s6283_s15, 4294967040  ;;  %s11212_s24 = sld [smem:[#allocation9_spill]]  ;;  %s11213_s13 = sld [smem:[#allocation10_spill]] }
 0x644   : > { %p23_p3 = scmp.ge.s32.totalorder %s8035_s16, 5   ;;  %s11214_s11 = smov %s7939_s12 }
 0x645   : > { %s11216_s14 = smov %s8035_s16 }
 0x646   :  { %25 = sbr.rel (!%p23_p3) target bundleno = 7 (0x7), region = 101 }
 0x649   : > { %s11215_s12 = smov %s11212_s24 }
 0x64d   :  { %6288 = vsyncpa [#allocation4], 1 }
 0x64e   :  { %6290 = vsyncpa [#allocation4 + $0x1], 1 }
 0x64f   :  { %6291 = vsyncpa [#allocation5], 1 }
 0x650   :  { %6293 = vsyncpa [#allocation5 + $0x1], 1 }

</bundles_post_ra>
